<compile_context>
chip_gen: v6e
topology: v6e:2x2x1
jax: 0.10.0
libtpu: 0.0.40
codegen_flags: <defaults>
</compile_context>

<pallas_src>
import math

import jax
import jax.numpy as jnp
from jax import lax
from jax.experimental import pallas as pl
from jax.experimental.pallas import tpu as pltpu


# Sub-pixel decomposition of ConvTranspose2d(kernel=4, stride=2, padding=1):
#   up[2m+ry, 2p+rx, co] = sum over taps ((dy,dx),(ky,kx)) of
#                          x[m+dy, p+dx, ci] * w[ky, kx, ci, co]
_PHASE_TAPS = {
    (0, 0): [((0, 0), (1, 1)), ((0, -1), (1, 3)), ((-1, 0), (3, 1)), ((-1, -1), (3, 3))],
    (0, 1): [((0, 1), (1, 0)), ((0, 0), (1, 2)), ((-1, 1), (3, 0)), ((-1, 0), (3, 2))],
    (1, 0): [((1, 0), (0, 1)), ((1, -1), (0, 3)), ((0, 0), (2, 1)), ((0, -1), (2, 3))],
    (1, 1): [((1, 1), (0, 0)), ((1, 0), (0, 2)), ((0, 1), (2, 0)), ((0, 0), (2, 2))],
}


def _build_view_list():
    """Regroup the 16 taps by input view (dy, dx): 9 views -> 9 MXU matmuls."""
    views = {}
    for phase, taps in _PHASE_TAPS.items():
        for (dy, dx), (ky, kx) in taps:
            views.setdefault((dy, dx), []).append((phase, (ky, kx)))
    return sorted(views.items())


_VIEW_LIST = _build_view_list()   # 9 entries, 16 (phase, weight-slice) pairs total


# ----------------------------------------------------------------------------
# Pallas kernel: fused ConvTranspose2d(4,2,1) + folded-BN affine + ReLU
# ----------------------------------------------------------------------------
def _make_up_kernel(tH, W, C):
    HW = tH * W

    def kernel(x_ref, xt_ref, xb_ref, w_ref, shift_ref, o_ref, xpad_ref):
        # x_ref:     (1, tH, W, C)      main row tile (NHWC)
        # xt_ref:    (1, 1, W, C)       row above the tile (clamped at the top edge)
        # xb_ref:    (1, 1, W, C)       row below the tile (clamped at the bottom edge)
        # w_ref:     (C, 16*C) bf16     folded weights, packed view-major
        # shift_ref: (1, C)   f32       folded conv-bias + BN shift
        # o_ref:     (1, tH, 2, 2W, C)  out[0, m, ry, 2p+rx, :] = up[2m+ry, 2p+rx, :]
        # xpad_ref:  VMEM (tH+2, W+2, C) f32 scratch (1-halo padded tile)
        t = pl.program_id(1)
        nt = pl.num_programs(1)
        f32 = jnp.float32

        # --- assemble the 1-halo padded tile; zero only the thin column halo ----
        zcol = jnp.zeros((tH + 2, 1, C), f32)
        xpad_ref[:, 0:1, :] = zcol
        xpad_ref[:, W + 1:W + 2, :] = zcol
        xpad_ref[0:1, 1:W + 1, :] = jnp.where(t > 0, xt_ref[0].astype(f32), 0.0)
        xpad_ref[tH + 1:tH + 2, 1:W + 1, :] = jnp.where(t < nt - 1,
                                                        xb_ref[0].astype(f32), 0.0)
        xpad_ref[1:tH + 1, 1:W + 1, :] = x_ref[0].astype(f32)
        # TODO(synk): v5e-specific — replace the dx=+-1 misaligned sublane slices below
        # with pltpu.roll along W plus a boundary zero mask (XLU instead of copies).

        # --- 9 view-grouped MXU matmuls (bf16 operands, f32 accumulation) -------
        acc = {}                                   # phase -> (HW, C) f32
        col = 0
        for (dy, dx), taps in _VIEW_LIST:
            k = len(taps)
            lhs = xpad_ref[1 + dy:1 + dy + tH, 1 + dx:1 + dx + W, :]
            lhs = lhs.reshape(HW, C).astype(jnp.bfloat16)
            res = jnp.dot(lhs, w_ref[:, col:col + k * C],
                          preferred_element_type=jnp.float32)     # (HW, k*C)
            for j, (phase, _) in enumerate(taps):
                chunk = res[:, j * C:(j + 1) * C]
                acc[phase] = chunk if phase not in acc else acc[phase] + chunk
            col += k * C

        # --- folded BN shift + ReLU, rx interleave in VMEM, dense lane store ----
        shift = shift_ref[...]                     # (1, C), broadcasts over (HW, C)
        for ry in (0, 1):
            y0 = jnp.maximum(acc[(ry, 0)] + shift, 0.0).reshape(tH, W, C)
            y1 = jnp.maximum(acc[(ry, 1)] + shift, 0.0).reshape(tH, W, C)
            row = jnp.stack([y0, y1], axis=2).reshape(tH, 2 * W, C)   # [., 2p+rx, .]
            o_ref[0, :, ry, :, :] = row.astype(o_ref.dtype)

    return kernel


def mrf_up(x_nhwc, w_packed, shift, tile_h=8):
    """Fused ConvTranspose2d(k=4,s=2,p=1) + BN(inference) + ReLU.  Returns (N,2H,2W,C)."""
    N, H, W, C = x_nhwc.shape
    tH = tile_h if H % tile_h == 0 else H
    # TODO(synk): ragged H (H % tile_h != 0) falls back to whole-image row blocks;
    # a masked last tile would keep the footprint bounded for arbitrary H.
    grid = (N, H // tH)

    cost = pl.CostEstimate(
        flops=2 * N * H * W * 16 * C * C,
        transcendentals=0,
        bytes_accessed=4 * N * H * W * C + 2 * 16 * C * C + 4 * C
                       + 4 * N * 4 * H * W * C)

    out6 = pl.pallas_call(
        _make_up_kernel(tH, W, C),
        out_shape=jax.ShapeDtypeStruct((N, H, 2, 2 * W, C), x_nhwc.dtype),
        grid=grid,
        in_specs=[
            pl.BlockSpec((1, tH, W, C), lambda n, t: (n, t, 0, 0)),
            pl.BlockSpec((1, 1, W, C),
                         lambda n, t: (n, jnp.maximum(t * tH - 1, 0), 0, 0)),
            pl.BlockSpec((1, 1, W, C),
                         lambda n, t: (n, jnp.minimum((t + 1) * tH, H - 1), 0, 0)),
            pl.BlockSpec((C, 16 * C), lambda n, t: (0, 0)),
            pl.BlockSpec((1, C), lambda n, t: (0, 0)),
        ],
        out_specs=pl.BlockSpec((1, tH, 2, 2 * W, C), lambda n, t: (n, t, 0, 0, 0)),
        scratch_shapes=[pltpu.VMEM((tH + 2, W + 2, C), jnp.float32)],
        compiler_params=pltpu.CompilerParams(
            dimension_semantics=("parallel", "parallel"),
            vmem_limit_bytes=64 * 1024 * 1024),
        cost_estimate=cost,
    )(x_nhwc, x_nhwc, x_nhwc, w_packed, shift)

    # (N, H, 2, 2W, C) -> (N, 2H, 2W, C) is a contiguous (free) reshape.
    return out6.reshape(N, 2 * H, 2 * W, C)


# ----------------------------------------------------------------------------
# _MRF forward
# ----------------------------------------------------------------------------
def mrf_forward(channels, params):
    """channels: list of NCHW arrays (len 1 or 2). params: dict for the `up` branch."""
    if len(channels) == 1:
        return channels[0]
    assert len(channels) == 2
    x0, x1 = channels
    w, b = params["w"], params["b"]                       # (Ci, Co, 4, 4), (Co,)
    gamma, beta = params["gamma"], params["beta"]
    mean, var, eps = params["mean"], params["var"], params["eps"]

    # Fold BatchNorm (inference mode) + conv bias into the weights / one shift vector,
    # then pack the 16 (C, C) weight slices view-major for the 9 grouped matmuls.
    # TODO(synk): training-mode BatchNorm (batch statistics) is not computed in-kernel.
    scale = gamma / jnp.sqrt(var + eps)
    w_k = jnp.transpose(w, (2, 3, 0, 1)) * scale[None, None, None, :]   # (ky, kx, ci, co)
    w_packed = jnp.concatenate(
        [w_k[ky, kx] for _, taps in _VIEW_LIST for _, (ky, kx) in taps],
        axis=1).astype(jnp.bfloat16)                      # (C, 16*C) bf16 MXU operand
    shift = ((b - mean) * scale + beta).reshape(1, -1)    # f32

    x0_nhwc = jnp.transpose(x0, (0, 2, 3, 1))
    up = mrf_up(x0_nhwc, w_packed, shift)                 # (N, 2H, 2W, C0) NHWC
    up_nchw = jnp.transpose(up, (0, 3, 1, 2))
    # Concat in NCHW: the skip tensor is touched exactly once.  Fusing the concat into
    # the NHWC kernel would require transposing the skip to NHWC and back (2 extra HBM
    # passes of the skip) because the module boundary is NCHW, so it is a net loss here.
    return jnp.concatenate([x1, up_nchw], axis=1)         # cat([channels[1], up], dim=C)


# ----------------------------------------------------------------------------
# Deterministic parameter init (mirrors the PyTorch __init__ shapes)
# ----------------------------------------------------------------------------
def init_params(key, c0):
    kw, kb, kg, kbt, km, kv = jax.random.split(key, 6)
    n = 4 * 4 * c0                                        # kH * kW * out_channels
    w = jax.random.normal(kw, (c0, c0, 4, 4), jnp.float32) * math.sqrt(2.0 / n)
    bound = 1.0 / math.sqrt(n)
    b = jax.random.uniform(kb, (c0,), jnp.float32, -bound, bound)
    # At fresh PyTorch init BN has gamma=1, beta=0, mean=0, var=1; use mildly
    # non-trivial values so the BN folding path is actually exercised.
    gamma = 1.0 + 0.1 * jax.random.normal(kg, (c0,), jnp.float32)
    beta = 0.1 * jax.random.normal(kbt, (c0,), jnp.float32)
    mean = 0.1 * jax.random.normal(km, (c0,), jnp.float32)
    var = jax.random.uniform(kv, (c0,), jnp.float32, 0.5, 1.5)
    return dict(w=w, b=b, gamma=gamma, beta=beta, mean=mean, var=var, eps=1e-5)


# ----------------------------------------------------------------------------
# Pure-JAX reference (independent path via XLA's dilated convolution, all f32)
# ----------------------------------------------------------------------------
def mrf_ref(channels, params):
    if len(channels) == 1:
        return channels[0]
    x0, x1 = channels
    w, b = params["w"], params["b"]
    gamma, beta = params["gamma"], params["beta"]
    mean, var, eps = params["mean"], params["var"], params["eps"]

    x = jnp.transpose(x0, (0, 2, 3, 1))
    # ConvTranspose2d(k=4, s=2, p=1) == lhs-dilated conv with the spatially flipped kernel.
    w_hwio_flip = jnp.transpose(w, (2, 3, 0, 1))[::-1, ::-1]
    y = lax.conv_general_dilated(
        x, w_hwio_flip, window_strides=(1, 1), padding=((2, 2), (2, 2)),
        lhs_dilation=(2, 2), dimension_numbers=("NHWC", "HWIO", "NHWC"),
        precision=lax.Precision.HIGHEST)
    y = y + b[None, None, None, :]
    y = (y - mean) * (gamma / jnp.sqrt(var + eps)) + beta
    y = jnp.maximum(y, 0.0)
    skip = jnp.transpose(x1, (0, 2, 3, 1))
    out = jnp.concatenate([skip, y], axis=-1)
    return jnp.transpose(out, (0, 3, 1, 2))


# ----------------------------------------------------------------------------
if __name__ == "__main__":
    key = jax.random.PRNGKey(0)
    N, C0, H, W = 2, 4, 16, 16      # low-res path: (N, C0, H, W)
    C1 = 8                          # high-res skip: (N, C1, 2H, 2W)

    key, kp, k0, k1 = jax.random.split(key, 4)
    params = init_params(kp, C0)
    x0 = jax.random.normal(k0, (N, C0, H, W), jnp.float32)
    x1 = jax.random.normal(k1, (N, C1, 2 * H, 2 * W), jnp.float32)

    # Two-input path: cat([x1, up(x0)], dim=1)
    out = jax.block_until_ready(mrf_forward([x0, x1], params))
    ref = mrf_ref([x0, x1], params)
    assert out.shape == (N, C1 + C0, 2 * H, 2 * W)
    # bf16 MXU operands + f32 accumulation vs the all-f32 reference -> loosened tolerance.
    assert jnp.allclose(out, ref, atol=3e-2, rtol=3e-2), "mismatch vs reference"

    # Single-input path: identity.
    out1 = jax.block_until_ready(mrf_forward([x1], params))
    assert jnp.allclose(out1, x1)

    print("KERNEL_OK")
</pallas_src>

<mosaic_0001>
module attributes {stable_mosaic.version = 11 : i64} {
  func.func @kernel(%arg0: i32, %arg1: i32, %arg2: memref<1x8x16x4xf32, #tpu.memory_space<vmem>>, %arg3: memref<1x1x16x4xf32, #tpu.memory_space<vmem>>, %arg4: memref<1x1x16x4xf32, #tpu.memory_space<vmem>>, %arg5: memref<4x64xbf16, #tpu.memory_space<vmem>>, %arg6: memref<1x4xf32, #tpu.memory_space<vmem>>, %arg7: memref<1x8x2x32x4xf32, #tpu.memory_space<vmem>>, %arg8: memref<10x18x4xf32, #tpu.memory_space<vmem>>) attributes {dimension_semantics = [#tpu.dimension_semantics<parallel>, #tpu.dimension_semantics<parallel>], iteration_bounds = array<i64: 2, 2>, scalar_prefetch = 0 : i64, scratch_operands = 1 : i64, tpu.core_type = #tpu.core_type<tc>, window_params = [{transform_indices = @transform_0, window_bounds = array<i64: 1, 8, 16, 4>}, {transform_indices = @transform_1, window_bounds = array<i64: 1, 1, 16, 4>}, {transform_indices = @transform_2, window_bounds = array<i64: 1, 1, 16, 4>}, {pipeline_mode = #tpu.pipeline_mode<synchronous>, transform_indices = @transform_3, window_bounds = array<i64: 4, 64>}, {pipeline_mode = #tpu.pipeline_mode<synchronous>, transform_indices = @transform_4, window_bounds = array<i64: 1, 4>}, {transform_indices = @transform_5, window_bounds = array<i64: 1, 8, 2, 32, 4>}]} {
    %cst = arith.constant 0.000000e+00 : f32
    %0 = vector.broadcast %cst : f32 to vector<10x1x4xf32>
    %c0 = arith.constant 0 : index
    %c0_0 = arith.constant 0 : index
    %c0_1 = arith.constant 0 : index
    %1 = vector.load %arg8[%c0, %c0_0, %c0_1] : memref<10x18x4xf32, #tpu.memory_space<vmem>>, vector<10x1x4xf32>
    tpu.vector_store %arg8[%c0, %c0_0, %c0_1], %0 {strides = array<i32>} : memref<10x18x4xf32, #tpu.memory_space<vmem>>, vector<10x1x4xf32>,
    %c0_2 = arith.constant 0 : index
    %c17 = arith.constant 17 : index
    %c0_3 = arith.constant 0 : index
    %2 = vector.load %arg8[%c0_2, %c17, %c0_3] : memref<10x18x4xf32, #tpu.memory_space<vmem>>, vector<10x1x4xf32>
    tpu.vector_store %arg8[%c0_2, %c17, %c0_3], %0 {strides = array<i32>} : memref<10x18x4xf32, #tpu.memory_space<vmem>>, vector<10x1x4xf32>,
    %c0_i32 = arith.constant 0 : i32
    %3 = arith.cmpi sgt, %arg1, %c0_i32 : i32
    %c0_4 = arith.constant 0 : index
    %c0_5 = arith.constant 0 : index
    %c0_6 = arith.constant 0 : index
    %c0_7 = arith.constant 0 : index
    %4 = vector.load %arg3[%c0_4, %c0_5, %c0_6, %c0_7] : memref<1x1x16x4xf32, #tpu.memory_space<vmem>>, vector<1x1x16x4xf32>
    %5 = vector.shape_cast %4 : vector<1x1x16x4xf32> to vector<1x16x4xf32>
    %cst_8 = arith.constant 0.000000e+00 : f32
    %6 = vector.broadcast %cst_8 : f32 to vector<1x16x4xf32>
    %7 = arith.select %3, %5, %6 : vector<1x16x4xf32>
    %c0_9 = arith.constant 0 : index
    %c1 = arith.constant 1 : index
    %c0_10 = arith.constant 0 : index
    %8 = vector.load %arg8[%c0_9, %c1, %c0_10] : memref<10x18x4xf32, #tpu.memory_space<vmem>>, vector<1x16x4xf32>
    tpu.vector_store %arg8[%c0_9, %c1, %c0_10], %7 {strides = array<i32>} : memref<10x18x4xf32, #tpu.memory_space<vmem>>, vector<1x16x4xf32>,
    %c1_i32 = arith.constant 1 : i32
    %9 = arith.cmpi slt, %arg1, %c1_i32 : i32
    %c0_11 = arith.constant 0 : index
    %c0_12 = arith.constant 0 : index
    %c0_13 = arith.constant 0 : index
    %c0_14 = arith.constant 0 : index
    %10 = vector.load %arg4[%c0_11, %c0_12, %c0_13, %c0_14] : memref<1x1x16x4xf32, #tpu.memory_space<vmem>>, vector<1x1x16x4xf32>
    %11 = vector.shape_cast %10 : vector<1x1x16x4xf32> to vector<1x16x4xf32>
    %cst_15 = arith.constant 0.000000e+00 : f32
    %12 = vector.broadcast %cst_15 : f32 to vector<1x16x4xf32>
    %13 = arith.select %9, %11, %12 : vector<1x16x4xf32>
    %c9 = arith.constant 9 : index
    %c1_16 = arith.constant 1 : index
    %c0_17 = arith.constant 0 : index
    %14 = vector.load %arg8[%c9, %c1_16, %c0_17] : memref<10x18x4xf32, #tpu.memory_space<vmem>>, vector<1x16x4xf32>
    tpu.vector_store %arg8[%c9, %c1_16, %c0_17], %13 {strides = array<i32>} : memref<10x18x4xf32, #tpu.memory_space<vmem>>, vector<1x16x4xf32>,
    %c0_18 = arith.constant 0 : index
    %c0_19 = arith.constant 0 : index
    %c0_20 = arith.constant 0 : index
    %c0_21 = arith.constant 0 : index
    %15 = vector.load %arg2[%c0_18, %c0_19, %c0_20, %c0_21] : memref<1x8x16x4xf32, #tpu.memory_space<vmem>>, vector<1x8x16x4xf32>
    %16 = vector.shape_cast %15 : vector<1x8x16x4xf32> to vector<8x16x4xf32>
    %c1_22 = arith.constant 1 : index
    %c1_23 = arith.constant 1 : index
    %c0_24 = arith.constant 0 : index
    %17 = vector.load %arg8[%c1_22, %c1_23, %c0_24] : memref<10x18x4xf32, #tpu.memory_space<vmem>>, vector<8x16x4xf32>
    tpu.vector_store %arg8[%c1_22, %c1_23, %c0_24], %16 {strides = array<i32>} : memref<10x18x4xf32, #tpu.memory_space<vmem>>, vector<8x16x4xf32>,
    %c0_25 = arith.constant 0 : index
    %c0_26 = arith.constant 0 : index
    %c0_27 = arith.constant 0 : index
    %18 = vector.load %arg8[%c0_25, %c0_26, %c0_27] : memref<10x18x4xf32, #tpu.memory_space<vmem>>, vector<8x16x4xf32>
    %19 = vector.shape_cast %18 : vector<8x16x4xf32> to vector<128x4xf32>
    %20 = arith.truncf %19 : vector<128x4xf32> to vector<128x4xbf16>
    %c0_28 = arith.constant 0 : index
    %c0_29 = arith.constant 0 : index
    %21 = vector.load %arg5[%c0_28, %c0_29] : memref<4x64xbf16, #tpu.memory_space<vmem>>, vector<4x4xbf16>
    %cst_30 = arith.constant dense<0.000000e+00> : vector<128x4xf32>
    %22 = tpu.matmul %20, %21, %cst_30 {dimension_numbers = #tpu.dot_dimension_numbers<[1], [0], [0], [1], [0, 0, 1, 1], [], []>} : vector<128x4xbf16>, vector<4x4xbf16>, vector<128x4xf32> -> vector<128x4xf32>
    %c0_31 = arith.constant 0 : index
    %c1_32 = arith.constant 1 : index
    %c0_33 = arith.constant 0 : index
    %23 = vector.load %arg8[%c0_31, %c1_32, %c0_33] : memref<10x18x4xf32, #tpu.memory_space<vmem>>, vector<8x16x4xf32>
    %24 = vector.shape_cast %23 : vector<8x16x4xf32> to vector<128x4xf32>
    %25 = arith.truncf %24 : vector<128x4xf32> to vector<128x4xbf16>
    %c0_34 = arith.constant 0 : index
    %c4 = arith.constant 4 : index
    %26 = vector.load %arg5[%c0_34, %c4] : memref<4x64xbf16, #tpu.memory_space<vmem>>, vector<4x8xbf16>
    %cst_35 = arith.constant dense<0.000000e+00> : vector<128x8xf32>
    %27 = tpu.matmul %25, %26, %cst_35 {dimension_numbers = #tpu.dot_dimension_numbers<[1], [0], [0], [1], [0, 0, 1, 1], [], []>} : vector<128x4xbf16>, vector<4x8xbf16>, vector<128x8xf32> -> vector<128x8xf32>
    %28 = vector.extract_strided_slice %27 {offsets = [0, 0], sizes = [128, 4], strides = [1, 1]} : vector<128x8xf32> to vector<128x4xf32>
    %29 = arith.addf %22, %28 : vector<128x4xf32>
    %30 = vector.extract_strided_slice %27 {offsets = [0, 4], sizes = [128, 4], strides = [1, 1]} : vector<128x8xf32> to vector<128x4xf32>
    %c0_36 = arith.constant 0 : index
    %c2 = arith.constant 2 : index
    %c0_37 = arith.constant 0 : index
    %31 = vector.load %arg8[%c0_36, %c2, %c0_37] : memref<10x18x4xf32, #tpu.memory_space<vmem>>, vector<8x16x4xf32>
    %32 = vector.shape_cast %31 : vector<8x16x4xf32> to vector<128x4xf32>
    %33 = arith.truncf %32 : vector<128x4xf32> to vector<128x4xbf16>
    %c0_38 = arith.constant 0 : index
    %c12 = arith.constant 12 : index
    %34 = vector.load %arg5[%c0_38, %c12] : memref<4x64xbf16, #tpu.memory_space<vmem>>, vector<4x4xbf16>
    %cst_39 = arith.constant dense<0.000000e+00> : vector<128x4xf32>
    %35 = tpu.matmul %33, %34, %cst_39 {dimension_numbers = #tpu.dot_dimension_numbers<[1], [0], [0], [1], [0, 0, 1, 1], [], []>} : vector<128x4xbf16>, vector<4x4xbf16>, vector<128x4xf32> -> vector<128x4xf32>
    %36 = arith.addf %30, %35 : vector<128x4xf32>
    %c1_40 = arith.constant 1 : index
    %c0_41 = arith.constant 0 : index
    %c0_42 = arith.constant 0 : index
    %37 = vector.load %arg8[%c1_40, %c0_41, %c0_42] : memref<10x18x4xf32, #tpu.memory_space<vmem>>, vector<8x16x4xf32>
    %38 = vector.shape_cast %37 : vector<8x16x4xf32> to vector<128x4xf32>
    %39 = arith.truncf %38 : vector<128x4xf32> to vector<128x4xbf16>
    %c0_43 = arith.constant 0 : index
    %c16 = arith.constant 16 : index
    %40 = vector.load %arg5[%c0_43, %c16] : memref<4x64xbf16, #tpu.memory_space<vmem>>, vector<4x8xbf16>
    %cst_44 = arith.constant dense<0.000000e+00> : vector<128x8xf32>
    %41 = tpu.matmul %39, %40, %cst_44 {dimension_numbers = #tpu.dot_dimension_numbers<[1], [0], [0], [1], [0, 0, 1, 1], [], []>} : vector<128x4xbf16>, vector<4x8xbf16>, vector<128x8xf32> -> vector<128x8xf32>
    %42 = vector.extract_strided_slice %41 {offsets = [0, 0], sizes = [128, 4], strides = [1, 1]} : vector<128x8xf32> to vector<128x4xf32>
    %43 = arith.addf %29, %42 : vector<128x4xf32>
    %44 = vector.extract_strided_slice %41 {offsets = [0, 4], sizes = [128, 4], strides = [1, 1]} : vector<128x8xf32> to vector<128x4xf32>
    %c1_45 = arith.constant 1 : index
    %c1_46 = arith.constant 1 : index
    %c0_47 = arith.constant 0 : index
    %45 = vector.load %arg8[%c1_45, %c1_46, %c0_47] : memref<10x18x4xf32, #tpu.memory_space<vmem>>, vector<8x16x4xf32>
    %46 = vector.shape_cast %45 : vector<8x16x4xf32> to vector<128x4xf32>
    %47 = arith.truncf %46 : vector<128x4xf32> to vector<128x4xbf16>
    %c0_48 = arith.constant 0 : index
    %c24 = arith.constant 24 : index
    %48 = vector.load %arg5[%c0_48, %c24] : memref<4x64xbf16, #tpu.memory_space<vmem>>, vector<4x16xbf16>
    %cst_49 = arith.constant dense<0.000000e+00> : vector<128x16xf32>
    %49 = tpu.matmul %47, %48, %cst_49 {dimension_numbers = #tpu.dot_dimension_numbers<[1], [0], [0], [1], [0, 0, 1, 1], [], []>} : vector<128x4xbf16>, vector<4x16xbf16>, vector<128x16xf32> -> vector<128x16xf32>
    %50 = vector.extract_strided_slice %49 {offsets = [0, 0], sizes = [128, 4], strides = [1, 1]} : vector<128x16xf32> to vector<128x4xf32>
    %51 = arith.addf %43, %50 : vector<128x4xf32>
    %52 = vector.extract_strided_slice %49 {offsets = [0, 4], sizes = [128, 4], strides = [1, 1]} : vector<128x16xf32> to vector<128x4xf32>
    %53 = arith.addf %36, %52 : vector<128x4xf32>
    %54 = vector.extract_strided_slice %49 {offsets = [0, 8], sizes = [128, 4], strides = [1, 1]} : vector<128x16xf32> to vector<128x4xf32>
    %55 = arith.addf %44, %54 : vector<128x4xf32>
    %56 = vector.extract_strided_slice %49 {offsets = [0, 12], sizes = [128, 4], strides = [1, 1]} : vector<128x16xf32> to vector<128x4xf32>
    %c1_50 = arith.constant 1 : index
    %c2_51 = arith.constant 2 : index
    %c0_52 = arith.constant 0 : index
    %57 = vector.load %arg8[%c1_50, %c2_51, %c0_52] : memref<10x18x4xf32, #tpu.memory_space<vmem>>, vector<8x16x4xf32>
    %58 = vector.shape_cast %57 : vector<8x16x4xf32> to vector<128x4xf32>
    %59 = arith.truncf %58 : vector<128x4xf32> to vector<128x4xbf16>
    %c0_53 = arith.constant 0 : index
    %c40 = arith.constant 40 : index
    %60 = vector.load %arg5[%c0_53, %c40] : memref<4x64xbf16, #tpu.memory_space<vmem>>, vector<4x8xbf16>
    %cst_54 = arith.constant dense<0.000000e+00> : vector<128x8xf32>
    %61 = tpu.matmul %59, %60, %cst_54 {dimension_numbers = #tpu.dot_dimension_numbers<[1], [0], [0], [1], [0, 0, 1, 1], [], []>} : vector<128x4xbf16>, vector<4x8xbf16>, vector<128x8xf32> -> vector<128x8xf32>
    %62 = vector.extract_strided_slice %61 {offsets = [0, 0], sizes = [128, 4], strides = [1, 1]} : vector<128x8xf32> to vector<128x4xf32>
    %63 = arith.addf %53, %62 : vector<128x4xf32>
    %64 = vector.extract_strided_slice %61 {offsets = [0, 4], sizes = [128, 4], strides = [1, 1]} : vector<128x8xf32> to vector<128x4xf32>
    %65 = arith.addf %56, %64 : vector<128x4xf32>
    %c2_55 = arith.constant 2 : index
    %c0_56 = arith.constant 0 : index
    %c0_57 = arith.constant 0 : index
    %66 = vector.load %arg8[%c2_55, %c0_56, %c0_57] : memref<10x18x4xf32, #tpu.memory_space<vmem>>, vector<8x16x4xf32>
    %67 = vector.shape_cast %66 : vector<8x16x4xf32> to vector<128x4xf32>
    %68 = arith.truncf %67 : vector<128x4xf32> to vector<128x4xbf16>
    %c0_58 = arith.constant 0 : index
    %c48 = arith.constant 48 : index
    %69 = vector.load %arg5[%c0_58, %c48] : memref<4x64xbf16, #tpu.memory_space<vmem>>, vector<4x4xbf16>
    %cst_59 = arith.constant dense<0.000000e+00> : vector<128x4xf32>
    %70 = tpu.matmul %68, %69, %cst_59 {dimension_numbers = #tpu.dot_dimension_numbers<[1], [0], [0], [1], [0, 0, 1, 1], [], []>} : vector<128x4xbf16>, vector<4x4xbf16>, vector<128x4xf32> -> vector<128x4xf32>
    %71 = arith.addf %55, %70 : vector<128x4xf32>
    %c2_60 = arith.constant 2 : index
    %c1_61 = arith.constant 1 : index
    %c0_62 = arith.constant 0 : index
    %72 = vector.load %arg8[%c2_60, %c1_61, %c0_62] : memref<10x18x4xf32, #tpu.memory_space<vmem>>, vector<8x16x4xf32>
    %73 = vector.shape_cast %72 : vector<8x16x4xf32> to vector<128x4xf32>
    %74 = arith.truncf %73 : vector<128x4xf32> to vector<128x4xbf16>
    %c0_63 = arith.constant 0 : index
    %c52 = arith.constant 52 : index
    %75 = vector.load %arg5[%c0_63, %c52] : memref<4x64xbf16, #tpu.memory_space<vmem>>, vector<4x8xbf16>
    %cst_64 = arith.constant dense<0.000000e+00> : vector<128x8xf32>
    %76 = tpu.matmul %74, %75, %cst_64 {dimension_numbers = #tpu.dot_dimension_numbers<[1], [0], [0], [1], [0, 0, 1, 1], [], []>} : vector<128x4xbf16>, vector<4x8xbf16>, vector<128x8xf32> -> vector<128x8xf32>
    %77 = vector.extract_strided_slice %76 {offsets = [0, 0], sizes = [128, 4], strides = [1, 1]} : vector<128x8xf32> to vector<128x4xf32>
    %78 = arith.addf %71, %77 : vector<128x4xf32>
    %79 = vector.extract_strided_slice %76 {offsets = [0, 4], sizes = [128, 4], strides = [1, 1]} : vector<128x8xf32> to vector<128x4xf32>
    %80 = arith.addf %65, %79 : vector<128x4xf32>
    %c2_65 = arith.constant 2 : index
    %c2_66 = arith.constant 2 : index
    %c0_67 = arith.constant 0 : index
    %81 = vector.load %arg8[%c2_65, %c2_66, %c0_67] : memref<10x18x4xf32, #tpu.memory_space<vmem>>, vector<8x16x4xf32>
    %82 = vector.shape_cast %81 : vector<8x16x4xf32> to vector<128x4xf32>
    %83 = arith.truncf %82 : vector<128x4xf32> to vector<128x4xbf16>
    %c0_68 = arith.constant 0 : index
    %c60 = arith.constant 60 : index
    %84 = vector.load %arg5[%c0_68, %c60] : memref<4x64xbf16, #tpu.memory_space<vmem>>, vector<4x4xbf16>
    %cst_69 = arith.constant dense<0.000000e+00> : vector<128x4xf32>
    %85 = tpu.matmul %83, %84, %cst_69 {dimension_numbers = #tpu.dot_dimension_numbers<[1], [0], [0], [1], [0, 0, 1, 1], [], []>} : vector<128x4xbf16>, vector<4x4xbf16>, vector<128x4xf32> -> vector<128x4xf32>
    %86 = arith.addf %80, %85 : vector<128x4xf32>
    %c0_70 = arith.constant 0 : index
    %c0_71 = arith.constant 0 : index
    %87 = vector.load %arg6[%c0_70, %c0_71] : memref<1x4xf32, #tpu.memory_space<vmem>>, vector<1x4xf32>
    %88 = vector.broadcast %87 : vector<1x4xf32> to vector<128x4xf32>
    %89 = arith.addf %51, %88 : vector<128x4xf32>
    %cst_72 = arith.constant 0.000000e+00 : f32
    %90 = vector.broadcast %cst_72 : f32 to vector<128x4xf32>
    %91 = arith.maximumf %89, %90 : vector<128x4xf32>
    %92 = vector.shape_cast %91 : vector<128x4xf32> to vector<8x16x4xf32>
    %93 = vector.broadcast %87 : vector<1x4xf32> to vector<128x4xf32>
    %94 = arith.addf %63, %93 : vector<128x4xf32>
    %cst_73 = arith.constant 0.000000e+00 : f32
    %95 = vector.broadcast %cst_73 : f32 to vector<128x4xf32>
    %96 = arith.maximumf %94, %95 : vector<128x4xf32>
    %97 = vector.shape_cast %96 : vector<128x4xf32> to vector<8x16x4xf32>
    %98 = vector.shape_cast %92 : vector<8x16x4xf32> to vector<8x16x1x4xf32>
    %99 = vector.shape_cast %97 : vector<8x16x4xf32> to vector<8x16x1x4xf32>
    %100 = tpu.concatenate %98, %99 in 2 : vector<8x16x1x4xf32>, vector<8x16x1x4xf32> -> vector<8x16x2x4xf32>
    %101 = vector.shape_cast %100 : vector<8x16x2x4xf32> to vector<8x32x4xf32>
    %c0_74 = arith.constant 0 : index
    %c0_75 = arith.constant 0 : index
    %c0_76 = arith.constant 0 : index
    %c0_77 = arith.constant 0 : index
    %c0_78 = arith.constant 0 : index
    %102 = vector.load %arg7[%c0_74, %c0_75, %c0_76, %c0_77, %c0_78] : memref<1x8x2x32x4xf32, #tpu.memory_space<vmem>>, vector<1x8x1x32x4xf32>
    %103 = vector.shape_cast %102 : vector<1x8x1x32x4xf32> to vector<8x32x4xf32>
    %104 = vector.shape_cast %101 : vector<8x32x4xf32> to vector<1x8x1x32x4xf32>
    tpu.vector_store %arg7[%c0_74, %c0_75, %c0_76, %c0_77, %c0_78], %104 {strides = array<i32>} : memref<1x8x2x32x4xf32, #tpu.memory_space<vmem>>, vector<1x8x1x32x4xf32>,
    %105 = vector.broadcast %87 : vector<1x4xf32> to vector<128x4xf32>
    %106 = arith.addf %78, %105 : vector<128x4xf32>
    %cst_79 = arith.constant 0.000000e+00 : f32
    %107 = vector.broadcast %cst_79 : f32 to vector<128x4xf32>
    %108 = arith.maximumf %106, %107 : vector<128x4xf32>
    %109 = vector.shape_cast %108 : vector<128x4xf32> to vector<8x16x4xf32>
    %110 = vector.broadcast %87 : vector<1x4xf32> to vector<128x4xf32>
    %111 = arith.addf %86, %110 : vector<128x4xf32>
    %cst_80 = arith.constant 0.000000e+00 : f32
    %112 = vector.broadcast %cst_80 : f32 to vector<128x4xf32>
    %113 = arith.maximumf %111, %112 : vector<128x4xf32>
    %114 = vector.shape_cast %113 : vector<128x4xf32> to vector<8x16x4xf32>
    %115 = vector.shape_cast %109 : vector<8x16x4xf32> to vector<8x16x1x4xf32>
    %116 = vector.shape_cast %114 : vector<8x16x4xf32> to vector<8x16x1x4xf32>
    %117 = tpu.concatenate %115, %116 in 2 : vector<8x16x1x4xf32>, vector<8x16x1x4xf32> -> vector<8x16x2x4xf32>
    %118 = vector.shape_cast %117 : vector<8x16x2x4xf32> to vector<8x32x4xf32>
    %c0_81 = arith.constant 0 : index
    %c0_82 = arith.constant 0 : index
    %c1_83 = arith.constant 1 : index
    %c0_84 = arith.constant 0 : index
    %c0_85 = arith.constant 0 : index
    %119 = vector.load %arg7[%c0_81, %c0_82, %c1_83, %c0_84, %c0_85] : memref<1x8x2x32x4xf32, #tpu.memory_space<vmem>>, vector<1x8x1x32x4xf32>
    %120 = vector.shape_cast %119 : vector<1x8x1x32x4xf32> to vector<8x32x4xf32>
    %121 = vector.shape_cast %118 : vector<8x32x4xf32> to vector<1x8x1x32x4xf32>
    tpu.vector_store %arg7[%c0_81, %c0_82, %c1_83, %c0_84, %c0_85], %121 {strides = array<i32>} : memref<1x8x2x32x4xf32, #tpu.memory_space<vmem>>, vector<1x8x1x32x4xf32>,
    return
  }
  func.func @transform_0(%arg0: i32, %arg1: i32) -> (i32, i32, i32, i32) {
    %c0_i32 = arith.constant 0 : i32
    %c0_i32_0 = arith.constant 0 : i32
    %c0_i32_1 = arith.constant 0 : i32
    return %arg0, %arg1, %c0_i32, %c0_i32_0 : i32, i32, i32, i32
  }
  func.func @transform_1(%arg0: i32, %arg1: i32) -> (i32, i32, i32, i32) {
    %c8_i32 = arith.constant 8 : i32
    %0 = arith.muli %arg1, %c8_i32 : i32
    %c1_i32 = arith.constant 1 : i32
    %1 = arith.subi %0, %c1_i32 : i32
    %c0_i32 = arith.constant 0 : i32
    %2 = arith.maxsi %1, %c0_i32 : i32
    %c0_i32_0 = arith.constant 0 : i32
    %c0_i32_1 = arith.constant 0 : i32
    %c0_i32_2 = arith.constant 0 : i32
    return %arg0, %2, %c0_i32_0, %c0_i32_1 : i32, i32, i32, i32
  }
  func.func @transform_2(%arg0: i32, %arg1: i32) -> (i32, i32, i32, i32) {
    %c1_i32 = arith.constant 1 : i32
    %0 = arith.addi %arg1, %c1_i32 : i32
    %c8_i32 = arith.constant 8 : i32
    %1 = arith.muli %0, %c8_i32 : i32
    %c15_i32 = arith.constant 15 : i32
    %2 = arith.minsi %1, %c15_i32 : i32
    %c0_i32 = arith.constant 0 : i32
    %c0_i32_0 = arith.constant 0 : i32
    %c0_i32_1 = arith.constant 0 : i32
    return %arg0, %2, %c0_i32, %c0_i32_0 : i32, i32, i32, i32
  }
  func.func @transform_3(%arg0: i32, %arg1: i32) -> (i32, i32) {
    %c0_i32 = arith.constant 0 : i32
    %c0_i32_0 = arith.constant 0 : i32
    %c0_i32_1 = arith.constant 0 : i32
    return %c0_i32, %c0_i32_0 : i32, i32
  }
  func.func @transform_4(%arg0: i32, %arg1: i32) -> (i32, i32) {
    %c0_i32 = arith.constant 0 : i32
    %c0_i32_0 = arith.constant 0 : i32
    %c0_i32_1 = arith.constant 0 : i32
    return %c0_i32, %c0_i32_0 : i32, i32
  }
  func.func @transform_5(%arg0: i32, %arg1: i32) -> (i32, i32, i32, i32, i32) {
    %c0_i32 = arith.constant 0 : i32
    %c0_i32_0 = arith.constant 0 : i32
    %c0_i32_1 = arith.constant 0 : i32
    %c0_i32_2 = arith.constant 0 : i32
    return %arg0, %arg1, %c0_i32, %c0_i32_0, %c0_i32_1 : i32, i32, i32, i32, i32
  }
}

</mosaic_0001>

<bundles_post_ra>
// kernel: tpu_custom_call.1
= control target key start
LH: loop header
LB: loop body
LE: loop exit
PB: predicated region body
PF: predicated region fallthrough
CT: control target
= control target key end

     0   :  { %s10440_s18 = smov 0   ;;  %s10442_s19 = smov 0   ;;  %s14452_s0 = inlined_call_operand.vmem [shape: f32[2,16,16,4], index: 0, kind: input, shape index: {}]   ;;  %s14453_s1 = inlined_call_operand.vmem [shape: f32[2,16,16,4], index: 1, kind: input, shape index: {}]   ;;  %s14454_s2 = inlined_call_operand.vmem [shape: f32[2,16,16,4], index: 2, kind: input, shape index: {}]   ;;  %s14455_s3 = inlined_call_operand.vmem [shape: bf16[4,64], index: 3, kind: input, shape index: {}]   ;;  %s14456_s4 = inlined_call_operand.vmem [shape: f32[1,4], index: 4, kind: input, shape index: {}]   ;;  %s14457_s5 = inlined_call_operand.vmem [shape: f32[2,16,2,32,4], index: 5, kind: output, shape index: {}]  }
   0x1   :  { %s10444_s20 = smov 0   ;;  %s10446_s21 = smov 0  }
   0x2   :  { %s10448_s22 = smov 0  }
   0x3 LB: > { %s24_s23 = sadd.s32 1, %s10385_s20  ;;  %s27_s24 = sadd.s32 1, %s10389_s21  ;;  %s10393_s22 = sphi %s10448_s22, %s15_s22   ;;  %s10389_s21 = sphi %s10446_s21, %s15018_s21   ;;  %s10385_s20 = sphi %s10444_s20, %s15017_s20   ;;  %s10381_s19 = sphi %s10442_s19, %s15016_s19   ;;  %s10377_s18 = sphi %s10440_s18, %s15015_s18  }
   0x4   : > { %p25_p0 = scmp.ge.s32.totalorder %s24_s23, 2  ;;  %p9882_p1 = scmp.ge.s32.totalorder %s10393_s22, 1 }
   0x5   : > { %p273_p2 = scmp.lt.s32.totalorder %s10393_s22, 5 }
   0x6   : > { %s15020_s23 = smov (%p25_p0, %s24_s23), 0  ;;  %s15022_s24 = smov (!%p25_p0, %s27_s24), %s10389_s21 }
   0x7   : > { %p274_p3 = pnand %p9882_p1, %p273_p2  ;;  %p29_p4 = scmp.ge.s32.totalorder %s15022_s24, 2 }
   0x9   : > { %s15024_s24 = smov (%p29_p4, %s15022_s24), 0  ;;  %277 = sbr.rel (%p274_p3) target bundleno = 1363 (0x553), region = 40 }
   0xe   : > { %v10477_v0 = vld.sshfl [vmem:[%s14455_s3] sm:$0x3 pattern:$0x76325410]  ;;  %v523_v1 = vlaneseq  ;;  %s10395_s27 = smov 116   ;;  %s10397_s28 = smov 104  }
   0xf   : > { %811 = vrot.lane.b32.xlu0 %v10477_v0, %s10395_s27  ;;  %v10396_v2 = vmov 1983009808   ;;  %1225 = vrot.lane.b32.xlu1 %v10477_v0, %s10397_s28  ;;  %s10484_s29 = sshll.u32 %s10377_s18, 3  ;;  %p338_p5 = scmp.lt.s32.totalorder %s10381_s19, 1  ;;  %v10495_v6 = vld [vmem:[%s14455_s3] sm:$0x3] }
  0x10   : > { %v521_v3 = vunpack.c.l.s4 %v10396_v2  ;;  %v10480_v4 = vshrl.u32 %v523_v1, 7  ;;  %p340_p6 = scmp.lt.s32.totalorder %s10484_s29, 15  ;;  %s10489_s30 = sadd.s32 4294967295, %s10484_s29  ;;  %vm394_vm0 = vcmask 24576   ;;  %v10400_v8 = vmov 0.0  }
  0x11   : > { %s10398_s6 = smov 112   ;;  %s15026_s19 = smov (!%p338_p5, %s10381_s19), 1  ;;  %395 = vst.msk [vmem:[#allocation2] sm:$0x1] %vm394_vm0, %v10400_v8  ;;  %396 = vst.msk [vmem:[#allocation2 + $0x18] sm:$0x1] %vm394_vm0, %v10400_v8 }
  0x12   : > { %v522_v5 = vunpack.c.0.s8 %v521_v3  ;;  %s10399_s9 = smov 80   ;;  %397 = vst.msk [vmem:[#allocation2 + $0x30] sm:$0x1] %vm394_vm0, %v10400_v8  ;;  %398 = vst.msk [vmem:[#allocation2 + $0x48] sm:$0x1] %vm394_vm0, %v10400_v8  ;;  %s10528_s11 = sshll.u32 %s15026_s19, 5 }
  0x13   : > { %1050 = vrot.lane.b32.xlu0 %v10477_v0, %s10398_s6  ;;  %1800 = vrot.lane.b32.xlu1 %v10477_v0, %s10399_s9  ;;  %s10505_s10 = scalar_select %p340_p6, %s10484_s29, 15  ;;  %399 = vst.msk [vmem:[#allocation2 + $0x60] sm:$0x1] %vm394_vm0, %v10400_v8  ;;  %400 = vst.msk [vmem:[#allocation2 + $0x78] sm:$0x1] %vm394_vm0, %v10400_v8  ;;  %vm423_vm1 = vcmask 31744  }
  0x14   : > { %v10501_v7 = vsub.s32 %v522_v5, %v10480_v4  ;;  %401 = vst.msk [vmem:[#allocation2 + $0x90] sm:$0x1] %vm394_vm0, %v10400_v8  ;;  %402 = vst.msk [vmem:[#allocation2 + $0xa8] sm:$0x1] %vm394_vm0, %v10400_v8  ;;  %p350_p7 = scmp.gt.s32.totalorder %s10489_s30, 0  ;;  %p9889_p8 = scmp.lt.s32.totalorder %s10489_s30, 15 }
  0x15   : > { %403 = vst.msk [vmem:[#allocation2 + $0xc0] sm:$0x1] %vm394_vm0, %v10400_v8  ;;  %404 = vst.msk [vmem:[#allocation2 + $0xd8] sm:$0x1] %vm394_vm0, %v10400_v8  ;;  %s9884_s12 = sshll.u32 %s10505_s10, 1  ;;  %s10029_s14 = sadd.s32 8, %s10484_s29 }
  0x16   : > { %14526 = vst [vmem:[#allocation3_spill] sm:$0xff] %v10501_v7  ;;  %405 = vst.msk [vmem:[#allocation2 + $0x11] sm:$0x1] %vm394_vm0, %v10400_v8  ;;  %v526_v9 = vrot.slane %v10495_v6, %v10501_v7  ;;  %s344_s13 = sadd.s32 %s10528_s11, %s9884_s12  ;;  %s10401_s15 = smov 124   ;;  %vm553_vm2 = vcmask 1041408   ;;  %vm5246_vm3 = vcmask 1040384  }
  0x17   : > { %406 = vst.msk [vmem:[#allocation2 + $0x29] sm:$0x1] %vm394_vm0, %v10400_v8  ;;  %407 = vst.msk [vmem:[#allocation2 + $0x41] sm:$0x1] %vm394_vm0, %v10400_v8  ;;  %s9886_s16 = sshll.u32 %s344_s13, 3  ;;  %p10538_p9 = scmp.lt.s32.totalorder %s10029_s14, 15 }
  0x18   : > { %408 = vst.msk [vmem:[#allocation2 + $0x59] sm:$0x1] %vm394_vm0, %v10400_v8  ;;  %409 = vst.msk [vmem:[#allocation2 + $0x71] sm:$0x1] %vm394_vm0, %v10400_v8  ;;  %527 = vrot.lane.b32.xlu0 %v526_v9, %s10401_s15  ;;  %s10545_s27 = scalar_lea.vmem %s14452_s0, %s9886_s16  ;;  %s10402_s29 = smov 88   ;;  %v679_v50 = vsel %vm553_vm2, %v10495_v6, 0 }
  0x19   : > { %410 = vst.msk [vmem:[#allocation2 + $0x89] sm:$0x1] %vm394_vm0, %v10400_v8  ;;  %411 = vst.msk [vmem:[#allocation2 + $0xa1] sm:$0x1] %vm394_vm0, %v10400_v8  ;;  %s351_s28 = scalar_select %p350_p7, %s10489_s30, 0  ;;  %v443_v10 = vld [vmem:[%s10545_s27 + $0x30] sm:$0xff] }
  0x1a   : > { %412 = vst.msk [vmem:[#allocation2 + $0xb9] sm:$0x1] %vm394_vm0, %v10400_v8  ;;  %413 = vst.msk [vmem:[#allocation2 + $0xd1] sm:$0x1] %vm394_vm0, %v10400_v8  ;;  %v444_v11 = vld [vmem:[%s10545_s27 + $0x38] sm:$0xff]  ;;  %v437_v12 = vld [vmem:[%s10545_s27] sm:$0xff] }
  0x1b   : > { %414 = vst.msk [vmem:[#allocation2 + $0xe9] sm:$0x1] %vm394_vm0, %v10400_v8  ;;  %s15028_s14 = smov (!%p10538_p9, %s10029_s14), 15  ;;  %v438_v13 = vld [vmem:[%s10545_s27 + $0x8] sm:$0xff]  ;;  %v445_v14 = vld [vmem:[%s10545_s27 + $0x40] sm:$0xff]  ;;  %s15030_s28 = smov (!%p9889_p8, %s351_s28), 15 }
  0x1c   : > { %460 = vst.msk [vmem:[#allocation2 + $0x61] sm:$0xff] %vm423_vm1, %v443_v10  ;;  %461 = vst.msk [vmem:[#allocation2 + $0x69] sm:$0xff] %vm423_vm1, %v444_v11  ;;  %v446_v15 = vld [vmem:[%s10545_s27 + $0x48] sm:$0xff]  ;;  %1496 = vrot.lane.b32.xlu0 %v10477_v0, %s10402_s29  ;;  %v439_v16 = vld [vmem:[%s10545_s27 + $0x10] sm:$0xff]  ;;  %s15032_s14 = smov (!%p10538_p9, %s15028_s14), 15  ;;  %s9894_s30 = sshll.u32 %s15030_s28, 1 }
  0x1d   : > { %454 = vst.msk [vmem:[#allocation2 + $0x19] sm:$0xff] %vm423_vm1, %v437_v12  ;;  %455 = vst.msk [vmem:[#allocation2 + $0x21] sm:$0xff] %vm423_vm1, %v438_v13  ;;  %v440_v17 = vld [vmem:[%s10545_s27 + $0x18] sm:$0xff]  ;;  %v447_v18 = vld [vmem:[%s10545_s27 + $0x50] sm:$0xff]  ;;  %s9905_s6 = sshll.u32 %s10505_s10, 3  ;;  %s10585_s7 = sshll.u32 %s15032_s14, 1 }
  0x1e   : > { %462 = vst.msk [vmem:[#allocation2 + $0x79] sm:$0xff] %vm423_vm1, %v445_v14  ;;  %463 = vst.msk [vmem:[#allocation2 + $0x81] sm:$0xff] %vm423_vm1, %v446_v15  ;;  %v448_v19 = vld [vmem:[%s10545_s27 + $0x58] sm:$0xff]  ;;  %v441_v20 = vld [vmem:[%s10545_s27 + $0x20] sm:$0xff]  ;;  %s9906_s8 = sshll.u32 %s15026_s19, 7  ;;  %s375_s9 = sadd.s32 %s10585_s7, %s10528_s11 }
  0x1f   : > { %456 = vst.msk [vmem:[#allocation2 + $0x31] sm:$0xff] %vm423_vm1, %v439_v16  ;;  %457 = vst.msk [vmem:[#allocation2 + $0x39] sm:$0xff] %vm423_vm1, %v440_v17  ;;  %v442_v21 = vld [vmem:[%s10545_s27 + $0x28] sm:$0xff]  ;;  %v449_v22 = vld [vmem:[%s10545_s27 + $0x60] sm:$0xff]  ;;  %s358_s12 = sadd.s32 %s9894_s30, %s10528_s11  ;;  %s10593_s13 = sadd.s32 %s9906_s8, %s9905_s6 }
  0x20   : > { %464 = vst.msk [vmem:[#allocation2 + $0x91] sm:$0xff] %vm423_vm1, %v447_v18  ;;  %465 = vst.msk [vmem:[#allocation2 + $0x99] sm:$0xff] %vm423_vm1, %v448_v19  ;;  %v450_v23 = vld [vmem:[%s10545_s27 + $0x68] sm:$0xff]  ;;  %p415_p10 = scmp.gt.s32.totalorder %s10377_s18, 0  ;;  %s9896_s10 = sshll.u32 %s358_s12, 3  ;;  %v451_v32 = vld [vmem:[%s10545_s27 + $0x70] sm:$0xff] }
  0x21   : > { %458 = vst.msk [vmem:[#allocation2 + $0x49] sm:$0xff] %vm423_vm1, %v441_v20  ;;  %459 = vst.msk [vmem:[#allocation2 + $0x51] sm:$0xff] %vm423_vm1, %v442_v21  ;;  %s360_s16 = scalar_lea.vmem %s14453_s1, %s9896_s10  ;;  %s10403_s11 = smov 68   ;;  %v452_v33 = vld [vmem:[%s10545_s27 + $0x78] sm:$0xff] }
  0x22   : > { %466 = vst.msk [vmem:[#allocation2 + $0xa9] sm:$0xff] %vm423_vm1, %v449_v22  ;;  %467 = vst.msk [vmem:[#allocation2 + $0xb1] sm:$0xff] %vm423_vm1, %v450_v23  ;;  %s10341_s17 = scalar_select %p415_p10, 255, 0  ;;  %2342 = vrot.lane.b32.xlu1 %v10477_v0, %s10403_s11 }
  0x23   : > { %v503_v24 = vld [vmem:[#allocation2 + $0x61] sm:$0xff]  ;;  %v504_v25 = vld [vmem:[#allocation2 + $0x69] sm:$0xff]  ;;  %s10404_s25 = smov 76   ;;  %468 = vst.msk [vmem:[#allocation2 + $0xc1] sm:$0xff] %vm423_vm1, %v451_v32  ;;  %469 = vst.msk [vmem:[#allocation2 + $0xc9] sm:$0xff] %vm423_vm1, %v452_v33  ;;  %p426_p11 = scmp.lt.s32.totalorder %s10377_s18, 1 }
  0x24   : > { %v10596_v26 = vpack.c.bf16 %v504_v25, %v503_v24  ;;  %v10342_v27 = vld [vmem:[%s360_s16] sm:%s10341_s17]  ;;  %v10345_v28 = vld [vmem:[%s360_s16 + $0x8] sm:%s10341_s17]  ;;  %s9903_s26 = sshll.u32 %s375_s9, 3  ;;  %v472_v3 = vld [vmem:[#allocation2 + $0x18] sm:$0xff]  ;;  %s10405_s7 = smov 4  }
  0x25   : > { %424 = vst.msk [vmem:[#allocation2 + $0x1] sm:$0xff] %vm423_vm1, %v10342_v27  ;;  %425 = vst.msk [vmem:[#allocation2 + $0x9] sm:$0xff] %vm423_vm1, %v10345_v28  ;;  %2039 = vrot.lane.b32.xlu0 %v10477_v0, %s10404_s25  ;;  %s377_s30 = scalar_lea.vmem %s14454_s2, %s9903_s26  ;;  %v497_v38 = vld [vmem:[#allocation2 + $0x19] sm:$0xff]  ;;  %v498_v39 = vld [vmem:[#allocation2 + $0x21] sm:$0xff]  ;;  %s10406_s8 = smov 12  }
  0x26   : > { %10121 = vmatprep.mubr.msk.bf16.mxu1 %vm423_vm1, %v10596_v26  ;;  %s10347_s6 = scalar_select %p426_p11, 255, 0  ;;  %v505_v40 = vld [vmem:[#allocation2 + $0x79] sm:$0xff]  ;;  %v506_v41 = vld [vmem:[#allocation2 + $0x81] sm:$0xff]  ;;  %v499_v43 = vld [vmem:[#allocation2 + $0x31] sm:$0xff]  ;;  %v10623_v46 = vpack.c.bf16 %v498_v39, %v497_v38 }
  0x27   : > { %v500_v44 = vld [vmem:[#allocation2 + $0x39] sm:$0xff]  ;;  %v10625_v47 = vpack.c.bf16 %v506_v41, %v505_v40  ;;  %v507_v48 = vld [vmem:[#allocation2 + $0x91] sm:$0xff]  ;;  %v781_v8 = vld [vmem:[#allocation2 + $0x22] sm:$0xff]  ;;  %s10407_s9 = smov 8   ;;  %s9907_s14 = sshll.u32 %s10593_s13, 3 }
  0x28   : > { %v10348_v34 = vld [vmem:[%s377_s30] sm:%s10347_s6]  ;;  %v10351_v35 = vld [vmem:[%s377_s30 + $0x8] sm:%s10347_s6]  ;;  %v10632_v51 = vpack.c.bf16 %v500_v44, %v499_v43  ;;  %v502_v55 = vld [vmem:[#allocation2 + $0x51] sm:$0xff]  ;;  %s11658_s16 = scalar_lea.vmem %s14457_s5, %s9907_s14  ;;  %s10409_s25 = smov 120  }
  0x29   : > { %435 = vst.msk [vmem:[#allocation2 + $0xd9] sm:$0xff] %vm423_vm1, %v10348_v34  ;;  %436 = vst.msk [vmem:[#allocation2 + $0xe1] sm:$0xff] %vm423_vm1, %v10351_v35  ;;  %v508_v49 = vld [vmem:[#allocation2 + $0x99] sm:$0xff]  ;;  %v501_v54 = vld [vmem:[#allocation2 + $0x49] sm:$0xff] }
  0x2a   : > { %v10634_v52 = vpack.c.bf16 %v508_v49, %v507_v48  ;;  %v509_v57 = vld [vmem:[#allocation2 + $0xa9] sm:$0xff]  ;;  %v510_v58 = vld [vmem:[#allocation2 + $0xb1] sm:$0xff]  ;;  %v10648_v63 = vpack.c.bf16 %v502_v55, %v501_v54  ;;  %v473_v5 = vld [vmem:[#allocation2 + $0x20] sm:$0xff] }
  0x2b   : > { %v10650_v0 = vpack.c.bf16 %v510_v58, %v509_v57  ;;  %v474_v9 = vld [vmem:[#allocation2 + $0x30] sm:$0xff]  ;;  %v475_v10 = vld [vmem:[#allocation2 + $0x38] sm:$0xff]  ;;  %v487_v13 = vpack.c.bf16 %v473_v5, %v472_v3  ;;  %v476_v19 = vld [vmem:[#allocation2 + $0x48] sm:$0xff] }
  0x2c   : > { %v495_v29 = vld [vmem:[#allocation2 + $0x1] sm:$0xff]  ;;  %v496_v30 = vld [vmem:[#allocation2 + $0x9] sm:$0xff]  ;;  %v782_v11 = vld [vmem:[#allocation2 + $0x32] sm:$0xff]  ;;  %v10661_v16 = vpack.c.bf16 %v475_v10, %v474_v9 }
  0x2d   : > { %v511_v31 = vpack.c.bf16 %v496_v30, %v495_v29  ;;  %v470_v59 = vld [vmem:[#allocation2] sm:$0xff]  ;;  %v471_v60 = vld [vmem:[#allocation2 + $0x8] sm:$0xff]  ;;  %v477_v20 = vld [vmem:[#allocation2 + $0x50] sm:$0xff] }
  0x2e   : > { %v778_v61 = vld [vmem:[#allocation2 + $0x2] sm:$0xff]  ;;  %v779_v62 = vld [vmem:[#allocation2 + $0xa] sm:$0xff]  ;;  %v486_v1 = vpack.c.bf16 %v471_v60, %v470_v59  ;;  %v783_v12 = vld [vmem:[#allocation2 + $0x3a] sm:$0xff]  ;;  %v10676_v30 = vpack.c.bf16 %v477_v20, %v476_v19 }
  0x2f   : > { %10113 = vmatprep.mubr.msk.bf16.mxu0 %vm423_vm1, %v511_v31  ;;  %v794_v2 = vpack.c.bf16 %v779_v62, %v778_v61  ;;  %v10663_v17 = vpack.c.bf16 %v783_v12, %v782_v11  ;;  %v784_v23 = vld [vmem:[#allocation2 + $0x4a] sm:$0xff]  ;;  %v785_v24 = vld [vmem:[#allocation2 + $0x52] sm:$0xff]  ;;  %v478_v25 = vld [vmem:[#allocation2 + $0x60] sm:$0xff] }
  0x30   : > { %v479_v27 = vld [vmem:[#allocation2 + $0x68] sm:$0xff]  ;;  %v10678_v31 = vpack.c.bf16 %v785_v24, %v784_v23  ;;  %v480_v34 = vld [vmem:[#allocation2 + $0x78] sm:$0xff]  ;;  %v481_v35 = vld [vmem:[#allocation2 + $0x80] sm:$0xff] }
  0x31   : > { %v786_v28 = vld [vmem:[#allocation2 + $0x62] sm:$0xff]  ;;  %v787_v29 = vld [vmem:[#allocation2 + $0x6a] sm:$0xff]  ;;  %v10680_v32 = vpack.c.bf16 %v479_v27, %v478_v25  ;;  %v483_v39 = vld [vmem:[#allocation2 + $0x98] sm:$0xff] }
  0x32   : > { %v10682_v33 = vpack.c.bf16 %v787_v29, %v786_v28  ;;  %v482_v38 = vld [vmem:[#allocation2 + $0x90] sm:$0xff]  ;;  %v791_v41 = vld [vmem:[#allocation2 + $0x9a] sm:$0xff]  ;;  %v484_v48 = vld [vmem:[#allocation2 + $0xa8] sm:$0xff] }
  0x33   : > { %v790_v40 = vld [vmem:[#allocation2 + $0x92] sm:$0xff]  ;;  %v492_v44 = vpack.c.bf16 %v483_v39, %v482_v38  ;;  %v1032_v60 = vld [vmem:[#allocation2 + $0xc8] sm:$0xff]  ;;  %v9987_v3 = vld [vmem:[%s14456_s4] ss:$0 sm:$0xff] }
  0x34   : > { %v485_v49 = vld [vmem:[#allocation2 + $0xb0] sm:$0xff]  ;;  %v1206_v61 = vld [vmem:[#allocation2 + $0xc1] sm:$0xff]  ;;  %2587 = vrot.lane.b32.xlu0 %v9987_v3, %s10405_s7  ;;  %6143 = vrot.lane.b32.xlu1 %v9987_v3, %s10406_s8  ;;  %v1781_v9 = vld [vmem:[#allocation2 + $0xd8] sm:$0xff] }
  0x35   : > { %v493_v54 = vpack.c.bf16 %v485_v49, %v484_v48  ;;  %v1207_v62 = vld [vmem:[#allocation2 + $0xc9] sm:$0xff]  ;;  %v1782_v10 = vld [vmem:[#allocation2 + $0xe0] sm:$0xff] }
  0x36   : > { %v1478_v11 = vld [vmem:[#allocation2 + $0xca] sm:$0xff]  ;;  %v1790_v12 = vpack.c.bf16 %v1782_v10, %v1781_v9 }
  0x81   : > { %v812_v36 = vpop.permute.xlu0 %811  ;;  %v1226_v56 = vpop.permute.xlu1 %1225 }
  0x82   : > { %v838_v53 = vsel %vm553_vm2, %v812_v36, 0  ;;  %v1252_v15 = vsel %vm553_vm2, %v1226_v56, 0 }
  0x85   : > { %v10618_v37 = vpop.permute.xlu0 %1050  ;;  %v1801_v21 = vpop.permute.xlu1 %1800 }
  0x86   : > { %v1077_v18 = vsel %vm553_vm2, %v10618_v37, 0  ;;  %v1827_v57 = vsel %vm553_vm2, %v1801_v21, 0 }
  0x8a   : > { %v528_v42 = vpop.permute.xlu0 %527 }
  0x8b   : > { %10275 = vmatprep.subr.msk.bf16.mxu0 %vm553_vm2, %v528_v42  ;;  %10276 = vmatprep.subr.msk.bf16.mxu1 %vm553_vm2, %v528_v42  ;;  %v555_v45 = vsel %vm553_vm2, %v528_v42, 0  ;;  %v491_v42 = vpack.c.bf16 %v481_v35, %v480_v34 }
  0x8c   : > { %10112 = vmatpush3.bf16.msra.mxu0 %v555_v45  ;;  %10274 = vmatpush3.bf16.msra.mxu1 %v555_v45  ;;  %v10694_v45 = vpack.c.bf16 %v791_v41, %v790_v40 }
  0x8d   : > { %10278 = vmatprep.subr.msk.bf16.mxu0 %vm553_vm2, %v812_v36  ;;  %10277 = vmatprep.subr.msk.bf16.mxu1 %vm553_vm2, %v10495_v6  ;;  %v780_v6 = vld [vmem:[#allocation2 + $0x1a] sm:$0xff] }
  0x8e   : > { %v10658_v14 = vpack.c.bf16 %v781_v8, %v780_v6  ;;  %v1497_v22 = vpop.permute.xlu0 %1496  ;;  %v788_v36 = vld [vmem:[#allocation2 + $0x7a] sm:$0xff]  ;;  %v1477_v8 = vld [vmem:[#allocation2 + $0xc2] sm:$0xff] }
  0x8f   : > { %10114 = vmatmul.mubr.msk.bf16.vlgmr.msra.gmra.mxu0 %vm423_vm1, %v10623_v46  ;;  %10122 = vmatmul.mubr.msk.bf16.vlgmr.msra.gmra.mxu1 %vm423_vm1, %v10625_v47 }
  0x90   : > { %10130 = vmatpush3.bf16.msra.mxu1 %v679_v50  ;;  %10148 = vmatpush3.bf16.msra.mxu0 %v838_v53  ;;  %v792_v50 = vld [vmem:[#allocation2 + $0xaa] sm:$0xff]  ;;  %v793_v53 = vld [vmem:[#allocation2 + $0xb2] sm:$0xff] }
  0x91   : > { %10279 = vmatprep.subr.msk.bf16.mxu1 %vm553_vm2, %v10618_v37  ;;  %10117 = vmatprep.mubr.msk.bf16.mxu0 %vm423_vm1, %v10632_v51  ;;  %v789_v37 = vld [vmem:[#allocation2 + $0x82] sm:$0xff]  ;;  %v10702_v55 = vpack.c.bf16 %v793_v53, %v792_v50 }
  0x92   : > { %10125 = vmatprep.mubr.msk.bf16.mxu1 %vm423_vm1, %v10634_v52  ;;  %10280 = vmatprep.subr.msk.bf16.mxu0 %vm553_vm2, %v1226_v56  ;;  %v10692_v43 = vpack.c.bf16 %v789_v37, %v788_v36  ;;  %v1523_v56 = vsel %vm553_vm2, %v1497_v22, 0 }
  0x94   : > { %v2343_v58 = vpop.permute.xlu1 %2342 }
  0x95   : > { %v2369_v6 = vsel %vm553_vm2, %v2343_v58, 0 }
  0x97   : > { %10118 = vmatmul.mubr.msk.bf16.gmra.mxu0 %vm423_vm1, %v10648_v63  ;;  %10126 = vmatmul.mubr.msk.bf16.gmra.mxu1 %vm423_vm1, %v10650_v0  ;;  %v2040_v59 = vpop.permute.xlu0 %2039 }
  0x98   : > { %10131 = vmatprep.mubr.msk.bf16.mxu1 %vm423_vm1, %v486_v1  ;;  %10149 = vmatprep.mubr.msk.bf16.mxu0 %vm423_vm1, %v794_v2  ;;  %v1215_v2 = vpack.c.bf16 %v1207_v62, %v1206_v61  ;;  %v2066_v5 = vsel %vm553_vm2, %v2040_v59, 0 }
  0x9f   : > { %10132 = vmatmul.mubr.msk.bf16.vlgmr.msra.gmra.mxu1 %vm423_vm1, %v487_v13  ;;  %10150 = vmatmul.mubr.msk.bf16.vlgmr.msra.gmra.mxu0 %vm423_vm1, %v10658_v14 }
  0xa0   : > { %10166 = vmatpush3.bf16.msra.mxu1 %v1077_v18  ;;  %10184 = vmatpush3.bf16.msra.mxu0 %v1252_v15 }
  0xa1   : > { %10135 = vmatprep.mubr.msk.bf16.mxu1 %vm423_vm1, %v10661_v16  ;;  %10153 = vmatprep.mubr.msk.bf16.mxu0 %vm423_vm1, %v10663_v17 }
  0xa2   : > { %10281 = vmatprep.subr.msk.bf16.mxu1 %vm553_vm2, %v1497_v22  ;;  %10282 = vmatprep.subr.msk.bf16.mxu0 %vm553_vm2, %v1801_v21 }
  0xa7   : > { %10136 = vmatmul.mubr.msk.bf16.gmra.mxu1 %vm423_vm1, %v10676_v30  ;;  %10154 = vmatmul.mubr.msk.bf16.gmra.mxu0 %vm423_vm1, %v10678_v31 }
  0xa8   : > { %10139 = vmatprep.mubr.msk.bf16.mxu1 %vm423_vm1, %v10680_v32  ;;  %10157 = vmatprep.mubr.msk.bf16.mxu0 %vm423_vm1, %v10682_v33 }
  0xaf   : > { %10140 = vmatmul.mubr.msk.bf16.gmra.mxu1 %vm423_vm1, %v491_v42  ;;  %10158 = vmatmul.mubr.msk.bf16.gmra.mxu0 %vm423_vm1, %v10692_v43 }
  0xb0   : > { %10143 = vmatprep.mubr.msk.bf16.mxu1 %vm423_vm1, %v492_v44  ;;  %10161 = vmatprep.mubr.msk.bf16.mxu0 %vm423_vm1, %v10694_v45 }
  0xb7   : > { %10144 = vmatmul.mubr.msk.bf16.gmra.mxu1 %vm423_vm1, %v493_v54  ;;  %10162 = vmatmul.mubr.msk.bf16.gmra.mxu0 %vm423_vm1, %v10702_v55 }
  0xb8   : > { %10167 = vmatprep.mubr.msk.bf16.mxu1 %vm423_vm1, %v487_v13  ;;  %10185 = vmatprep.mubr.msk.bf16.mxu0 %vm423_vm1, %v10623_v46  ;;  %v1031_v46 = vld [vmem:[#allocation2 + $0xc0] sm:$0xff]  ;;  %v1486_v13 = vpack.c.bf16 %v1478_v11, %v1477_v8 }
  0xb9   : > { %v1040_v1 = vpack.c.bf16 %v1032_v60, %v1031_v46 }
  0xbf   : > { %10168 = vmatmul.mubr.msk.bf16.vlgmr.msra.gmra.mxu1 %vm423_vm1, %v10661_v16  ;;  %10186 = vmatmul.mubr.msk.bf16.vlgmr.msra.gmra.mxu0 %vm423_vm1, %v10632_v51 }
  0xc0   : > { %10171 = vmatprep.mubr.msk.bf16.mxu1 %vm423_vm1, %v10676_v30  ;;  %10189 = vmatprep.mubr.msk.bf16.mxu0 %vm423_vm1, %v10648_v63 }
  0xc1   : > { %10202 = vmatpush3.bf16.msra.mxu1 %v1523_v56  ;;  %10220 = vmatpush3.bf16.msra.mxu0 %v1827_v57 }
  0xc2   : > { %10283 = vmatprep.subr.msk.bf16.mxu1 %vm553_vm2, %v2040_v59  ;;  %10284 = vmatprep.subr.msk.bf16.mxu0 %vm553_vm2, %v2343_v58 }
  0xc7   : > { %10172 = vmatmul.mubr.msk.bf16.gmra.mxu1 %vm423_vm1, %v10680_v32  ;;  %10190 = vmatmul.mubr.msk.bf16.gmra.mxu0 %vm423_vm1, %v10596_v26 }
  0xc8   : > { %10175 = vmatprep.mubr.msk.bf16.mxu1 %vm423_vm1, %v491_v42  ;;  %10193 = vmatprep.mubr.msk.bf16.mxu0 %vm423_vm1, %v10625_v47 }
  0xcf   : > { %10176 = vmatmul.mubr.msk.bf16.gmra.mxu1 %vm423_vm1, %v492_v44  ;;  %10194 = vmatmul.mubr.msk.bf16.gmra.mxu0 %vm423_vm1, %v10634_v52 }
  0xd0   : > { %10179 = vmatprep.mubr.msk.bf16.mxu1 %vm423_vm1, %v493_v54  ;;  %10197 = vmatprep.mubr.msk.bf16.mxu0 %vm423_vm1, %v10650_v0 }
  0xd7   : > { %10180 = vmatmul.mubr.msk.bf16.gmra.mxu1 %vm423_vm1, %v1040_v1  ;;  %10198 = vmatmul.mubr.msk.bf16.gmra.mxu0 %vm423_vm1, %v1215_v2 }
  0xd8   : > { %10221 = vmatprep.mubr.msk.bf16.mxu0 %vm423_vm1, %v10661_v16  ;;  %10203 = vmatprep.mubr.msk.bf16.mxu1 %vm423_vm1, %v10658_v14 }
  0xdf   : > { %10222 = vmatmul.mubr.msk.bf16.vlgmr.msra.gmra.mxu0 %vm423_vm1, %v10676_v30  ;;  %10204 = vmatmul.mubr.msk.bf16.vlgmr.msra.gmra.mxu1 %vm423_vm1, %v10663_v17 }
  0xe0   : > { %10225 = vmatprep.mubr.msk.bf16.mxu0 %vm423_vm1, %v10680_v32  ;;  %10207 = vmatprep.mubr.msk.bf16.mxu1 %vm423_vm1, %v10678_v31 }
  0xe1   : > { %10238 = vmatpush3.bf16.msra.mxu1 %v2066_v5  ;;  %10256 = vmatpush3.bf16.msra.mxu0 %v2369_v6 }
  0xe7   : > { %10226 = vmatmul.mubr.msk.bf16.gmra.mxu0 %vm423_vm1, %v491_v42  ;;  %10208 = vmatmul.mubr.msk.bf16.gmra.mxu1 %vm423_vm1, %v10682_v33 }
  0xe8   : > { %10229 = vmatprep.mubr.msk.bf16.mxu0 %vm423_vm1, %v492_v44  ;;  %10211 = vmatprep.mubr.msk.bf16.mxu1 %vm423_vm1, %v10692_v43 }
  0xef   : > { %10230 = vmatmul.mubr.msk.bf16.gmra.mxu0 %vm423_vm1, %v493_v54  ;;  %10212 = vmatmul.mubr.msk.bf16.gmra.mxu1 %vm423_vm1, %v10694_v45 }
  0xf0   : > { %10233 = vmatprep.mubr.msk.bf16.mxu0 %vm423_vm1, %v1040_v1  ;;  %10215 = vmatprep.mubr.msk.bf16.mxu1 %vm423_vm1, %v10702_v55 }
  0xf7   : > { %10234 = vmatmul.mubr.msk.bf16.gmra.mxu0 %vm423_vm1, %v1790_v12  ;;  %10216 = vmatmul.mubr.msk.bf16.gmra.mxu1 %vm423_vm1, %v1486_v13 }
  0xf8   : > { %10257 = vmatprep.mubr.msk.bf16.mxu0 %vm423_vm1, %v10663_v17  ;;  %10239 = vmatprep.mubr.msk.bf16.mxu1 %vm423_vm1, %v10632_v51  ;;  %v2323_v51 = vld [vmem:[#allocation2 + $0xda] sm:$0xff] }
  0xff   : > { %10258 = vmatmul.mubr.msk.bf16.vlgmr.msra.gmra.mxu0 %vm423_vm1, %v10678_v31  ;;  %10240 = vmatmul.mubr.msk.bf16.vlgmr.msra.gmra.mxu1 %vm423_vm1, %v10648_v63  ;;  %v2020_v63 = vld [vmem:[#allocation2 + $0xd9] sm:$0xff] }
 0x100   : > { %10261 = vmatprep.mubr.msk.bf16.mxu0 %vm423_vm1, %v10682_v33  ;;  %10243 = vmatprep.mubr.msk.bf16.mxu1 %vm423_vm1, %v10596_v26  ;;  %v2324_v26 = vld [vmem:[#allocation2 + $0xe2] sm:$0xff] }
 0x101   : > { %v2332_v14 = vpack.c.bf16 %v2324_v26, %v2323_v51 }
 0x107   : > { %10262 = vmatmul.mubr.msk.bf16.gmra.mxu0 %vm423_vm1, %v10692_v43  ;;  %10244 = vmatmul.mubr.msk.bf16.gmra.mxu1 %vm423_vm1, %v10625_v47  ;;  %v2021_v47 = vld [vmem:[#allocation2 + $0xe1] sm:$0xff] }
 0x108   : > { %10265 = vmatprep.mubr.msk.bf16.mxu0 %vm423_vm1, %v10694_v45  ;;  %10247 = vmatprep.mubr.msk.bf16.mxu1 %vm423_vm1, %v10634_v52  ;;  %v2029_v15 = vpack.c.bf16 %v2021_v47, %v2020_v63 }
 0x10f   : > { %10266 = vmatmul.mubr.msk.bf16.gmra.mxu0 %vm423_vm1, %v10702_v55  ;;  %10248 = vmatmul.mubr.msk.bf16.gmra.mxu1 %vm423_vm1, %v10650_v0 }
 0x110   : > { %10269 = vmatprep.mubr.msk.bf16.mxu0 %vm423_vm1, %v1486_v13  ;;  %10251 = vmatprep.mubr.msk.bf16.mxu1 %vm423_vm1, %v1215_v2 }
 0x117   : > { %10270 = vmatmul.mubr.msk.bf16.gmra.mxu0 %vm423_vm1, %v2332_v14  ;;  %10252 = vmatmul.mubr.msk.bf16.gmra.mxu1 %vm423_vm1, %v2029_v15 }
 0x14f   : > { %v10798_v52 = vpop.f32.mrf.mxu0  ;;  %v10800_v16 = vpop.f32.mrf.mxu1 }
 0x151   : > { %v10802_v17 = vpop.f32.mrf.mxu0  ;;  %v10804_v0 = vpop.f32.mrf.mxu1 }
 0x153   : > { %v10806_v18 = vpop.f32.mrf.mxu0  ;;  %v10808_v19 = vpop.f32.mrf.mxu1 }
 0x155   : > { %v10810_v20 = vpop.f32.mrf.mxu0  ;;  %v10812_v21 = vpop.f32.mrf.mxu1 }
 0x156   : > { %14528 = vst [vmem:[#allocation4_spill] sm:$0xff] %v10812_v21 }
 0x157   : > { %v10814_v22 = vpop.f32.mrf.mxu0  ;;  %v10816_v23 = vpop.f32.mrf.mxu1 }
 0x158   : > { %14529 = vst [vmem:[#allocation5_spill] sm:$0xff] %v10816_v23 }
 0x159   : > { %v10818_v24 = vpop.f32.mrf.mxu0  ;;  %v10820_v25 = vpop.f32.mrf.mxu1 }
 0x15a   : > { %14530 = vst [vmem:[#allocation6_spill] sm:$0xff] %v10820_v25 }
 0x15b   : > { %v10822_v27 = vpop.f32.mrf.mxu0  ;;  %v10824_v28 = vpop.f32.mrf.mxu1 }
 0x15c   : > { %14531 = vst [vmem:[#allocation7_spill] sm:$0xff] %v10824_v28 }
 0x15d   : > { %v10826_v29 = vpop.f32.mrf.mxu0  ;;  %v10828_v30 = vpop.f32.mrf.mxu1 }
 0x15e   : > { %14532 = vst [vmem:[#allocation8_spill] sm:$0xff] %v10828_v30 }
 0x15f   : > { %v10830_v31 = vpop.f32.mrf.mxu1  ;;  %v10151_v32 = vpop.f32.mrf.mxu0 }
 0x160   : > { %957 = vrot.lane.b32.xlu0 %v10151_v32, %s10405_s7 }
 0x161   : > { %v10833_v33 = vpop.f32.mrf.mxu1  ;;  %v874_v34 = vpop.f32.mrf.mxu0 }
 0x162   : > { %953 = vrot.lane.b32.xlu1 %v874_v34, %s10405_s7 }
 0x163   : > { %v10836_v35 = vpop.f32.mrf.mxu1  ;;  %v10152_v36 = vpop.f32.mrf.mxu0 }
 0x165   : > { %v10838_v37 = vpop.f32.mrf.mxu1  ;;  %v877_v38 = vpop.f32.mrf.mxu0 }
 0x166   : > { %14533 = vst [vmem:[#allocation9_spill] sm:$0xff] %v10838_v37  ;;  %959 = vrot.lane.b32.xlu1 %v10152_v36, %s10405_s7 }
 0x167   : > { %v10841_v39 = vpop.f32.mrf.mxu1  ;;  %v10155_v40 = vpop.f32.mrf.mxu0 }
 0x168   : > { %14534 = vst [vmem:[#allocation10_spill] sm:$0xff] %v10841_v39  ;;  %965 = vrot.lane.b32.xlu0 %v10155_v40, %s10405_s7 }
 0x169   : > { %v10844_v41 = vpop.f32.mrf.mxu1  ;;  %v890_v42 = vpop.f32.mrf.mxu0 }
 0x16a   : > { %14535 = vst [vmem:[#allocation11_spill] sm:$0xff] %v10844_v41  ;;  %955 = vrot.lane.b32.xlu1 %v877_v38, %s10405_s7 }
 0x16b   : > { %v10847_v43 = vpop.f32.mrf.mxu1  ;;  %v10156_v44 = vpop.f32.mrf.mxu0 }
 0x16c   : > { %14536 = vst [vmem:[#allocation12_spill] sm:$0xff] %v10847_v43  ;;  %961 = vrot.lane.b32.xlu0 %v890_v42, %s10405_s7 }
 0x16d   : > { %v10850_v45 = vpop.f32.mrf.mxu1  ;;  %v893_v48 = vpop.f32.mrf.mxu0 }
 0x16e   : > { %14537 = vst [vmem:[#allocation13_spill] sm:$0xff] %v10850_v45  ;;  %967 = vrot.lane.b32.xlu1 %v10156_v44, %s10405_s7 }
 0x16f   : > { %v10853_v49 = vpop.f32.mrf.mxu1  ;;  %v10159_v50 = vpop.f32.mrf.mxu0 }
 0x170   : > { %14538 = vst [vmem:[#allocation14_spill] sm:$0xff] %v10853_v49  ;;  %973 = vrot.lane.b32.xlu0 %v10159_v50, %s10405_s7 }
 0x171   : > { %v10856_v53 = vpop.f32.mrf.mxu1  ;;  %v906_v54 = vpop.f32.mrf.mxu0 }
 0x172   : > { %14539 = vst [vmem:[#allocation15_spill] sm:$0xff] %v10856_v53  ;;  %963 = vrot.lane.b32.xlu1 %v893_v48, %s10405_s7 }
 0x173   : > { %v10859_v55 = vpop.f32.mrf.mxu1  ;;  %v10160_v56 = vpop.f32.mrf.mxu0 }
 0x174   : > { %14540 = vst [vmem:[#allocation16_spill] sm:$0xff] %v10859_v55  ;;  %969 = vrot.lane.b32.xlu0 %v906_v54, %s10405_s7 }
 0x175   : > { %v10862_v57 = vpop.f32.mrf.mxu1  ;;  %v909_v58 = vpop.f32.mrf.mxu0 }
 0x176   : > { %14541 = vst [vmem:[#allocation17_spill] sm:$0xff] %v10862_v57  ;;  %975 = vrot.lane.b32.xlu1 %v10160_v56, %s10405_s7 }
 0x177   : > { %v10865_v59 = vpop.f32.mrf.mxu1  ;;  %v10163_v46 = vpop.f32.mrf.mxu0 }
 0x178   : > { %14542 = vst [vmem:[#allocation18_spill] sm:$0xff] %v10865_v59  ;;  %981 = vrot.lane.b32.xlu0 %v10163_v46, %s10405_s7 }
 0x179   : > { %v10868_v60 = vpop.f32.mrf.mxu1  ;;  %v922_v61 = vpop.f32.mrf.mxu0 }
 0x17a   : > { %14543 = vst [vmem:[#allocation19_spill] sm:$0xff] %v10868_v60  ;;  %971 = vrot.lane.b32.xlu1 %v909_v58, %s10405_s7 }
 0x17b   : > { %v10871_v62 = vpop.f32.mrf.mxu1  ;;  %v10164_v1 = vpop.f32.mrf.mxu0 }
 0x17c   : > { %14544 = vst [vmem:[#allocation20_spill] sm:$0xff] %v10871_v62  ;;  %977 = vrot.lane.b32.xlu0 %v922_v61, %s10405_s7 }
 0x17d   : > { %v10874_v2 = vpop.f32.mrf.mxu1  ;;  %v925_v3 = vpop.f32.mrf.mxu0 }
 0x17e   : > { %14545 = vst [vmem:[#allocation21_spill] sm:$0xff] %v10874_v2  ;;  %983 = vrot.lane.b32.xlu1 %v10164_v1, %s10405_s7 }
 0x17f   : > { %v10877_v5 = vpop.f32.mrf.mxu1  ;;  %v10879_v6 = vpop.f32.mrf.mxu0 }
 0x180   : > { %14546 = vst [vmem:[#allocation22_spill] sm:$0xff] %v10877_v5  ;;  %1403 = vrot.lane.b32.xlu0 %v10879_v6, %s10401_s15 }
 0x181   : > { %v10883_v8 = vpop.f32.mrf.mxu1  ;;  %v10885_v9 = vpop.f32.mrf.mxu0 }
 0x182   : > { %14547 = vst [vmem:[#allocation23_spill] sm:$0xff] %v10883_v8  ;;  %979 = vrot.lane.b32.xlu1 %v925_v3, %s10405_s7 }
 0x183   : > { %v10888_v10 = vpop.f32.mrf.mxu1  ;;  %v10890_v11 = vpop.f32.mrf.mxu0 }
 0x184   : > { %14548 = vst [vmem:[#allocation24_spill] sm:$0xff] %v10888_v10  ;;  %1399 = vrot.lane.b32.xlu0 %v10885_v9, %s10401_s15 }
 0x185   : > { %v10894_v12 = vpop.f32.mrf.mxu1  ;;  %v10896_v13 = vpop.f32.mrf.mxu0 }
 0x186   : > { %14549 = vst [vmem:[#allocation25_spill] sm:$0xff] %v10894_v12  ;;  %1405 = vrot.lane.b32.xlu1 %v10890_v11, %s10401_s15 }
 0x187   : > { %v10900_v51 = vpop.f32.mrf.mxu1  ;;  %v10902_v26 = vpop.f32.mrf.mxu0 }
 0x188   : > { %14550 = vst [vmem:[#allocation26_spill] sm:$0xff] %v10900_v51  ;;  %14551 = vst [vmem:[#allocation27_spill] sm:$0xff] %v10902_v26  ;;  %1411 = vrot.lane.b32.xlu0 %v10902_v26, %s10401_s15 }
 0x189   : > { %v10906_v63 = vpop.f32.mrf.mxu1  ;;  %v10908_v47 = vpop.f32.mrf.mxu0 }
 0x18a   : > { %14552 = vst [vmem:[#allocation28_spill] sm:$0xff] %v10906_v63  ;;  %1401 = vrot.lane.b32.xlu1 %v10896_v13, %s10401_s15 }
 0x18b   : > { %v10912_v14 = vpop.f32.mrf.mxu1  ;;  %v10914_v15 = vpop.f32.mrf.mxu0 }
 0x18c   : > { %14553 = vst [vmem:[#allocation29_spill] sm:$0xff] %v10912_v14  ;;  %14554 = vst [vmem:[#allocation30_spill] sm:$0xff] %v10914_v15  ;;  %1407 = vrot.lane.b32.xlu0 %v10908_v47, %s10401_s15 }
 0x18d   : > { %v10918_v32 = vpop.f32.mrf.mxu1  ;;  %v10920_v34 = vpop.f32.mrf.mxu0 }
 0x18e   : > { %14555 = vst [vmem:[#allocation31_spill] sm:$0xff] %v10918_v32  ;;  %1413 = vrot.lane.b32.xlu1 %v10914_v15, %s10401_s15 }
 0x18f   : > { %v10924_v36 = vpop.f32.mrf.mxu1  ;;  %v10926_v38 = vpop.f32.mrf.mxu0 }
 0x190   : > { %14556 = vst [vmem:[#allocation32_spill] sm:$0xff] %v10924_v36  ;;  %1419 = vrot.lane.b32.xlu0 %v10926_v38, %s10401_s15 }
 0x191   : > { %v10930_v40 = vpop.f32.mrf.mxu1  ;;  %v10932_v42 = vpop.f32.mrf.mxu0 }
 0x192   : > { %14557 = vst [vmem:[#allocation33_spill] sm:$0xff] %v10930_v40  ;;  %1409 = vrot.lane.b32.xlu1 %v10920_v34, %s10401_s15 }
 0x193   : > { %v10936_v44 = vpop.f32.mrf.mxu1  ;;  %v10938_v48 = vpop.f32.mrf.mxu0 }
 0x194   : > { %14558 = vst [vmem:[#allocation34_spill] sm:$0xff] %v10936_v44  ;;  %14559 = vst [vmem:[#allocation35_spill] sm:$0xff] %v10938_v48  ;;  %1415 = vrot.lane.b32.xlu0 %v10932_v42, %s10401_s15 }
 0x195   : > { %v10942_v50 = vpop.f32.mrf.mxu1  ;;  %v10944_v54 = vpop.f32.mrf.mxu0 }
 0x196   : > { %14560 = vst [vmem:[#allocation36_spill] sm:$0xff] %v10942_v50  ;;  %14561 = vst [vmem:[#allocation37_spill] sm:$0xff] %v10944_v54  ;;  %1421 = vrot.lane.b32.xlu1 %v10938_v48, %s10401_s15 }
 0x197   : > { %v10948_v56 = vpop.f32.mrf.mxu1  ;;  %v10950_v58 = vpop.f32.mrf.mxu0 }
 0x198   : > { %14562 = vst [vmem:[#allocation38_spill] sm:$0xff] %v10948_v56  ;;  %14563 = vst [vmem:[#allocation39_spill] sm:$0xff] %v10950_v58  ;;  %1427 = vrot.lane.b32.xlu0 %v10950_v58, %s10401_s15 }
 0x199   : > { %v10954_v46 = vpop.f32.mrf.mxu1  ;;  %v10956_v61 = vpop.f32.mrf.mxu0 }
 0x19a   : > { %14564 = vst [vmem:[#allocation40_spill] sm:$0xff] %v10954_v46  ;;  %14565 = vst [vmem:[#allocation41_spill] sm:$0xff] %v10956_v61  ;;  %1417 = vrot.lane.b32.xlu1 %v10944_v54, %s10401_s15 }
 0x19b   : > { %v10960_v1 = vpop.f32.mrf.mxu1  ;;  %v10962_v3 = vpop.f32.mrf.mxu0 }
 0x19c   : > { %14566 = vst [vmem:[#allocation42_spill] sm:$0xff] %v10960_v1  ;;  %14567 = vst [vmem:[#allocation43_spill] sm:$0xff] %v10962_v3  ;;  %1423 = vrot.lane.b32.xlu0 %v10956_v61, %s10401_s15 }
 0x19d   : > { %v10966_v2 = vpop.f32.mrf.mxu1  ;;  %v10968_v62 = vpop.f32.mrf.mxu0 }
 0x19e   : > { %14568 = vst [vmem:[#allocation44_spill] sm:$0xff] %v10966_v2  ;;  %14569 = vst [vmem:[#allocation45_spill] sm:$0xff] %v10968_v62  ;;  %1429 = vrot.lane.b32.xlu1 %v10962_v3, %s10401_s15 }
 0x19f   : > { %v10223_v46 = vpop.f32.mrf.mxu0  ;;  %v10205_v60 = vpop.f32.mrf.mxu1 }
 0x1a0   : > { %1946 = vrot.lane.b32.xlu0 %v10223_v46, %s10405_s7 }
 0x1a1   : > { %v1559_v1 = vpop.f32.mrf.mxu1  ;;  %v1863_v56 = vpop.f32.mrf.mxu0 }
 0x1a2   : > { %1425 = vrot.lane.b32.xlu1 %v10968_v62, %s10401_s15 }
 0x1a3   : > { %v10206_v59 = vpop.f32.mrf.mxu1  ;;  %v10224_v46 = vpop.f32.mrf.mxu0 }
 0x1a4   : > { %1942 = vrot.lane.b32.xlu0 %v1863_v56, %s10405_s7 }
 0x1a5   : > { %v1562_v2 = vpop.f32.mrf.mxu1  ;;  %v1866_v50 = vpop.f32.mrf.mxu0 }
 0x1a6   : > { %1642 = vrot.lane.b32.xlu1 %v10205_v60, %s10405_s7 }
 0x1a7   : > { %v10227_v56 = vpop.f32.mrf.mxu0  ;;  %v10209_v44 = vpop.f32.mrf.mxu1 }
 0x1a8   : > { %1644 = vrot.lane.b32.xlu0 %v10206_v59, %s10405_s7 }
 0x1aa   : > { %1706 = vrot.lane.b32.xlu1 %v10205_v60, %s10407_s9  ;;  %v1575_v60 = vpop.f32.mrf.mxu1 }
 0x1ac   : > { %1708 = vrot.lane.b32.xlu0 %v10206_v59, %s10407_s9  ;;  %v1879_v59 = vpop.f32.mrf.mxu0  ;;  %v10210_v57 = vpop.f32.mrf.mxu1 }
 0x1ae   : > { %1638 = vrot.lane.b32.xlu1 %v1559_v1, %s10405_s7 }
 0x1b0   : > { %1640 = vrot.lane.b32.xlu0 %v1562_v2, %s10405_s7 }
 0x1b2   : > { %1702 = vrot.lane.b32.xlu1 %v1559_v1, %s10407_s9  ;;  %v1578_v1 = vpop.f32.mrf.mxu1 }
 0x1b4   : > { %1704 = vrot.lane.b32.xlu0 %v1562_v2, %s10407_s9  ;;  %v10228_v2 = vpop.f32.mrf.mxu0 }
 0x1b6   : > { %1948 = vrot.lane.b32.xlu1 %v10224_v46, %s10405_s7 }
 0x1b8   : > { %1954 = vrot.lane.b32.xlu0 %v10227_v56, %s10405_s7  ;;  %v10997_v56 = vpop.permute.xlu1 %6143 }
 0x1b9   : > { %14570 = vst [vmem:[#allocation46_spill] sm:$0xff] %v10997_v56 }
 0x1ba   : > { %1944 = vrot.lane.b32.xlu1 %v1866_v50, %s10405_s7  ;;  %v1882_v50 = vpop.f32.mrf.mxu0 }
 0x1bc   : > { %1950 = vrot.lane.b32.xlu0 %v1879_v59, %s10405_s7  ;;  %v10231_v46 = vpop.f32.mrf.mxu0  ;;  %v10213_v59 = vpop.f32.mrf.mxu1 }
 0x1be   : > { %1650 = vrot.lane.b32.xlu1 %v10209_v44, %s10405_s7  ;;  %v1591_v55 = vpop.f32.mrf.mxu1 }
 0x1c0   : > { %1652 = vrot.lane.b32.xlu0 %v10210_v57, %s10405_s7 }
 0x1c2   : > { %1714 = vrot.lane.b32.xlu1 %v10209_v44, %s10407_s9  ;;  %v10999_v44 = vpop.permute.xlu0 %2587 }
 0x1c3   : > { %14571 = vst [vmem:[#allocation47_spill] sm:$0xff] %v10999_v44 }
 0x1c4   : > { %1716 = vrot.lane.b32.xlu0 %v10210_v57, %s10407_s9  ;;  %v1895_v57 = vpop.f32.mrf.mxu0 }
 0x1c6   : > { %1646 = vrot.lane.b32.xlu1 %v1575_v60, %s10405_s7 }
 0x1c8   : > { %1648 = vrot.lane.b32.xlu0 %v1578_v1, %s10405_s7 }
 0x1ca   : > { %1710 = vrot.lane.b32.xlu1 %v1575_v60, %s10407_s9 }
 0x1cc   : > { %1712 = vrot.lane.b32.xlu0 %v1578_v1, %s10407_s9 }
 0x1ce   : > { %1956 = vrot.lane.b32.xlu1 %v10228_v2, %s10405_s7  ;;  %v10214_v2 = vpop.f32.mrf.mxu1 }
 0x1d0   : > { %1962 = vrot.lane.b32.xlu0 %v10231_v46, %s10405_s7  ;;  %v1594_v53 = vpop.f32.mrf.mxu1 }
 0x1d2   : > { %1952 = vrot.lane.b32.xlu1 %v1882_v50, %s10405_s7  ;;  %v11006_v60 = vpop.permute.xlu0 %957  ;;  %v10217_v32 = vpop.f32.mrf.mxu1 }
 0x1d4   : > { %v11003_v40 = vpop.permute.xlu1 %953  ;;  %1958 = vrot.lane.b32.xlu0 %v1895_v57, %s10405_s7  ;;  %v10232_v57 = vpop.f32.mrf.mxu0 }
 0x1d5   : > { %v1607_v28 = vpop.f32.mrf.mxu1 }
 0x1d6   : > { %1658 = vrot.lane.b32.xlu1 %v10213_v59, %s10405_s7  ;;  %v1898_v62 = vpop.f32.mrf.mxu0 }
 0x1d8   : > { %v11009_v1 = vpop.permute.xlu1 %959  ;;  %1660 = vrot.lane.b32.xlu0 %v10214_v2, %s10405_s7 }
 0x1da   : > { %v11012_v56 = vpop.permute.xlu0 %965  ;;  %1722 = vrot.lane.b32.xlu1 %v10213_v59, %s10407_s9 }
 0x1dc   : > { %v11015_v50 = vpop.permute.xlu1 %955  ;;  %1724 = vrot.lane.b32.xlu0 %v10214_v2, %s10407_s9  ;;  %v10235_v2 = vpop.f32.mrf.mxu0 }
 0x1de   : > { %v11018_v46 = vpop.permute.xlu0 %961  ;;  %1654 = vrot.lane.b32.xlu1 %v1591_v55, %s10405_s7 }
 0x1e0   : > { %v11021_v36 = vpop.permute.xlu1 %967  ;;  %1656 = vrot.lane.b32.xlu0 %v1594_v53, %s10405_s7 }
 0x1e2   : > { %v11024_v49 = vpop.permute.xlu0 %973  ;;  %1718 = vrot.lane.b32.xlu1 %v1591_v55, %s10407_s9  ;;  %v1911_v55 = vpop.f32.mrf.mxu0 }
 0x1e4   : > { %v11027_v59 = vpop.permute.xlu1 %963  ;;  %1720 = vrot.lane.b32.xlu0 %v1594_v53, %s10407_s9 }
 0x1e6   : > { %v11030_v30 = vpop.permute.xlu0 %969  ;;  %1964 = vrot.lane.b32.xlu1 %v10232_v57, %s10405_s7  ;;  %v10218_v57 = vpop.f32.mrf.mxu1 }
 0x1e8   : > { %v11033_v3 = vpop.permute.xlu1 %975  ;;  %1970 = vrot.lane.b32.xlu0 %v10235_v2, %s10405_s7 }
 0x1ea   : > { %v11036_v45 = vpop.permute.xlu0 %981  ;;  %1960 = vrot.lane.b32.xlu1 %v1898_v62, %s10405_s7 }
 0x1eb   : > { %14572 = vst [vmem:[#allocation48_spill] sm:$0xff] %v11036_v45 }
 0x1ec   : > { %v11039_v14 = vpop.permute.xlu1 %971  ;;  %1966 = vrot.lane.b32.xlu0 %v1911_v55, %s10405_s7  ;;  %v10236_v55 = vpop.f32.mrf.mxu0 }
 0x1ed   : > { %14573 = vst [vmem:[#allocation49_spill] sm:$0xff] %v11039_v14  ;;  %v10408_v14 = vmov 1966171168  }
 0x1ee   : > { %v11042_v53 = vpop.permute.xlu0 %977  ;;  %1666 = vrot.lane.b32.xlu1 %v10217_v32, %s10405_s7 }
 0x1ef   : > { %14574 = vst [vmem:[#allocation50_spill] sm:$0xff] %v11042_v53  ;;  %v1610_v53 = vpop.f32.mrf.mxu1 }
 0x1f0   : > { %v11045_v43 = vpop.permute.xlu1 %983  ;;  %1668 = vrot.lane.b32.xlu0 %v10218_v57, %s10405_s7 }
 0x1f1   : > { %14575 = vst [vmem:[#allocation51_spill] sm:$0xff] %v11045_v43 }
 0x1f2   : > { %v11048_v2 = vpop.permute.xlu0 %1403  ;;  %1730 = vrot.lane.b32.xlu1 %v10217_v32, %s10407_s9 }
 0x1f3   : > { %14576 = vst [vmem:[#allocation52_spill] sm:$0xff] %v11048_v2  ;;  %v1914_v2 = vpop.f32.mrf.mxu0 }
 0x1f4   : > { %v11051_v62 = vpop.permute.xlu1 %979  ;;  %1732 = vrot.lane.b32.xlu0 %v10218_v57, %s10407_s9 }
 0x1f5   : > { %14577 = vst [vmem:[#allocation53_spill] sm:$0xff] %v11051_v62  ;;  %v10259_v57 = vpop.f32.mrf.mxu0 }
 0x1f6   : > { %v11054_v61 = vpop.permute.xlu0 %1399  ;;  %1662 = vrot.lane.b32.xlu1 %v1607_v28, %s10405_s7 }
 0x1f7   : > { %14578 = vst [vmem:[#allocation54_spill] sm:$0xff] %v11054_v61  ;;  %v10241_v61 = vpop.f32.mrf.mxu1 }
 0x1f8   : > { %v11057_v25 = vpop.permute.xlu1 %1405  ;;  %1664 = vrot.lane.b32.xlu0 %v1610_v53, %s10405_s7 }
 0x1f9   : > { %14579 = vst [vmem:[#allocation55_spill] sm:$0xff] %v11057_v25 }
 0x1fa   : > { %v11060_v43 = vpop.permute.xlu0 %1411  ;;  %1726 = vrot.lane.b32.xlu1 %v1607_v28, %s10407_s9  ;;  %v2405_v28 = vpop.f32.mrf.mxu0 }
 0x1fb   : > { %14580 = vst [vmem:[#allocation56_spill] sm:$0xff] %v11060_v43  ;;  %v2102_v43 = vpop.f32.mrf.mxu1 }
 0x1fc   : > { %v11063_v32 = vpop.permute.xlu1 %1401  ;;  %1728 = vrot.lane.b32.xlu0 %v1610_v53, %s10407_s9 }
 0x1fd   : > { %14581 = vst [vmem:[#allocation57_spill] sm:$0xff] %v11063_v32 }
 0x1fe   : > { %v11066_v62 = vpop.permute.xlu0 %1407  ;;  %1972 = vrot.lane.b32.xlu1 %v10236_v55, %s10405_s7  ;;  %v10242_v55 = vpop.f32.mrf.mxu1 }
 0x1ff   : > { %14582 = vst [vmem:[#allocation58_spill] sm:$0xff] %v11066_v62 }
 0x200   : > { %v11069_v58 = vpop.permute.xlu1 %1413  ;;  %2488 = vrot.lane.b32.xlu0 %v10259_v57, %s10406_s8 }
 0x201   : > { %14583 = vst [vmem:[#allocation59_spill] sm:$0xff] %v11069_v58 }
 0x202   : > { %v11072_v25 = vpop.permute.xlu0 %1419  ;;  %1968 = vrot.lane.b32.xlu1 %v1914_v2, %s10405_s7 }
 0x203   : > { %14584 = vst [vmem:[#allocation60_spill] sm:$0xff] %v11072_v25 }
 0x204   : > { %v11075_v63 = vpop.permute.xlu1 %1409  ;;  %2484 = vrot.lane.b32.xlu0 %v2405_v28, %s10406_s8  ;;  %v10260_v28 = vpop.f32.mrf.mxu0 }
 0x205   : > { %14585 = vst [vmem:[#allocation61_spill] sm:$0xff] %v11075_v63 }
 0x206   : > { %v11078_v53 = vpop.permute.xlu0 %1415  ;;  %2185 = vrot.lane.b32.xlu1 %v10241_v61, %s10405_s7 }
 0x207   : > { %14586 = vst [vmem:[#allocation62_spill] sm:$0xff] %v11078_v53  ;;  %v2105_v53 = vpop.f32.mrf.mxu1 }
 0x208   : > { %v11081_v62 = vpop.permute.xlu1 %1421  ;;  %2187 = vrot.lane.b32.xlu0 %v10242_v55, %s10405_s7 }
 0x209   : > { %14587 = vst [vmem:[#allocation63_spill] sm:$0xff] %v11081_v62 }
 0x20a   : > { %v11084_v57 = vpop.permute.xlu0 %1427  ;;  %2249 = vrot.lane.b32.xlu1 %v10241_v61, %s10407_s9 }
 0x20b   : > { %14588 = vst [vmem:[#allocation64_spill] sm:$0xff] %v11084_v57  ;;  %v2408_v57 = vpop.f32.mrf.mxu0 }
 0x20c   : > { %v11087_v2 = vpop.permute.xlu1 %1417  ;;  %2251 = vrot.lane.b32.xlu0 %v10242_v55, %s10407_s9 }
 0x20d   : > { %14589 = vst [vmem:[#allocation65_spill] sm:$0xff] %v11087_v2  ;;  %v10263_v55 = vpop.f32.mrf.mxu0 }
 0x20e   : > { %v11090_v63 = vpop.permute.xlu0 %1423  ;;  %2181 = vrot.lane.b32.xlu1 %v2102_v43, %s10405_s7 }
 0x20f   : > { %14590 = vst [vmem:[#allocation66_spill] sm:$0xff] %v11090_v63  ;;  %v10245_v63 = vpop.f32.mrf.mxu1 }
 0x210   : > { %v11093_v25 = vpop.permute.xlu1 %1429  ;;  %2183 = vrot.lane.b32.xlu0 %v2105_v53, %s10405_s7 }
 0x211   : > { %14591 = vst [vmem:[#allocation67_spill] sm:$0xff] %v11093_v25 }
 0x212   : > { %v11096_v62 = vpop.permute.xlu0 %1946  ;;  %2245 = vrot.lane.b32.xlu1 %v2102_v43, %s10407_s9  ;;  %v2421_v43 = vpop.f32.mrf.mxu0 }
 0x213   : > { %14592 = vst [vmem:[#allocation68_spill] sm:$0xff] %v11096_v62  ;;  %v2118_v62 = vpop.f32.mrf.mxu1 }
 0x214   : > { %v11099_v61 = vpop.permute.xlu1 %1425  ;;  %2247 = vrot.lane.b32.xlu0 %v2105_v53, %s10407_s9 }
 0x215   : > { %14593 = vst [vmem:[#allocation69_spill] sm:$0xff] %v11099_v61 }
 0x216   : > { %v11102_v2 = vpop.permute.xlu0 %1942  ;;  %2490 = vrot.lane.b32.xlu1 %v10260_v28, %s10406_s8  ;;  %v10246_v28 = vpop.f32.mrf.mxu1 }
 0x217   : > { %14594 = vst [vmem:[#allocation70_spill] sm:$0xff] %v11102_v2 }
 0x218   : > { %v11105_v58 = vpop.permute.xlu1 %1642  ;;  %2496 = vrot.lane.b32.xlu0 %v10263_v55, %s10406_s8 }
 0x21a   : > { %v11108_v25 = vpop.permute.xlu0 %1644  ;;  %2486 = vrot.lane.b32.xlu1 %v2408_v57, %s10406_s8 }
 0x21c   : > { %v11111_v32 = vpop.permute.xlu1 %1706  ;;  %2492 = vrot.lane.b32.xlu0 %v2421_v43, %s10406_s8  ;;  %v10264_v43 = vpop.f32.mrf.mxu0 }
 0x21d   : > { %14595 = vst [vmem:[#allocation71_spill] sm:$0xff] %v11111_v32 }
 0x21e   : > { %v11114_v53 = vpop.permute.xlu0 %1708  ;;  %2193 = vrot.lane.b32.xlu1 %v10245_v63, %s10405_s7  ;;  %v2424_v45 = vpop.f32.mrf.mxu0 }
 0x21f   : > { %14596 = vst [vmem:[#allocation72_spill] sm:$0xff] %v11114_v53  ;;  %v2121_v53 = vpop.f32.mrf.mxu1 }
 0x220   : > { %v11117_v61 = vpop.permute.xlu1 %1638  ;;  %2195 = vrot.lane.b32.xlu0 %v10246_v28, %s10405_s7 }
 0x222   : > { %v11120_v55 = vpop.permute.xlu0 %1640  ;;  %2257 = vrot.lane.b32.xlu1 %v10245_v63, %s10407_s9 }
 0x224   : > { %v11123_v57 = vpop.permute.xlu1 %1702  ;;  %2259 = vrot.lane.b32.xlu0 %v10246_v28, %s10407_s9  ;;  %v10267_v28 = vpop.f32.mrf.mxu0 }
 0x225   : > { %14597 = vst [vmem:[#allocation73_spill] sm:$0xff] %v11123_v57 }
 0x226   : > { %v11126_v2 = vpop.permute.xlu0 %1704  ;;  %2189 = vrot.lane.b32.xlu1 %v2118_v62, %s10405_s7 }
 0x227   : > { %14598 = vst [vmem:[#allocation74_spill] sm:$0xff] %v11126_v2  ;;  %v10249_v2 = vpop.f32.mrf.mxu1 }
 0x228   : > { %v11129_v32 = vpop.permute.xlu1 %1948  ;;  %2191 = vrot.lane.b32.xlu0 %v2121_v53, %s10405_s7 }
 0x229   : > { %14599 = vst [vmem:[#allocation75_spill] sm:$0xff] %v11129_v32 }
 0x22a   : > { %v11132_v23 = vpop.permute.xlu0 %1954  ;;  %2253 = vrot.lane.b32.xlu1 %v2118_v62, %s10407_s9  ;;  %v2437_v62 = vpop.f32.mrf.mxu0 }
 0x22b   : > { %14600 = vst [vmem:[#allocation76_spill] sm:$0xff] %v11132_v23  ;;  %v2134_v23 = vpop.f32.mrf.mxu1 }
 0x22c   : > { %v11135_v63 = vpop.permute.xlu1 %1944  ;;  %2255 = vrot.lane.b32.xlu0 %v2121_v53, %s10407_s9 }
 0x22d   : > { %14601 = vst [vmem:[#allocation77_spill] sm:$0xff] %v11135_v63 }
 0x22e   : > { %v11138_v57 = vpop.permute.xlu0 %1950  ;;  %2498 = vrot.lane.b32.xlu1 %v10264_v43, %s10406_s8  ;;  %v10250_v43 = vpop.f32.mrf.mxu1 }
 0x22f   : > { %14602 = vst [vmem:[#allocation78_spill] sm:$0xff] %v11138_v57 }
 0x230   : > { %v11141_v51 = vpop.permute.xlu1 %1650  ;;  %2504 = vrot.lane.b32.xlu0 %v10267_v28, %s10406_s8 }
 0x232   : > { %v11144_v32 = vpop.permute.xlu0 %1652  ;;  %2494 = vrot.lane.b32.xlu1 %v2424_v45, %s10406_s8 }
 0x234   : > { %v11147_v41 = vpop.permute.xlu1 %1714  ;;  %2500 = vrot.lane.b32.xlu0 %v2437_v62, %s10406_s8  ;;  %v10268_v62 = vpop.f32.mrf.mxu0 }
 0x235   : > { %14603 = vst [vmem:[#allocation79_spill] sm:$0xff] %v11147_v41  ;;  %v1003_v41 = vadd.f32 %v10798_v52, %v11006_v60 }
 0x236   : > { %v11150_v53 = vpop.permute.xlu0 %1716  ;;  %2201 = vrot.lane.b32.xlu1 %v10249_v2, %s10405_s7 }
 0x237   : > { %14604 = vst [vmem:[#allocation80_spill] sm:$0xff] %v11150_v53  ;;  %v2137_v53 = vpop.f32.mrf.mxu1 }
 0x238   : > { %v11153_v57 = vpop.permute.xlu1 %1646  ;;  %2203 = vrot.lane.b32.xlu0 %v10250_v43, %s10405_s7 }
 0x23a   : > { %v11156_v28 = vpop.permute.xlu0 %1648  ;;  %2265 = vrot.lane.b32.xlu1 %v10249_v2, %s10407_s9  ;;  %v2440_v2 = vpop.f32.mrf.mxu0 }
 0x23c   : > { %v11159_v45 = vpop.permute.xlu1 %1710  ;;  %2267 = vrot.lane.b32.xlu0 %v10250_v43, %s10407_s9  ;;  %v1001_v43 = vadd.f32 %v11003_v40, %v10802_v17  ;;  %v10271_v7 = vpop.f32.mrf.mxu0 }
 0x23d   : > { %14605 = vst [vmem:[#allocation81_spill] sm:$0xff] %v11159_v45 }
 0x23e   : > { %v11162_v63 = vpop.permute.xlu0 %1712  ;;  %2197 = vrot.lane.b32.xlu1 %v2134_v23, %s10405_s7  ;;  %v1367_v21 = vadd.f32 %v10885_v9, %v1001_v43 }
 0x23f   : > { %14606 = vst [vmem:[#allocation82_spill] sm:$0xff] %v11162_v63  ;;  %v1369_v63 = vadd.f32 %v10879_v6, %v1003_v41 }
 0x240   : > { %v11167_v39 = vpop.permute.xlu1 %1956  ;;  %2199 = vrot.lane.b32.xlu0 %v2137_v53, %s10405_s7  ;;  %v1686_v40 = vadd.f32 %v11117_v61, %v1367_v21 }
 0x241   : > { %14607 = vst [vmem:[#allocation83_spill] sm:$0xff] %v11167_v39  ;;  %v1688_v60 = vadd.f32 %v11105_v58, %v1369_v63  ;;  %v2453_v58 = vpop.f32.mrf.mxu0 }
 0x242   : > { %v11170_v54 = vpop.permute.xlu0 %1962  ;;  %2261 = vrot.lane.b32.xlu1 %v2134_v23, %s10407_s9  ;;  %v2640_v23 = vunpack.c.l.s4 %v10408_v14  ;;  %v2590_v43 = vadd.f32 %v10999_v44, %v1686_v40 }
 0x243   : > { %14608 = vst [vmem:[#allocation84_spill] sm:$0xff] %v11170_v54  ;;  %v10253_v54 = vpop.f32.mrf.mxu1  ;;  %v2592_v41 = vadd.f32 %v10999_v44, %v1688_v60 }
 0x244   : > { %v11176_v45 = vpop.permute.xlu1 %1952  ;;  %2263 = vrot.lane.b32.xlu0 %v2137_v53, %s10407_s9  ;;  %v2606_v60 = vmax.f32 %v2590_v43, 0.0 }
 0x245   : > { %14609 = vst [vmem:[#allocation85_spill] sm:$0xff] %v11176_v45  ;;  %v2150_v63 = vpop.f32.mrf.mxu1  ;;  %v2608_v14 = vmax.f32 %v2592_v41, 0.0 }
 0x246   : > { %v11180_v39 = vpop.permute.xlu0 %1958  ;;  %2506 = vrot.lane.b32.xlu1 %v10268_v62, %s10406_s8  ;;  %v2641_v62 = vunpack.c.0.s8 %v2640_v23  ;;  %v3566_v37 = vcombine.high %v2606_v60, %v2606_v60 }
 0x247   : > { %14610 = vst [vmem:[#allocation86_spill] sm:$0xff] %v11180_v39  ;;  %v3664_v43 = vcombine.high %v2608_v14, %v2608_v14 }
 0x248   : > { %v11184_v12 = vpop.permute.xlu1 %1658  ;;  %2512 = vrot.lane.b32.xlu0 %v10271_v7, %s10406_s8  ;;  %v10254_v7 = vpop.f32.mrf.mxu1  ;;  %v11200_v21 = vsub.s32 %v2641_v62, %v10480_v4 }
 0x24a   : > { %v11189_v53 = vpop.permute.xlu0 %1660  ;;  %2502 = vrot.lane.b32.xlu1 %v2440_v2, %s10406_s8  ;;  %v3671_v2 = vrot.slane %v2608_v14, %v11200_v21  ;;  %v3678_v14 = vrot.slane %v3664_v43, %v11200_v21 }
 0x24b   : > { %14611 = vst [vmem:[#allocation87_spill] sm:$0xff] %v11189_v53 }
 0x24c   : > { %v11192_v39 = vpop.permute.xlu1 %1722  ;;  %2508 = vrot.lane.b32.xlu0 %v2453_v58, %s10406_s8  ;;  %v3679_v40 = vcombine.high %v3671_v2, %v3671_v2  ;;  %v3573_v58 = vrot.slane %v2606_v60, %v11200_v21  ;;  %v3680_v43 = vcombine.high %v3678_v14, %v3678_v14 }
 0x24d   : > { %14612 = vst [vmem:[#allocation88_spill] sm:$0xff] %v11192_v39 }
 0x24e   : > { %v11196_v45 = vpop.permute.xlu0 %1724  ;;  %2209 = vrot.lane.b32.xlu1 %v10253_v54, %s10405_s7 }
 0x24f   : > { %14613 = vst [vmem:[#allocation89_spill] sm:$0xff] %v11196_v45  ;;  %v2153_v45 = vpop.f32.mrf.mxu1 }
 0x250   : > { %v11202_v61 = vpop.permute.xlu1 %1654  ;;  %2211 = vrot.lane.b32.xlu0 %v10254_v7, %s10405_s7 }
 0x252   : > { %v11206_v23 = vpop.permute.xlu0 %1656  ;;  %2273 = vrot.lane.b32.xlu1 %v10253_v54, %s10407_s9  ;;  %v3701_v54 = vrot.slane %v3679_v40, %v11200_v21 }
 0x253   : > { %14614 = vst [vmem:[#allocation90_spill] sm:$0xff] %v11206_v23  ;;  %v3581_v23 = vcombine.high %v3573_v58, %v3573_v58 }
 0x254   : > { %v11209_v41 = vpop.permute.xlu1 %1718  ;;  %2275 = vrot.lane.b32.xlu0 %v10254_v7, %s10407_s9  ;;  %v1004_v7 = vadd.f32 %v10806_v18, %v11009_v1 }
 0x255   : > { %14615 = vst [vmem:[#allocation91_spill] sm:$0xff] %v11209_v41  ;;  %v3603_v40 = vrot.slane %v3581_v23, %v11200_v21  ;;  %v3711_v23 = vcombine.high %v3701_v54, %v3701_v54 }
 0x256   : > { %v11213_v62 = vpop.permute.xlu0 %1720  ;;  %2205 = vrot.lane.b32.xlu1 %v2150_v63, %s10405_s7  ;;  %v1370_v1 = vadd.f32 %v10890_v11, %v1004_v7  ;;  %v1002_v7 = vadd.f32 %v11015_v50, %v10810_v20  ;;  %v3708_v50 = vrot.slane %v3680_v43, %v11200_v21 }
 0x257   : > { %14616 = vst [vmem:[#allocation92_spill] sm:$0xff] %v11213_v62  ;;  %v11226_v62 = vsub.s32 0, %v10480_v4  ;;  %v3687_v4 = vrot.slane %v3671_v2, %v11200_v21  ;;  %v3589_v2 = vrot.slane %v3573_v58, %v11200_v21  ;;  %v3613_v43 = vcombine.high %v3603_v40, %v3603_v40 }
 0x258   : > { %v11216_v39 = vpop.permute.xlu1 %1964  ;;  %2207 = vrot.lane.b32.xlu0 %v2153_v45, %s10405_s7  ;;  %v1368_v58 = vadd.f32 %v10896_v13, %v1002_v7 }
 0x259   : > { %14617 = vst [vmem:[#allocation93_spill] sm:$0xff] %v11216_v39  ;;  %v10272_v39 = vpop.f32.mrf.mxu0 }
 0x25a   : > { %v11219_v53 = vpop.permute.xlu0 %1970  ;;  %2269 = vrot.lane.b32.xlu1 %v2150_v63, %s10407_s9  ;;  %v4421_v63 = vrot.slane %v3701_v54, %v11226_v62 }
 0x25b   : > { %14618 = vst [vmem:[#allocation94_spill] sm:$0xff] %v11219_v53 }
 0x25c   : > { %v11228_v41 = vpop.permute.xlu1 %1960  ;;  %2271 = vrot.lane.b32.xlu0 %v2153_v45, %s10407_s9  ;;  %v1689_v45 = vadd.f32 %v11108_v25, %v1370_v1  ;;  %v4417_v25 = vrot.slane %v3687_v4, %v11226_v62 }
 0x25d   : > { %14619 = vst [vmem:[#allocation95_spill] sm:$0xff] %v11228_v41  ;;  %v2456_v41 = vpop.f32.mrf.mxu0 }
 0x25e   : > { %v11232_v48 = vpop.permute.xlu0 %1966  ;;  %2514 = vrot.lane.b32.xlu1 %v10272_v39, %s10406_s8  ;;  %v4357_v39 = vrot.slane %v3603_v40, %v11226_v62  ;;  %v2593_v60 = vadd.f32 %v10999_v44, %v1689_v45 }
 0x25f   : > { %14620 = vst [vmem:[#allocation96_spill] sm:$0xff] %v11232_v48 }
 0x260   : > { %v11239_v53 = vpop.permute.xlu1 %1666  ;;  %4896 = vrot.lane.b32.xlu0 %v4421_v63, %s10401_s15  ;;  %v3580_v63 = vrot.slane %v3566_v37, %v11200_v21  ;;  %v2609_v45 = vmax.f32 %v2593_v60, 0.0  ;;  %v1687_v37 = vadd.f32 %v11120_v55, %v1368_v58  ;;  %v4365_v58 = vrot.slane %v3613_v43, %v11226_v62 }
 0x261   : > { %14621 = vst [vmem:[#allocation97_spill] sm:$0xff] %v11239_v53 }
 0x262   : > { %v11243_v48 = vpop.permute.xlu0 %1668  ;;  %2510 = vrot.lane.b32.xlu1 %v2456_v41, %s10406_s8  ;;  %v4429_v41 = vrot.slane %v3711_v23, %v11226_v62  ;;  %v4437_v23 = vrot.slane %v3708_v50, %v11226_v62  ;;  %v2591_v60 = vadd.f32 %v10999_v44, %v1687_v37  ;;  %v3596_v43 = vrot.slane %v3580_v63, %v11200_v21 }
 0x263   : > { %14622 = vst [vmem:[#allocation98_spill] sm:$0xff] %v11243_v48  ;;  %v3582_v48 = vcombine.high %v3580_v63, %v3580_v63 }
 0x264   : > { %v11250_v53 = vpop.permute.xlu1 %1730  ;;  %4864 = vrot.lane.b32.xlu0 %v4357_v39, %s10401_s15  ;;  %v4353_v39 = vrot.slane %v3589_v2, %v11226_v62 }
 0x265   : > { %14623 = vst [vmem:[#allocation99_spill] sm:$0xff] %v11250_v53  ;;  %v3709_v53 = vcombine.high %v3687_v4, %v3687_v4  ;;  %v3720_v4 = vrot.slane %v2609_v45, %v11200_v21  ;;  %v3610_v40 = vrot.slane %v3582_v48, %v11200_v21 }
 0x266   : > { %v11256_v1 = vpop.permute.xlu0 %1732  ;;  %4894 = vrot.lane.b32.xlu1 %v4417_v25, %s10401_s15 }
 0x267   : > { %14624 = vst [vmem:[#allocation100_spill] sm:$0xff] %v11256_v1  ;;  %v4425_v7 = vrot.slane %v3709_v53, %v11226_v62  ;;  %v4373_v37 = vrot.slane %v3610_v40, %v11226_v62 }
 0x268   : > { %v11262_v54 = vpop.permute.xlu1 %1662  ;;  %4900 = vrot.lane.b32.xlu0 %v4429_v41, %s10401_s15  ;;  %v3694_v41 = vrot.slane %v3678_v14, %v11200_v21  ;;  %v3728_v14 = vcombine.high %v3720_v4, %v3720_v4 }
 0x26a   : > { %v11267_v1 = vpop.permute.xlu0 %1664  ;;  %4862 = vrot.lane.b32.xlu1 %v4353_v39, %s10401_s15  ;;  %v4433_v53 = vrot.slane %v3694_v41, %v11226_v62 }
 0x26b   : > { %14625 = vst [vmem:[#allocation101_spill] sm:$0xff] %v11267_v1 }
 0x26c   : > { %v11271_v25 = vpop.permute.xlu1 %1726  ;;  %4904 = vrot.lane.b32.xlu0 %v4437_v23, %s10401_s15  ;;  %v3611_v23 = vcombine.high %v3589_v2, %v3589_v2 }
 0x26d   : > { %14626 = vst [vmem:[#allocation102_spill] sm:$0xff] %v11271_v25  ;;  %v2607_v25 = vmax.f32 %v2591_v60, 0.0 }
 0x26e   : > { %v11278_v55 = vpop.permute.xlu0 %1728  ;;  %4898 = vrot.lane.b32.xlu1 %v4425_v7, %s10401_s15  ;;  %v3712_v7 = vcombine.high %v3708_v50, %v3708_v50  ;;  %v4361_v48 = vrot.slane %v3611_v23, %v11226_v62  ;;  %v4369_v50 = vrot.slane %v3596_v43, %v11226_v62  ;;  %v3713_v23 = vcombine.high %v2609_v45, %v2609_v45 }
 0x26f   : > { %14627 = vst [vmem:[#allocation103_spill] sm:$0xff] %v11278_v55 }
 0x270   : > { %v11283_v39 = vpop.permute.xlu1 %1972  ;;  %4868 = vrot.lane.b32.xlu0 %v4365_v58, %s10401_s15  ;;  %v3622_v58 = vrot.slane %v2607_v25, %v11200_v21  ;;  %v4445_v60 = vrot.slane %v3712_v7, %v11226_v62  ;;  %v1007_v7 = vadd.f32 %v10814_v22, %v11012_v56  ;;  %v3727_v45 = vrot.slane %v3713_v23, %v11200_v21 }
 0x271   : > { %14628 = vst [vmem:[#allocation104_spill] sm:$0xff] %v11283_v39 }
 0x272   : > { %v11287_v1 = vpop.permute.xlu0 %2488  ;;  %4902 = vrot.lane.b32.xlu1 %v4433_v53, %s10401_s15  ;;  %v3750_v53 = vrot.slane %v3728_v14, %v11200_v21  ;;  %v3736_v14 = vrot.slane %v3720_v4, %v11200_v21  ;;  %v1373_v56 = vadd.f32 %v10902_v26, %v1007_v7  ;;  %v1005_v7 = vadd.f32 %v11018_v46, %v10818_v24 }
 0x273   : > { %14629 = vst [vmem:[#allocation105_spill] sm:$0xff] %v11287_v1  ;;  %v3729_v1 = vcombine.high %v3727_v45, %v3727_v45 }
 0x274   : > { %v11291_v55 = vpop.permute.xlu1 %1968  ;;  %4872 = vrot.lane.b32.xlu0 %v4373_v37, %s10401_s15  ;;  %v3710_v37 = vcombine.high %v3694_v41, %v3694_v41  ;;  %v4449_v4 = vrot.slane %v3736_v14, %v11226_v62  ;;  %v1692_v23 = vadd.f32 %v11141_v51, %v1373_v56 }
 0x275   : > { %14630 = vst [vmem:[#allocation106_spill] sm:$0xff] %v11291_v55  ;;  %v3630_v55 = vcombine.high %v3622_v58, %v3622_v58  ;;  %v3757_v46 = vrot.slane %v3729_v1, %v11200_v21 }
 0x276   : > { %v11297_v2 = vpop.permute.xlu0 %2484  ;;  %4866 = vrot.lane.b32.xlu1 %v4361_v48, %s10401_s15  ;;  %v3614_v48 = vcombine.high %v3610_v40, %v3610_v40  ;;  %v4441_v41 = vrot.slane %v3710_v37, %v11226_v62  ;;  %v3615_v37 = vcombine.high %v2607_v25, %v2607_v25 }
 0x277   : > { %14631 = vst [vmem:[#allocation107_spill] sm:$0xff] %v11297_v2  ;;  %v4453_v2 = vrot.slane %v3750_v53, %v11226_v62  ;;  %v3652_v40 = vrot.slane %v3630_v55, %v11200_v21  ;;  %v3760_v55 = vcombine.high %v3750_v53, %v3750_v53 }
 0x278   : > { %v11302_v39 = vpop.permute.xlu1 %2185  ;;  %4908 = vrot.lane.b32.xlu0 %v4445_v60, %s10401_s15  ;;  %v3629_v51 = vrot.slane %v3615_v37, %v11200_v21 }
 0x279   : > { %14632 = vst [vmem:[#allocation108_spill] sm:$0xff] %v11302_v39  ;;  %v4461_v53 = vrot.slane %v3760_v55, %v11226_v62  ;;  %v4469_v55 = vrot.slane %v3757_v46, %v11226_v62  ;;  %v3662_v1 = vcombine.high %v3652_v40, %v3652_v40 }
 0x27a   : > { %v11306_v63 = vpop.permute.xlu0 %2187  ;;  %4870 = vrot.lane.b32.xlu1 %v4369_v50, %s10401_s15  ;;  %v4381_v50 = vrot.slane %v3614_v48, %v11226_v62  ;;  %v4389_v48 = vrot.slane %v3652_v40, %v11226_v62  ;;  %v3631_v37 = vcombine.high %v3629_v51, %v3629_v51 }
 0x27b   : > { %14633 = vst [vmem:[#allocation109_spill] sm:$0xff] %v11306_v63 }
 0x27c   : > { %v11313_v39 = vpop.permute.xlu1 %2249  ;;  %4912 = vrot.lane.b32.xlu0 %v4453_v2, %s10401_s15  ;;  %v3612_v2 = vcombine.high %v3596_v43, %v3596_v43  ;;  %v2596_v43 = vadd.f32 %v10999_v44, %v1692_v23  ;;  %v3659_v40 = vrot.slane %v3631_v37, %v11200_v21 }
 0x27e   : > { %v11318_v60 = vpop.permute.xlu0 %2251  ;;  %4906 = vrot.lane.b32.xlu1 %v4441_v41, %s10401_s15  ;;  %v3638_v41 = vrot.slane %v3622_v58, %v11200_v21  ;;  %v4377_v25 = vrot.slane %v3612_v2, %v11226_v62  ;;  %v1371_v58 = vadd.f32 %v10908_v47, %v1005_v7 }
 0x27f   : > { %14634 = vst [vmem:[#allocation110_spill] sm:$0xff] %v11318_v60 }
 0x280   : > { %v11324_v63 = vpop.permute.xlu1 %2181  ;;  %4876 = vrot.lane.b32.xlu0 %v4381_v50, %s10401_s15  ;;  %v4385_v2 = vrot.slane %v3638_v41, %v11226_v62  ;;  %v1690_v23 = vadd.f32 %v11153_v57, %v1371_v58  ;;  %v4397_v58 = vrot.slane %v3662_v1, %v11226_v62  ;;  %v3645_v1 = vrot.slane %v3629_v51, %v11200_v21 }
 0x281   : > { %14635 = vst [vmem:[#allocation111_spill] sm:$0xff] %v11324_v63 }
 0x282   : > { %v11329_v60 = vpop.permute.xlu0 %2183  ;;  %4910 = vrot.lane.b32.xlu1 %v4449_v4, %s10401_s15 }
 0x283   : > { %14636 = vst [vmem:[#allocation112_spill] sm:$0xff] %v11329_v60  ;;  %v2612_v60 = vmax.f32 %v2596_v43, 0.0  ;;  %v2594_v43 = vadd.f32 %v10999_v44, %v1690_v23  ;;  %v4405_v23 = vrot.slane %v3659_v40, %v11226_v62 }
 0x284   : > { %v11336_v50 = vpop.permute.xlu1 %2245  ;;  %4880 = vrot.lane.b32.xlu0 %v4389_v48, %s10401_s15  ;;  %v3758_v48 = vcombine.high %v3736_v14, %v3736_v14 }
 0x285   : > { %v3867_v14 = vrot.slane %v2612_v60, %v11200_v21 }
 0x286   : > { %v11342_v56 = vpop.permute.xlu0 %2247  ;;  %4874 = vrot.lane.b32.xlu1 %v4377_v25, %s10401_s15  ;;  %v4457_v7 = vrot.slane %v3758_v48, %v11226_v62 }
 0x288   : > { %v11348_v4 = vpop.permute.xlu1 %2490  ;;  %4916 = vrot.lane.b32.xlu0 %v4461_v53, %s10401_s15  ;;  %v3743_v53 = vrot.slane %v3727_v45, %v11200_v21  ;;  %v3875_v45 = vcombine.high %v3867_v14, %v3867_v14 }
 0x289   : > { %14637 = vst [vmem:[#allocation113_spill] sm:$0xff] %v11348_v4 }
 0x28a   : > { %v11353_v63 = vpop.permute.xlu0 %2496  ;;  %4878 = vrot.lane.b32.xlu1 %v4385_v2, %s10401_s15  ;;  %v4465_v48 = vrot.slane %v3743_v53, %v11226_v62 }
 0x28b   : > { %14638 = vst [vmem:[#allocation114_spill] sm:$0xff] %v11353_v63  ;;  %v2610_v63 = vmax.f32 %v2594_v43, 0.0 }
 0x28c   : > { %v11357_v25 = vpop.permute.xlu1 %2486  ;;  %4920 = vrot.lane.b32.xlu0 %v4469_v55, %s10401_s15  ;;  %v3660_v55 = vcombine.high %v3638_v41, %v3638_v41 }
 0x28e   : > { %v11364_v57 = vpop.permute.xlu0 %2492  ;;  %4914 = vrot.lane.b32.xlu1 %v4457_v7, %s10401_s15  ;;  %v3761_v7 = vcombine.high %v3757_v46, %v3757_v46  ;;  %v4393_v37 = vrot.slane %v3660_v55, %v11226_v62  ;;  %v4401_v46 = vrot.slane %v3645_v1, %v11226_v62  ;;  %v3860_v55 = vcombine.high %v2612_v60, %v2612_v60 }
 0x28f   : > { %14639 = vst [vmem:[#allocation115_spill] sm:$0xff] %v11364_v57 }
 0x290   : > { %v11369_v2 = vpop.permute.xlu1 %2193  ;;  %4884 = vrot.lane.b32.xlu0 %v4397_v58, %s10401_s15  ;;  %v3769_v58 = vrot.slane %v2610_v63, %v11200_v21  ;;  %v4477_v43 = vrot.slane %v3761_v7, %v11226_v62  ;;  %v1008_v7 = vadd.f32 %v10822_v27, %v11021_v36  ;;  %v3874_v60 = vrot.slane %v3860_v55, %v11200_v21 }
 0x291   : > { %14640 = vst [vmem:[#allocation116_spill] sm:$0xff] %v11369_v2 }
 0x292   : > { %v11373_v4 = vpop.permute.xlu0 %2195  ;;  %4918 = vrot.lane.b32.xlu1 %v4465_v48, %s10401_s15  ;;  %v3897_v48 = vrot.slane %v3875_v45, %v11200_v21  ;;  %v3777_v2 = vcombine.high %v3769_v58, %v3769_v58  ;;  %v3883_v45 = vrot.slane %v3867_v14, %v11200_v21  ;;  %v1374_v36 = vadd.f32 %v10914_v15, %v1008_v7 }
 0x293   : > { %14641 = vst [vmem:[#allocation117_spill] sm:$0xff] %v11373_v4  ;;  %v3876_v55 = vcombine.high %v3874_v60, %v3874_v60  ;;  %v1006_v7 = vadd.f32 %v11027_v59, %v10826_v29 }
 0x294   : > { %v11377_v57 = vpop.permute.xlu1 %2257  ;;  %4888 = vrot.lane.b32.xlu0 %v4405_v23, %s10401_s15  ;;  %v3759_v23 = vcombine.high %v3743_v53, %v3743_v53  ;;  %v4545_v14 = vrot.slane %v3883_v45, %v11226_v62 }
 0x295   : > { %14642 = vst [vmem:[#allocation118_spill] sm:$0xff] %v11377_v57  ;;  %v3762_v57 = vcombine.high %v2610_v63, %v2610_v63  ;;  %v3904_v59 = vrot.slane %v3876_v55, %v11200_v21 }
 0x296   : > { %v11383_v41 = vpop.permute.xlu0 %2259  ;;  %4882 = vrot.lane.b32.xlu1 %v4393_v37, %s10401_s15  ;;  %v3663_v37 = vcombine.high %v3659_v40, %v3659_v40  ;;  %v4473_v53 = vrot.slane %v3759_v23, %v11226_v62  ;;  %v3799_v40 = vrot.slane %v3777_v2, %v11200_v21  ;;  %v1693_v23 = vadd.f32 %v11144_v32, %v1374_v36 }
 0x297   : > { %14643 = vst [vmem:[#allocation119_spill] sm:$0xff] %v11383_v41  ;;  %v4549_v41 = vrot.slane %v3897_v48, %v11226_v62  ;;  %v3907_v2 = vcombine.high %v3897_v48, %v3897_v48 }
 0x298   : > { %v11388_v4 = vpop.permute.xlu1 %2189  ;;  %4924 = vrot.lane.b32.xlu0 %v4477_v43, %s10401_s15  ;;  %v2597_v63 = vadd.f32 %v10999_v44, %v1693_v23  ;;  %v3809_v55 = vcombine.high %v3799_v40, %v3799_v40 }
 0x299   : > { %14644 = vst [vmem:[#allocation120_spill] sm:$0xff] %v11388_v4  ;;  %v4557_v48 = vrot.slane %v3907_v2, %v11226_v62  ;;  %v4565_v2 = vrot.slane %v3904_v59, %v11226_v62 }
 0x29a   : > { %v11392_v51 = vpop.permute.xlu0 %2191  ;;  %4886 = vrot.lane.b32.xlu1 %v4401_v46, %s10401_s15  ;;  %v4413_v46 = vrot.slane %v3663_v37, %v11226_v62  ;;  %v4485_v37 = vrot.slane %v3799_v40, %v11226_v62  ;;  %v2613_v23 = vmax.f32 %v2597_v63, 0.0 }
 0x29b   : > { %14645 = vst [vmem:[#allocation121_spill] sm:$0xff] %v11392_v51 }
 0x29c   : > { %v11399_v4 = vpop.permute.xlu1 %2253  ;;  %4960 = vrot.lane.b32.xlu0 %v4549_v41, %s10401_s15  ;;  %v3661_v41 = vcombine.high %v3645_v1, %v3645_v1  ;;  %v3776_v1 = vrot.slane %v3762_v57, %v11200_v21 }
 0x29d   : > { %14646 = vst [vmem:[#allocation122_spill] sm:$0xff] %v11399_v4 }
 0x29e   : > { %v11404_v43 = vpop.permute.xlu0 %2255  ;;  %4922 = vrot.lane.b32.xlu1 %v4473_v53, %s10401_s15  ;;  %v3785_v53 = vrot.slane %v3769_v58, %v11200_v21  ;;  %v4409_v32 = vrot.slane %v3661_v41, %v11226_v62  ;;  %v1372_v58 = vadd.f32 %v10920_v34, %v1006_v7 }
 0x29f   : > { %14647 = vst [vmem:[#allocation123_spill] sm:$0xff] %v11404_v43 }
 0x2a0   : > { %v11410_v51 = vpop.permute.xlu1 %2498  ;;  %4892 = vrot.lane.b32.xlu0 %v4413_v46, %s10401_s15  ;;  %v4481_v41 = vrot.slane %v3785_v53, %v11226_v62  ;;  %v1691_v57 = vadd.f32 %v11156_v28, %v1372_v58  ;;  %v4493_v58 = vrot.slane %v3809_v55, %v11226_v62  ;;  %v3792_v55 = vrot.slane %v3776_v1, %v11200_v21 }
 0x2a1   : > { %14648 = vst [vmem:[#allocation124_spill] sm:$0xff] %v11410_v51 }
 0x2a2   : > { %v11415_v43 = vpop.permute.xlu0 %2504  ;;  %4958 = vrot.lane.b32.xlu1 %v4545_v14, %s10401_s15  ;;  %v2595_v63 = vadd.f32 %v10999_v44, %v1691_v57 }
 0x2a3   : > { %14649 = vst [vmem:[#allocation125_spill] sm:$0xff] %v11415_v43  ;;  %v3778_v43 = vcombine.high %v3776_v1, %v3776_v1 }
 0x2a4   : > { %v11422_v46 = vpop.permute.xlu1 %2494  ;;  %4928 = vrot.lane.b32.xlu0 %v4485_v37, %s10401_s15  ;;  %v3905_v37 = vcombine.high %v3883_v45, %v3883_v45  ;;  %v3916_v45 = vrot.slane %v2613_v23, %v11200_v21 }
 0x2a5   : > { %14650 = vst [vmem:[#allocation126_spill] sm:$0xff] %v11422_v46  ;;  %v3806_v40 = vrot.slane %v3778_v43, %v11200_v21 }
 0x2a6   : > { %v11428_v36 = vpop.permute.xlu0 %2500  ;;  %4890 = vrot.lane.b32.xlu1 %v4409_v32, %s10401_s15  ;;  %v4553_v7 = vrot.slane %v3905_v37, %v11226_v62 }
 0x2a7   : > { %14651 = vst [vmem:[#allocation127_spill] sm:$0xff] %v11428_v36  ;;  %v4501_v57 = vrot.slane %v3806_v40, %v11226_v62 }
 0x2a8   : > { %v11434_v14 = vpop.permute.xlu1 %2201  ;;  %4964 = vrot.lane.b32.xlu0 %v4557_v48, %s10401_s15  ;;  %v3890_v48 = vrot.slane %v3874_v60, %v11200_v21  ;;  %v3924_v60 = vcombine.high %v3916_v45, %v3916_v45 }
 0x2a9   : > { %14652 = vst [vmem:[#allocation128_spill] sm:$0xff] %v11434_v14 }
 0x2aa   : > { %v11439_v36 = vpop.permute.xlu0 %2203  ;;  %4926 = vrot.lane.b32.xlu1 %v4481_v41, %s10401_s15  ;;  %v4561_v37 = vrot.slane %v3890_v48, %v11226_v62 }
 0x2ab   : > { %14653 = vst [vmem:[#allocation129_spill] sm:$0xff] %v11439_v36  ;;  %v2611_v36 = vmax.f32 %v2595_v63, 0.0 }
 0x2ac   : > { %v11443_v32 = vpop.permute.xlu1 %2265  ;;  %4968 = vrot.lane.b32.xlu0 %v4565_v2, %s10401_s15  ;;  %v3807_v2 = vcombine.high %v3785_v53, %v3785_v53 }
 0x2ad   : > { %14654 = vst [vmem:[#allocation130_spill] sm:$0xff] %v11443_v32 }
 0x2ae   : > { %v11450_v28 = vpop.permute.xlu0 %2267  ;;  %4962 = vrot.lane.b32.xlu1 %v4553_v7, %s10401_s15  ;;  %v3908_v7 = vcombine.high %v3904_v59, %v3904_v59  ;;  %v4489_v43 = vrot.slane %v3807_v2, %v11226_v62  ;;  %v4497_v59 = vrot.slane %v3792_v55, %v11226_v62  ;;  %v3909_v2 = vcombine.high %v2613_v23, %v2613_v23 }
 0x2af   : > { %14655 = vst [vmem:[#allocation131_spill] sm:$0xff] %v11450_v28 }
 0x2b0   : > { %v11455_v41 = vpop.permute.xlu1 %2197  ;;  %4932 = vrot.lane.b32.xlu0 %v4493_v58, %s10401_s15  ;;  %v3818_v58 = vrot.slane %v2611_v36, %v11200_v21  ;;  %v4573_v63 = vrot.slane %v3908_v7, %v11226_v62  ;;  %v1011_v7 = vadd.f32 %v10800_v16, %v11024_v49  ;;  %v3923_v23 = vrot.slane %v3909_v2, %v11200_v21 }
 0x2b1   : > { %14656 = vst [vmem:[#allocation132_spill] sm:$0xff] %v11455_v41  ;;  %v3811_v2 = vcombine.high %v2611_v36, %v2611_v36 }
 0x2b2   : > { %v11459_v14 = vpop.permute.xlu0 %2199  ;;  %4966 = vrot.lane.b32.xlu1 %v4561_v37, %s10401_s15  ;;  %v3946_v37 = vrot.slane %v3924_v60, %v11200_v21  ;;  %v3826_v41 = vcombine.high %v3818_v58, %v3818_v58  ;;  %v3932_v60 = vrot.slane %v3916_v45, %v11200_v21  ;;  %v1377_v49 = vadd.f32 %v10926_v38, %v1011_v7 }
 0x2b3   : > { %14657 = vst [vmem:[#allocation133_spill] sm:$0xff] %v11459_v14  ;;  %v3808_v45 = vcombine.high %v3792_v55, %v3792_v55  ;;  %v3834_v55 = vrot.slane %v3818_v58, %v11200_v21  ;;  %v716_v58 = vadd.f32 %v10833_v33, %v10802_v17 }
 0x2b4   : > { %v11463_v28 = vpop.permute.xlu1 %2261  ;;  %4936 = vrot.lane.b32.xlu0 %v4501_v57, %s10401_s15  ;;  %v3906_v57 = vcombine.high %v3890_v48, %v3890_v48  ;;  %v4581_v32 = vrot.slane %v3946_v37, %v11226_v62  ;;  %v3956_v7 = vcombine.high %v3946_v37, %v3946_v37 }
 0x2b5   : > { %14658 = vst [vmem:[#allocation134_spill] sm:$0xff] %v11463_v28 }
 0x2b6   : > { %v11469_v53 = vpop.permute.xlu0 %2263  ;;  %4930 = vrot.lane.b32.xlu1 %v4489_v43, %s10401_s15  ;;  %v3810_v43 = vcombine.high %v3806_v40, %v3806_v40  ;;  %v4569_v48 = vrot.slane %v3906_v57, %v11226_v62  ;;  %v3848_v40 = vrot.slane %v3826_v41, %v11200_v21  ;;  %v724_v57 = vadd.f32 %v10830_v31, %v10798_v52 }
 0x2b7   : > { %14659 = vst [vmem:[#allocation135_spill] sm:$0xff] %v11469_v53  ;;  %v4505_v52 = vrot.slane %v3808_v45, %v11226_v62  ;;  %v3825_v31 = vrot.slane %v3811_v2, %v11200_v21  ;;  %v4589_v37 = vrot.slane %v3956_v7, %v11226_v62  ;;  %v3954_v2 = vcombine.high %v3932_v60, %v3932_v60 }
 0x2b8   : > { %v11474_v14 = vpop.permute.xlu1 %2506  ;;  %4972 = vrot.lane.b32.xlu0 %v4573_v63, %s10401_s15  ;;  %v4517_v41 = vrot.slane %v3848_v40, %v11226_v62 }
 0x2b9   : > { %14660 = vst [vmem:[#allocation136_spill] sm:$0xff] %v11474_v14 }
 0x2ba   : > { %v11478_v1 = vpop.permute.xlu0 %2512  ;;  %4934 = vrot.lane.b32.xlu1 %v4497_v59, %s10401_s15  ;;  %v4509_v59 = vrot.slane %v3810_v43, %v11226_v62 }
 0x2bb   : > { %14661 = vst [vmem:[#allocation137_spill] sm:$0xff] %v11478_v1 }
 0x2bc   : > { %v11485_v14 = vpop.permute.xlu1 %2502  ;;  %4976 = vrot.lane.b32.xlu0 %v4581_v32, %s10401_s15  ;;  %v4577_v32 = vrot.slane %v3932_v60, %v11226_v62 }
 0x2bd   : > { %14662 = vst [vmem:[#allocation138_spill] sm:$0xff] %v11485_v14 }
 0x2be   : > { %v11490_v63 = vpop.permute.xlu0 %2508  ;;  %4970 = vrot.lane.b32.xlu1 %v4569_v48, %s10401_s15  ;;  %v1696_v48 = vadd.f32 %v11184_v12, %v1377_v49 }
 0x2bf   : > { %14663 = vst [vmem:[#allocation139_spill] sm:$0xff] %v11490_v63  ;;  %v3925_v63 = vcombine.high %v3923_v23, %v3923_v23 }
 0x2c0   : > { %v11496_v1 = vpop.permute.xlu1 %2209  ;;  %4940 = vrot.lane.b32.xlu0 %v4509_v59, %s10401_s15  ;;  %v1009_v59 = vadd.f32 %v11030_v30, %v10804_v0  ;;  %v2600_v12 = vadd.f32 %v10999_v44, %v1696_v48  ;;  %v1176_v48 = vadd.f32 %v10883_v8, %v716_v58 }
 0x2c1   : > { %14664 = vst [vmem:[#allocation140_spill] sm:$0xff] %v11496_v1  ;;  %v1178_v1 = vadd.f32 %v10877_v5, %v724_v57  ;;  %v3953_v30 = vrot.slane %v3925_v63, %v11200_v21  ;;  %v4513_v57 = vrot.slane %v3834_v55, %v11226_v62 }
 0x2c2   : > { %4974 = vrot.lane.b32.xlu1 %v4577_v32, %s10401_s15  ;;  %v11504_v43 = vpop.permute.xlu0 %2211  ;;  %v1375_v32 = vadd.f32 %v10932_v42, %v1009_v59  ;;  %v11531_v7 = vmax.f32 %v2600_v12, 0.0  ;;  %v11541_v59 = vld [vmem:[%s14456_s4] ss:$0 sm:$0xff]  ;;  %v3939_v12 = vrot.slane %v3923_v23, %v11200_v21 }
 0x2c3   : > { %14665 = vst [vmem:[#allocation141_spill] sm:$0xff] %v11504_v43  ;;  %v1353_v49 = vadd.f32 %v10879_v6, %v1178_v1  ;;  %v4597_v33 = vrot.slane %v3953_v30, %v11226_v62  ;;  %v3858_v1 = vcombine.high %v3848_v40, %v3848_v40 }
 0x2c4   : > { %v11511_v14 = vpop.permute.xlu1 %2273  ;;  %4944 = vrot.lane.b32.xlu0 %v4517_v41, %s10401_s15  ;;  %v3827_v41 = vcombine.high %v3825_v31, %v3825_v31  ;;  %v1694_v63 = vadd.f32 %v11202_v61, %v1375_v32  ;;  %v4585_v61 = vrot.slane %v3954_v2, %v11226_v62  ;;  %v4063_v40 = vrot.slane %v11531_v7, %v11200_v21 }
 0x2c5   : > { %14666 = vst [vmem:[#allocation142_spill] sm:$0xff] %v11511_v14  ;;  %v2557_v60 = vadd.f32 %v11541_v59, %v1353_v49  ;;  %v4525_v49 = vrot.slane %v3858_v1, %v11226_v62  ;;  %v4593_v23 = vrot.slane %v3939_v12, %v11226_v62  ;;  %v3856_v2 = vcombine.high %v3834_v55, %v3834_v55 }
 0x2c6   : > { %4938 = vrot.lane.b32.xlu1 %v4505_v52, %s10401_s15  ;;  %v11518_v36 = vpop.permute.xlu0 %2275  ;;  %v2598_v58 = vadd.f32 %v10999_v44, %v1694_v63  ;;  %v11573_v55 = vrot.slane %v3825_v31, %v11200_v21 }
 0x2c7   : > { %14667 = vst [vmem:[#allocation143_spill] sm:$0xff] %v11518_v36  ;;  %v1012_v36 = vadd.f32 %v10808_v19, %v11033_v3 }
 0x2c8   : > { %v11526_v45 = vpop.permute.xlu1 %2205  ;;  %4980 = vrot.lane.b32.xlu0 %v4589_v37, %s10401_s15  ;;  %v1351_v37 = vadd.f32 %v10885_v9, %v1176_v48  ;;  %v11563_v63 = vmax.f32 %v2598_v58, 0.0 }
 0x2c9   : > { %14668 = vst [vmem:[#allocation144_spill] sm:$0xff] %v11526_v45  ;;  %v3957_v45 = vcombine.high %v3953_v30, %v3953_v30 }
 0x2ca   : > { %4942 = vrot.lane.b32.xlu1 %v4513_v57, %s10401_s15  ;;  %v11535_v17 = vpop.permute.xlu0 %2207  ;;  %v3855_v57 = vrot.slane %v3827_v41, %v11200_v21  ;;  %v2555_v48 = vadd.f32 %v11541_v59, %v1351_v37  ;;  %v3965_v58 = vrot.slane %v11563_v63, %v11200_v21 }
 0x2cb   : > { %14669 = vst [vmem:[#allocation145_spill] sm:$0xff] %v11535_v17  ;;  %v4071_v17 = vcombine.high %v4063_v40, %v4063_v40  ;;  %v4605_v30 = vrot.slane %v3957_v45, %v11226_v62 }
 0x2cc   : > { %v11544_v52 = vpop.permute.xlu1 %2269  ;;  %4984 = vrot.lane.b32.xlu0 %v4597_v33, %s10401_s15  ;;  %v2573_v33 = vmax.f32 %v2557_v60, 0.0  ;;  %v4533_v1 = vrot.slane %v3855_v57, %v11226_v62  ;;  %v11575_v37 = vmax.f32 %v2555_v48, 0.0  ;;  %v4529_v48 = vrot.slane %v11573_v55, %v11226_v62 }
 0x2cd   : > { %14670 = vst [vmem:[#allocation146_spill] sm:$0xff] %v11544_v52  ;;  %v3973_v45 = vcombine.high %v3965_v58, %v3965_v58 }
 0x2ce   : > { %4978 = vrot.lane.b32.xlu1 %v4585_v61, %s10401_s15  ;;  %v11554_v32 = vpop.permute.xlu0 %2271  ;;  %v2743_v41 = vrot.slane %v2573_v33, %v11200_v21  ;;  %v2736_v14 = vcombine.high %v2573_v33, %v2573_v33 }
 0x2cf   : > { %14671 = vst [vmem:[#allocation147_spill] sm:$0xff] %v11554_v32  ;;  %v4056_v32 = vcombine.high %v11531_v7, %v11531_v7  ;;  %v11604_v7 = vrot.slane %v4063_v40, %v11200_v21 }
 0x2d0   : > { %v11558_v43 = vpop.permute.xlu1 %2514  ;;  %4948 = vrot.lane.b32.xlu0 %v4525_v49, %s10401_s15  ;;  %v4521_v49 = vrot.slane %v3856_v2, %v11226_v62  ;;  %v727_v2 = vadd.f32 %v10836_v35, %v10806_v18 }
 0x2d1   : > { %14672 = vst [vmem:[#allocation148_spill] sm:$0xff] %v11558_v43  ;;  %v3955_v43 = vcombine.high %v3939_v12, %v3939_v12  ;;  %v11611_v8 = vrot.slane %v4056_v32, %v11200_v21 }
 0x2d2   : > { %4982 = vrot.lane.b32.xlu1 %v4593_v23, %s10401_s15  ;;  %v4897_v61 = vpop.permute.xlu0 %4896 }
 0x2d4   : > { %v11568_v60 = vpop.permute.xlu1 %2510  ;;  %4952 = vrot.lane.b32.xlu0 %v4533_v1, %s10401_s15  ;;  %v2751_v1 = vcombine.high %v2743_v41, %v2743_v41 }
 0x2d5   : > { %14673 = vst [vmem:[#allocation149_spill] sm:$0xff] %v11568_v60  ;;  %v11584_v60 = vrot.slane %v4071_v17, %v11200_v21  ;;  %v2645_v17 = vrot.slane %v11575_v37, %v11200_v21 }
 0x2d6   : > { %4946 = vrot.lane.b32.xlu1 %v4521_v49, %s10401_s15  ;;  %v11580_v23 = vpop.permute.xlu0 %4864  ;;  %v1179_v49 = vadd.f32 %v10888_v10, %v727_v2  ;;  %v2773_v12 = vrot.slane %v2751_v1, %v11200_v21  ;;  %v2759_v2 = vrot.slane %v2743_v41, %v11200_v21  ;;  %v14674_v10 = vld [vmem:[#allocation9_spill] sm:$0xff] }
 0x2d7   : > { %v4677_v35 = vrot.slane %v11584_v60, %v11226_v62  ;;  %v2653_v33 = vcombine.high %v2645_v17, %v2645_v17 }
 0x2d8   : > { %v4895_v31 = vpop.permute.xlu1 %4894  ;;  %4988 = vrot.lane.b32.xlu0 %v4605_v30, %s10401_s15  ;;  %v3859_v30 = vcombine.high %v3855_v57, %v3855_v57  ;;  %v719_v57 = vadd.f32 %v14674_v10, %v10810_v20  ;;  %v1354_v41 = vadd.f32 %v10890_v11, %v1179_v49  ;;  %v5264_v10 = vsel %vm5246_vm3, %v2773_v12, %v4897_v61 }
 0x2d9   : > { %v5263_v3 = vsel %vm5246_vm3, %v2759_v2, %v4895_v31  ;;  %v2783_v32 = vcombine.high %v2773_v12, %v2773_v12  ;;  %v2781_v5 = vcombine.high %v2759_v2, %v2759_v2  ;;  %v2750_v49 = vrot.slane %v2736_v14, %v11200_v21 }
 0x2da   : > { %4950 = vrot.lane.b32.xlu1 %v4529_v48, %s10401_s15  ;;  %v4901_v18 = vpop.permute.xlu0 %4900  ;;  %v4601_v48 = vrot.slane %v3955_v43, %v11226_v62  ;;  %v4541_v1 = vrot.slane %v3859_v30, %v11226_v62  ;;  %v11620_v43 = vrot.slane %v3973_v45, %v11200_v21  ;;  %v5571_v31 = vcombine.low %v5263_v3, %v5264_v10  ;;  %v14677_v10 = vld [vmem:[#allocation25_spill] sm:$0xff] }
 0x2db   : > { %v3857_v30 = vcombine.high %v11573_v55, %v11573_v55  ;;  %v4072_v45 = vcombine.high %v11611_v8, %v11611_v8  ;;  %v5266_v61 = vsel %vm5246_vm3, %v2783_v32, %v4901_v18  ;;  %v3958_v14 = vcombine.high %v11563_v63, %v11563_v63  ;;  %v14679_v18 = vld [vmem:[#allocation49_spill] sm:$0xff] }
 0x2dc   : > { %v4863_v52 = vpop.permute.xlu1 %4862  ;;  %5024 = vrot.lane.b32.xlu0 %v4677_v35, %s10401_s15  ;;  %v14675_v35 = vld [vmem:[#allocation35_spill] sm:$0xff]  ;;  %v4613_v55 = vrot.slane %v11620_v43, %v11226_v62  ;;  %v11649_v63 = vrot.slane %v3965_v58, %v11200_v21 }
 0x2dd   : > { %v1378_v20 = vadd.f32 %v14675_v35, %v1012_v36  ;;  %v14676_v36 = vld [vmem:[#allocation87_spill] sm:$0xff] }
 0x2de   : > { %4986 = vrot.lane.b32.xlu1 %v4601_v48, %s10401_s15  ;;  %v11616_v40 = vpop.permute.xlu0 %4904  ;;  %v4673_v48 = vrot.slane %v11604_v7, %v11226_v62 }
 0x2df   : > { %v1697_v28 = vadd.f32 %v14676_v36, %v1378_v20  ;;  %v1177_v20 = vadd.f32 %v14677_v10, %v719_v57  ;;  %v14678_v36 = vld [vmem:[#allocation4_spill] sm:$0xff] }
 0x2e0   : > { %v4899_v53 = vpop.permute.xlu1 %4898  ;;  %4956 = vrot.lane.b32.xlu0 %v4541_v1, %s10401_s15  ;;  %v4103_v1 = vcombine.high %v11584_v60, %v11584_v60  ;;  %v1010_v32 = vadd.f32 %v14679_v18, %v14678_v36  ;;  %v4537_v60 = vrot.slane %v3857_v30, %v11226_v62  ;;  %v11672_v18 = vrot.slane %v4072_v45, %v11200_v21 }
 0x2e1   : > { %v5265_v12 = vsel %vm5246_vm3, %v2781_v5, %v4899_v53  ;;  %v2675_v5 = vrot.slane %v2653_v33, %v11200_v21  ;;  %v2661_v53 = vrot.slane %v2645_v17, %v11200_v21  ;;  %v2638_v17 = vcombine.high %v11575_v37, %v11575_v37  ;;  %v14681_v37 = vld [vmem:[#allocation37_spill] sm:$0xff] }
 0x2e2   : > { %v5572_v2 = vcombine.low %v5265_v12, %v5266_v61  ;;  %5022 = vrot.lane.b32.xlu1 %v4673_v48, %s10401_s15  ;;  %v4869_v3 = vpop.permute.xlu0 %4868  ;;  %v14680_v48 = vld [vmem:[#allocation3_spill] sm:$0xff]  ;;  %v2601_v58 = vadd.f32 %v10999_v44, %v1697_v28  ;;  %v2752_v33 = vcombine.high %v2750_v49, %v2750_v49  ;;  %v1376_v10 = vadd.f32 %v14681_v37, %v1010_v32 }
 0x2e3   : > { %v5579_v61 = vrot.slane %v5571_v31, %v14680_v48  ;;  %v5247_v57 = vsel %vm5246_vm3, %v2661_v53, %v4863_v52  ;;  %v11665_v31 = vrot.slane %v3958_v14, %v11200_v21  ;;  %v5248_v28 = vsel %vm5246_vm3, %v2675_v5, %v11580_v23 }
 0x2e4   : > { %v5586_v12 = vrot.slane %v5572_v2, %v14680_v48  ;;  %v4903_v51 = vpop.permute.xlu1 %4902  ;;  %4992 = vrot.lane.b32.xlu0 %v4613_v55, %s10401_s15  ;;  %v4685_v55 = vrot.slane %v4103_v1, %v11226_v62  ;;  %v2685_v52 = vcombine.high %v2675_v5, %v2675_v5  ;;  %v2683_v46 = vcombine.high %v2661_v53, %v2661_v53 }
 0x2e5   : > { %v2558_v14 = vadd.f32 %v11541_v59, %v1354_v41  ;;  %v5503_v4 = vcombine.low %v5247_v57, %v5248_v28  ;;  %v4609_v1 = vrot.slane %v11649_v63, %v11226_v62  ;;  %v4101_v45 = vcombine.high %v11604_v7, %v11604_v7 }
 0x2e6   : > { %v5587_v2 = vcombine.low %v5579_v61, %v5586_v12  ;;  %4954 = vrot.lane.b32.xlu1 %v4537_v60, %s10401_s15  ;;  %v11668_v30 = vpop.permute.xlu0 %4872  ;;  %v11685_v32 = vmax.f32 %v2601_v58, 0.0  ;;  %v14682_v12 = vld [vmem:[#allocation90_spill] sm:$0xff]  ;;  %v5250_v5 = vsel %vm5246_vm3, %v2685_v52, %v4869_v3  ;;  %v3974_v53 = vcombine.high %v11665_v31, %v11665_v31 }
 0x2e7   : > { %v1695_v23 = vadd.f32 %v14682_v12, %v1376_v10  ;;  %v4005_v7 = vcombine.high %v11620_v43, %v11620_v43  ;;  %v2780_v58 = vrot.slane %v2752_v33, %v11200_v21  ;;  %v2766_v10 = vrot.slane %v2750_v49, %v11200_v21 }
 0x2e8   : > { %6083 = vst.msk [vmem:[%s11658_s16 + $0x40] sm:$0xff] %vm423_vm1, %v5587_v2  ;;  %v4867_v61 = vpop.permute.xlu1 %4866  ;;  %5028 = vrot.lane.b32.xlu0 %v4685_v55, %s10401_s15  ;;  %v4693_v2 = vrot.slane %v11672_v18, %v11226_v62  ;;  %v2652_v3 = vrot.slane %v2638_v17, %v11200_v21  ;;  %v4681_v52 = vrot.slane %v4101_v45, %v11226_v62  ;;  %v11708_v43 = vmax.f32 %v2558_v14, 0.0 }
 0x2e9   : > { %v5249_v41 = vsel %vm5246_vm3, %v2683_v46, %v4867_v61  ;;  %v5511_v46 = vrot.slane %v5503_v4, %v14680_v48  ;;  %v11706_v61 = vrot.slane %v11611_v8, %v11200_v21  ;;  %v1352_v49 = vadd.f32 %v10896_v13, %v1177_v20 }
 0x2ea   : > { %v5504_v60 = vcombine.low %v5249_v41, %v5250_v5  ;;  %4990 = vrot.lane.b32.xlu1 %v4609_v1, %s10401_s15  ;;  %v4909_v57 = vpop.permute.xlu0 %4908  ;;  %v11713_v17 = vrot.slane %v11685_v32, %v11200_v21  ;;  %v5267_v4 = vsel %vm5246_vm3, %v2766_v10, %v4903_v51  ;;  %v2599_v33 = vadd.f32 %v10999_v44, %v1695_v23 }
 0x2eb   : > { %v4621_v8 = vrot.slane %v4005_v7, %v11226_v62  ;;  %v11722_v14 = vrot.slane %v3974_v53, %v11200_v21  ;;  %v5268_v20 = vsel %vm5246_vm3, %v2780_v58, %v11616_v40  ;;  %v2654_v12 = vcombine.high %v2652_v3, %v2652_v3 }
 0x2ec   : > { %v5518_v55 = vrot.slane %v5504_v60, %v14680_v48  ;;  %v4871_v28 = vpop.permute.xlu1 %4870  ;;  %5032 = vrot.lane.b32.xlu0 %v4693_v2, %s10401_s15  ;;  %v2784_v5 = vcombine.high %v2780_v58, %v2780_v58  ;;  %v2782_v41 = vcombine.high %v2766_v10, %v2766_v10  ;;  %v5588_v60 = vcombine.low %v5267_v4, %v5268_v20 }
 0x2ed   : > { %v4689_v23 = vrot.slane %v11706_v61, %v11226_v62  ;;  %v4003_v2 = vcombine.high %v11649_v63, %v11649_v63  ;;  %v2556_v53 = vadd.f32 %v11541_v59, %v1352_v49  ;;  %v4120_v40 = vcombine.high %v11713_v17, %v11713_v17 }
 0x2ee   : > { %v5519_v1 = vcombine.low %v5511_v46, %v5518_v55  ;;  %5026 = vrot.lane.b32.xlu1 %v4681_v52, %s10401_s15  ;;  %v11718_v45 = vpop.permute.xlu0 %4912  ;;  %v5270_v7 = vsel %vm5246_vm3, %v2784_v5, %v4909_v57  ;;  %v11738_v10 = vmax.f32 %v2599_v33, 0.0  ;;  %v4629_v52 = vrot.slane %v11722_v14, %v11226_v62 }
 0x2ef   : > { %v4104_v63 = vcombine.high %v11672_v18, %v11672_v18  ;;  %v2682_v49 = vrot.slane %v2654_v12, %v11200_v21  ;;  %v2668_v4 = vrot.slane %v2652_v3, %v11200_v21  ;;  %v2792_v57 = vrot.slane %v11708_v43, %v11200_v21  ;;  %v14683_v18 = vld [vmem:[#allocation10_spill] sm:$0xff] }
 0x2f0   : > { %6079 = vst.msk [vmem:[%s11658_s16] sm:$0xff] %vm423_vm1, %v5519_v1  ;;  %v4907_v51 = vpop.permute.xlu1 %4906  ;;  %4996 = vrot.lane.b32.xlu0 %v4621_v8, %s10401_s15  ;;  %v5596_v33 = vrot.slane %v5588_v60, %v14680_v48  ;;  %v4617_v20 = vrot.slane %v4003_v2, %v11226_v62  ;;  %v11755_v5 = vrot.slane %v11665_v31, %v11200_v21  ;;  %v11759_v12 = vmax.f32 %v2556_v53, 0.0 }
 0x2f1   : > { %v5269_v58 = vsel %vm5246_vm3, %v2782_v41, %v4907_v51  ;;  %v740_v3 = vadd.f32 %v14683_v18, %v10814_v22  ;;  %v5251_v41 = vsel %vm5246_vm3, %v2668_v4, %v4871_v28  ;;  %v11764_v60 = vrot.slane %v11738_v10, %v11200_v21 }
 0x2f2   : > { %v5589_v46 = vcombine.low %v5269_v58, %v5270_v7  ;;  %5030 = vrot.lane.b32.xlu1 %v4689_v23, %s10401_s15  ;;  %v4877_v55 = vpop.permute.xlu0 %4876  ;;  %v4701_v31 = vrot.slane %v4104_v63, %v11226_v62  ;;  %v11771_v2 = vrot.slane %v4120_v40, %v11200_v21  ;;  %v5252_v22 = vsel %vm5246_vm3, %v2682_v49, %v11668_v30  ;;  %v14684_v58 = vld [vmem:[#allocation11_spill] sm:$0xff] }
 0x2f3   : > { %v2800_v53 = vcombine.high %v2792_v57, %v2792_v57  ;;  %v2686_v7 = vcombine.high %v2682_v49, %v2682_v49  ;;  %v2684_v28 = vcombine.high %v2668_v4, %v2668_v4  ;;  %v4625_v63 = vrot.slane %v11755_v5, %v11226_v62 }
 0x2f4   : > { %v5603_v1 = vrot.slane %v5589_v46, %v14680_v48  ;;  %v4911_v8 = vpop.permute.xlu1 %4910  ;;  %5000 = vrot.lane.b32.xlu0 %v4629_v52, %s10401_s15  ;;  %v732_v46 = vadd.f32 %v14684_v58, %v10818_v24  ;;  %v5520_v52 = vcombine.low %v5251_v41, %v5252_v22  ;;  %v4102_v40 = vcombine.high %v11706_v61, %v11706_v61  ;;  %v14685_v41 = vld [vmem:[#allocation26_spill] sm:$0xff] }
 0x2f5   : > { %v4105_v30 = vcombine.high %v11685_v32, %v11685_v32  ;;  %v5254_v49 = vsel %vm5246_vm3, %v2686_v7, %v4877_v55  ;;  %v2694_v24 = vrot.slane %v11759_v12, %v11200_v21  ;;  %v4709_v61 = vrot.slane %v11771_v2, %v11226_v62 }
 0x2f6   : > { %v5604_v51 = vcombine.low %v5596_v33, %v5603_v1  ;;  %4994 = vrot.lane.b32.xlu1 %v4617_v20, %s10401_s15  ;;  %v11767_v23 = vpop.permute.xlu0 %4880  ;;  %v4022_v1 = vcombine.high %v11764_v60, %v11764_v60  ;;  %v4006_v32 = vcombine.high %v11722_v14, %v11722_v14  ;;  %v1182_v55 = vadd.f32 %v14685_v41, %v740_v3 }
 0x2f7   : > { %v2822_v7 = vrot.slane %v2800_v53, %v11200_v21  ;;  %v11804_v58 = vrot.slane %v11713_v17, %v11200_v21  ;;  %v4697_v14 = vrot.slane %v4102_v40, %v11226_v62  ;;  %v2785_v3 = vcombine.high %v11708_v43, %v11708_v43  ;;  %v14689_v43 = vld [vmem:[#allocation39_spill] sm:$0xff] }
 0x2f8   : > { %6084 = vst.msk [vmem:[%s11658_s16 + $0x48] sm:$0xff] %vm423_vm1, %v5604_v51  ;;  %v4875_v33 = vpop.permute.xlu1 %4874  ;;  %5036 = vrot.lane.b32.xlu0 %v4701_v31, %s10401_s15  ;;  %v14686_v51 = vld [vmem:[#allocation48_spill] sm:$0xff]  ;;  %v14687_v31 = vld [vmem:[#allocation5_spill] sm:$0xff]  ;;  %v2702_v17 = vcombine.high %v2694_v24, %v2694_v24  ;;  %v4637_v40 = vrot.slane %v4006_v32, %v11226_v62 }
 0x2f9   : > { %v5253_v4 = vsel %vm5246_vm3, %v2684_v28, %v4875_v33  ;;  %v1015_v22 = vadd.f32 %v14687_v31, %v14686_v51  ;;  %v2808_v28 = vrot.slane %v2792_v57, %v11200_v21  ;;  %v5528_v33 = vrot.slane %v5520_v52, %v14680_v48 }
 0x2fa   : > { %v5521_v20 = vcombine.low %v5253_v4, %v5254_v49  ;;  %4998 = vrot.lane.b32.xlu1 %v4625_v63, %s10401_s15  ;;  %v4917_v18 = vpop.permute.xlu0 %4916  ;;  %v14688_v4 = vld [vmem:[#allocation28_spill] sm:$0xff]  ;;  %v11817_v51 = vrot.slane %v4105_v30, %v11200_v21  ;;  %v1357_v30 = vadd.f32 %v10902_v26, %v1182_v55  ;;  %v4705_v32 = vrot.slane %v11804_v58, %v11226_v62 }
 0x2fb   : > { %v11813_v53 = vadd.f32 %v14688_v4, %v732_v46  ;;  %v5271_v57 = vsel %vm5246_vm3, %v2808_v28, %v4911_v8  ;;  %v1381_v41 = vadd.f32 %v14689_v43, %v1015_v22  ;;  %v5272_v46 = vsel %vm5246_vm3, %v2822_v7, %v11718_v45  ;;  %v14690_v45 = vld [vmem:[#allocation97_spill] sm:$0xff] }
 0x2fc   : > { %v5535_v63 = vrot.slane %v5521_v20, %v14680_v48  ;;  %v4879_v49 = vpop.permute.xlu1 %4878  ;;  %5040 = vrot.lane.b32.xlu0 %v4709_v61, %s10401_s15  ;;  %v11824_v61 = vrot.slane %v4022_v1, %v11200_v21  ;;  %v2832_v8 = vcombine.high %v2822_v7, %v2822_v7  ;;  %v2830_v4 = vcombine.high %v2808_v28, %v2808_v28 }
 0x2fd   : > { %v5605_v31 = vcombine.low %v5271_v57, %v5272_v46  ;;  %v4004_v1 = vcombine.high %v11755_v5, %v11755_v5  ;;  %v4007_v22 = vcombine.high %v11738_v10, %v11738_v10  ;;  %v1700_v7 = vadd.f32 %v14690_v45, %v1381_v41  ;;  %v14691_v10 = vld [vmem:[#allocation6_spill] sm:$0xff] }
 0x2fe   : > { %v5536_v52 = vcombine.low %v5528_v33, %v5535_v63  ;;  %5034 = vrot.lane.b32.xlu1 %v4697_v14, %s10401_s15  ;;  %v11820_v20 = vpop.permute.xlu0 %4920  ;;  %v5274_v28 = vsel %vm5246_vm3, %v2832_v8, %v4917_v18  ;;  %v4121_v63 = vcombine.high %v11817_v51, %v11817_v51  ;;  %v4152_v5 = vcombine.high %v11771_v2, %v11771_v2 }
 0x2ff   : > { %v2724_v18 = vrot.slane %v2702_v17, %v11200_v21  ;;  %v2799_v46 = vrot.slane %v2785_v3, %v11200_v21  ;;  %v11856_v8 = vrot.slane %v11764_v60, %v11200_v21  ;;  %v4633_v2 = vrot.slane %v4004_v1, %v11226_v62 }
 0x300   : > { %6080 = vst.msk [vmem:[%s11658_s16 + $0x8] sm:$0xff] %vm423_vm1, %v5536_v52  ;;  %v4915_v33 = vpop.permute.xlu1 %4914  ;;  %5004 = vrot.lane.b32.xlu0 %v4637_v40, %s10401_s15  ;;  %v4645_v52 = vrot.slane %v11824_v61, %v11226_v62  ;;  %v14692_v40 = vld [vmem:[#allocation50_spill] sm:$0xff]  ;;  %v2604_v3 = vadd.f32 %v10999_v44, %v1700_v7  ;;  %v4717_v1 = vrot.slane %v4152_v5, %v11226_v62 }
 0x301   : > { %v5273_v55 = vsel %vm5246_vm3, %v2830_v4, %v4915_v33  ;;  %v1013_v41 = vadd.f32 %v14692_v40, %v14691_v10  ;;  %v2710_v4 = vrot.slane %v2694_v24, %v11200_v21  ;;  %v5613_v33 = vrot.slane %v5605_v31, %v14680_v48 }
 0x302   : > { %v5606_v14 = vcombine.low %v5273_v55, %v5274_v28  ;;  %5038 = vrot.lane.b32.xlu1 %v4705_v32, %s10401_s15  ;;  %v4885_v57 = vpop.permute.xlu0 %4884  ;;  %v2561_v28 = vadd.f32 %v11541_v59, %v1357_v30  ;;  %v11864_v24 = vrot.slane %v4007_v22, %v11200_v21  ;;  %v2687_v31 = vcombine.high %v11759_v12, %v11759_v12 }
 0x303   : > { %v5255_v60 = vsel %vm5246_vm3, %v2710_v4, %v4879_v49  ;;  %v11875_v30 = vrot.slane %v4121_v63, %v11200_v21  ;;  %v5256_v22 = vsel %vm5246_vm3, %v2724_v18, %v11767_v23  ;;  %v2734_v7 = vcombine.high %v2724_v18, %v2724_v18  ;;  %v14693_v49 = vld [vmem:[#allocation41_spill] sm:$0xff] }
 0x304   : > { %v5620_v32 = vrot.slane %v5606_v14, %v14680_v48  ;;  %v4919_v45 = vpop.permute.xlu1 %4918  ;;  %5008 = vrot.lane.b32.xlu0 %v4645_v52, %s10401_s15  ;;  %v2801_v14 = vcombine.high %v2799_v46, %v2799_v46  ;;  %v2732_v52 = vcombine.high %v2710_v4, %v2710_v4  ;;  %v1379_v40 = vadd.f32 %v14693_v49, %v1013_v41 }
 0x305   : > { %v5537_v26 = vcombine.low %v5255_v60, %v5256_v22  ;;  %v4641_v5 = vrot.slane %v11856_v8, %v11226_v62  ;;  %v4150_v63 = vcombine.high %v11804_v58, %v11804_v58  ;;  %v4023_v23 = vcombine.high %v11864_v24, %v11864_v24 }
 0x306   : > { %v5621_v17 = vcombine.low %v5613_v33, %v5620_v32  ;;  %5002 = vrot.lane.b32.xlu1 %v4633_v2, %s10401_s15  ;;  %v11871_v55 = vpop.permute.xlu0 %4888  ;;  %v11889_v33 = vmax.f32 %v2604_v3, 0.0  ;;  %v5258_v18 = vsel %vm5246_vm3, %v2734_v7, %v4885_v57  ;;  %v1698_v4 = vadd.f32 %v11262_v54, %v1379_v40 }
 0x307   : > { %v4725_v60 = vrot.slane %v11875_v30, %v11226_v62  ;;  %v4054_v58 = vcombine.high %v11824_v61, %v11824_v61  ;;  %v2815_v3 = vrot.slane %v2799_v46, %v11200_v21  ;;  %v2701_v57 = vrot.slane %v2687_v31, %v11200_v21 }
 0x308   : > { %6085 = vst.msk [vmem:[%s11658_s16 + $0x50] sm:$0xff] %vm423_vm1, %v5621_v17  ;;  %v4883_v12 = vpop.permute.xlu1 %4882  ;;  %5044 = vrot.lane.b32.xlu0 %v4717_v1, %s10401_s15  ;;  %v2829_v17 = vrot.slane %v2801_v14, %v11200_v21  ;;  %v5545_v1 = vrot.slane %v5537_v26, %v14680_v48  ;;  %v4713_v7 = vrot.slane %v4150_v63, %v11226_v62  ;;  %v11910_v61 = vmax.f32 %v2561_v28, 0.0 }
 0x309   : > { %v5257_v41 = vsel %vm5246_vm3, %v2732_v52, %v4883_v12  ;;  %v11908_v52 = vrot.slane %v11817_v51, %v11200_v21  ;;  %v1355_v46 = vadd.f32 %v10908_v47, %v11813_v53  ;;  %v11916_v26 = vrot.slane %v11889_v33, %v11200_v21 }
 0x30a   : > { %v5538_v32 = vcombine.low %v5257_v41, %v5258_v18  ;;  %5006 = vrot.lane.b32.xlu1 %v4641_v5, %s10401_s15  ;;  %v4925_v2 = vpop.permute.xlu0 %4924  ;;  %v5275_v31 = vsel %vm5246_vm3, %v2815_v3, %v4919_v45  ;;  %v2602_v14 = vadd.f32 %v10999_v44, %v1698_v4  ;;  %v4653_v51 = vrot.slane %v4054_v58, %v11226_v62 }
 0x30b   : > { %v11925_v28 = vrot.slane %v4023_v23, %v11200_v21  ;;  %v5276_v53 = vsel %vm5246_vm3, %v2829_v17, %v11820_v20  ;;  %v2703_v5 = vcombine.high %v2701_v57, %v2701_v57  ;;  %v2833_v63 = vcombine.high %v2829_v17, %v2829_v17 }
 0x30c   : > { %v5552_v54 = vrot.slane %v5538_v32, %v14680_v48  ;;  %v4887_v22 = vpop.permute.xlu1 %4886  ;;  %5048 = vrot.lane.b32.xlu0 %v4725_v60, %s10401_s15  ;;  %v2831_v18 = vcombine.high %v2815_v3, %v2815_v3  ;;  %v5622_v41 = vcombine.low %v5275_v31, %v5276_v53  ;;  %v4721_v4 = vrot.slane %v11908_v52, %v11226_v62 }
 0x30d   : > { %v4052_v32 = vcombine.high %v11856_v8, %v11856_v8  ;;  %v2559_v23 = vadd.f32 %v11541_v59, %v1355_v46  ;;  %v4267_v20 = vcombine.high %v11916_v26, %v11916_v26  ;;  %v5278_v60 = vsel %vm5246_vm3, %v2833_v63, %v4925_v2 }
 0x30e   : > { %v5553_v40 = vcombine.low %v5545_v1, %v5552_v54  ;;  %5042 = vrot.lane.b32.xlu1 %v4713_v7, %s10401_s15  ;;  %v11921_v12 = vpop.permute.xlu0 %4960  ;;  %v11941_v17 = vmax.f32 %v2602_v14, 0.0  ;;  %v4661_v54 = vrot.slane %v11925_v28, %v11226_v62  ;;  %v4153_v8 = vcombine.high %v11875_v30, %v11875_v30  ;;  %v14694_v30 = vld [vmem:[#allocation12_spill] sm:$0xff] }
 0x30f   : > { %v2731_v7 = vrot.slane %v2703_v5, %v11200_v21  ;;  %v2717_v46 = vrot.slane %v2701_v57, %v11200_v21  ;;  %v2939_v2 = vrot.slane %v11910_v61, %v11200_v21  ;;  %v5630_v31 = vrot.slane %v5622_v41, %v14680_v48 }
 0x310   : > { %6081 = vst.msk [vmem:[%s11658_s16 + $0x10] sm:$0xff] %vm423_vm1, %v5553_v40  ;;  %v4923_v45 = vpop.permute.xlu1 %4922  ;;  %5012 = vrot.lane.b32.xlu0 %v4653_v51, %s10401_s15  ;;  %v4649_v51 = vrot.slane %v4052_v32, %v11226_v62  ;;  %v11958_v53 = vrot.slane %v11864_v24, %v11200_v21  ;;  %v743_v57 = vadd.f32 %v14694_v30, %v10822_v27  ;;  %v11962_v5 = vmax.f32 %v2559_v23, 0.0 }
 0x311   : > { %v5277_v58 = vsel %vm5246_vm3, %v2831_v18, %v4923_v45  ;;  %v5259_v63 = vsel %vm5246_vm3, %v2717_v46, %v4887_v22  ;;  %v11967_v18 = vrot.slane %v11941_v17, %v11200_v21  ;;  %v4733_v24 = vrot.slane %v4153_v8, %v11226_v62 }
 0x312   : > { %v5623_v3 = vcombine.low %v5277_v58, %v5278_v60  ;;  %5046 = vrot.lane.b32.xlu1 %v4721_v4, %s10401_s15  ;;  %v4893_v1 = vpop.permute.xlu0 %4892  ;;  %v11974_v4 = vrot.slane %v4267_v20, %v11200_v21  ;;  %v5260_v27 = vsel %vm5246_vm3, %v2731_v7, %v11871_v55  ;;  %v2947_v32 = vcombine.high %v2939_v2, %v2939_v2  ;;  %v14695_v60 = vld [vmem:[#allocation29_spill] sm:$0xff] }
 0x313   : > { %v2735_v23 = vcombine.high %v2731_v7, %v2731_v7  ;;  %v2733_v22 = vcombine.high %v2717_v46, %v2717_v46  ;;  %v1183_v58 = vadd.f32 %v14695_v60, %v743_v57  ;;  %v4657_v8 = vrot.slane %v11958_v53, %v11226_v62  ;;  %v14696_v57 = vld [vmem:[#allocation51_spill] sm:$0xff] }
 0x314   : > { %v5637_v14 = vrot.slane %v5623_v3, %v14680_v48  ;;  %v4959_v40 = vpop.permute.xlu1 %4958  ;;  %5016 = vrot.lane.b32.xlu0 %v4661_v54, %s10401_s15  ;;  %v5554_v3 = vcombine.low %v5259_v63, %v5260_v27  ;;  %v4151_v20 = vcombine.high %v11908_v52, %v11908_v52  ;;  %v4252_v55 = vcombine.high %v11889_v33, %v11889_v33  ;;  %v14697_v63 = vld [vmem:[#allocation7_spill] sm:$0xff] }
 0x315   : > { %v5262_v7 = vsel %vm5246_vm3, %v2735_v23, %v4893_v1  ;;  %v2841_v46 = vrot.slane %v11962_v5, %v11200_v21  ;;  %v4805_v52 = vrot.slane %v11974_v4, %v11226_v62  ;;  %v4055_v33 = vcombine.high %v11925_v28, %v11925_v28  ;;  %v14698_v28 = vld [vmem:[#allocation13_spill] sm:$0xff] }
 0x316   : > { %v5638_v41 = vcombine.low %v5630_v31, %v5637_v14  ;;  %5010 = vrot.lane.b32.xlu1 %v4649_v51, %s10401_s15  ;;  %v11970_v45 = vpop.permute.xlu0 %4928  ;;  %v4169_v14 = vcombine.high %v11967_v18, %v11967_v18  ;;  %v2932_v1 = vcombine.high %v11910_v61, %v11910_v61  ;;  %v2955_v27 = vrot.slane %v2939_v2, %v11200_v21 }
 0x317   : > { %v12007_v23 = vrot.slane %v11916_v26, %v11200_v21  ;;  %v4729_v61 = vrot.slane %v4151_v20, %v11226_v62  ;;  %v12017_v2 = vrot.slane %v4252_v55, %v11200_v21 }
 0x318   : > { %6086 = vst.msk [vmem:[%s11658_s16 + $0x58] sm:$0xff] %vm423_vm1, %v5638_v41  ;;  %v4891_v54 = vpop.permute.xlu1 %4890  ;;  %5052 = vrot.lane.b32.xlu0 %v4733_v24, %s10401_s15  ;;  %v1016_v41 = vadd.f32 %v14697_v63, %v14696_v57  ;;  %v2969_v24 = vrot.slane %v2947_v32, %v11200_v21  ;;  %v1358_v32 = vadd.f32 %v10914_v15, %v1183_v58  ;;  %v14699_v57 = vld [vmem:[#allocation43_spill] sm:$0xff] }
 0x319   : > { %v5261_v31 = vsel %vm5246_vm3, %v2733_v22, %v4891_v54  ;;  %v5562_v22 = vrot.slane %v5554_v3, %v14680_v48  ;;  %v5295_v26 = vsel %vm5246_vm3, %v2955_v27, %v4959_v40  ;;  %v12025_v20 = vrot.slane %v4169_v14, %v11200_v21 }
 0x31a   : > { %v5555_v51 = vcombine.low %v5261_v31, %v5262_v7  ;;  %5014 = vrot.lane.b32.xlu1 %v4657_v8, %s10401_s15  ;;  %v4965_v30 = vpop.permute.xlu0 %4964  ;;  %v735_v7 = vadd.f32 %v14698_v28, %v10826_v29  ;;  %v2849_v31 = vcombine.high %v2841_v46, %v2841_v46  ;;  %v1382_v29 = vadd.f32 %v14699_v57, %v1016_v41 }
 0x31b   : > { %v5296_v58 = vsel %vm5246_vm3, %v2969_v24, %v11921_v12  ;;  %v2979_v55 = vcombine.high %v2969_v24, %v2969_v24  ;;  %v2977_v28 = vcombine.high %v2955_v27, %v2955_v27  ;;  %v2946_v40 = vrot.slane %v2932_v1, %v11200_v21  ;;  %v14700_v12 = vld [vmem:[#allocation98_spill] sm:$0xff] }
 0x31c   : > { %v5569_v54 = vrot.slane %v5555_v51, %v14680_v48  ;;  %v4927_v8 = vpop.permute.xlu1 %4926  ;;  %5088 = vrot.lane.b32.xlu0 %v4805_v52, %s10401_s15  ;;  %v4669_v52 = vrot.slane %v4055_v33, %v11226_v62  ;;  %v5707_v60 = vcombine.low %v5295_v26, %v5296_v58  ;;  %v4801_v33 = vrot.slane %v12007_v23, %v11226_v62 }
 0x31d   : > { %v4053_v14 = vcombine.high %v11958_v53, %v11958_v53  ;;  %v4268_v41 = vcombine.high %v12017_v2, %v12017_v2  ;;  %v1701_v24 = vadd.f32 %v14700_v12, %v1382_v29  ;;  %v5298_v27 = vsel %vm5246_vm3, %v2979_v55, %v4965_v30  ;;  %v14702_v29 = vld [vmem:[#allocation8_spill] sm:$0xff]  ;;  %v14703_v12 = vld [vmem:[#allocation53_spill] sm:$0xff] }
 0x31e   : > { %v5570_v3 = vcombine.low %v5562_v22, %v5569_v54  ;;  %5050 = vrot.lane.b32.xlu1 %v4729_v61, %s10401_s15  ;;  %v12021_v51 = vpop.permute.xlu0 %4968  ;;  %v4154_v1 = vcombine.high %v11941_v17, %v11941_v17  ;;  %v4299_v53 = vcombine.high %v11974_v4, %v11974_v4  ;;  %v1014_v30 = vadd.f32 %v14703_v12, %v14702_v29 }
 0x31f   : > { %v2871_v55 = vrot.slane %v2849_v31, %v11200_v21  ;;  %v12057_v17 = vrot.slane %v11967_v18, %v11200_v21  ;;  %v4665_v4 = vrot.slane %v4053_v14, %v11226_v62  ;;  %v2605_v31 = vadd.f32 %v10999_v44, %v1701_v24 }
 0x320   : > { %6082 = vst.msk [vmem:[%s11658_s16 + $0x18] sm:$0xff] %vm423_vm1, %v5570_v3  ;;  %v4963_v22 = vpop.permute.xlu1 %4962  ;;  %5020 = vrot.lane.b32.xlu0 %v4669_v52, %s10401_s15  ;;  %v4741_v3 = vrot.slane %v12025_v20, %v11226_v62  ;;  %v14701_v52 = vld [vmem:[#allocation31_spill] sm:$0xff]  ;;  %v12068_v18 = vrot.slane %v4154_v1, %v11200_v21  ;;  %v12075_v14 = vrot.slane %v4268_v41, %v11200_v21 }
 0x321   : > { %v5297_v54 = vsel %vm5246_vm3, %v2977_v28, %v4963_v22  ;;  %v1181_v58 = vadd.f32 %v14701_v52, %v735_v7  ;;  %v2857_v28 = vrot.slane %v2841_v46, %v11200_v21  ;;  %v5715_v22 = vrot.slane %v5707_v60, %v14680_v48 }
 0x322   : > { %v5708_v61 = vcombine.low %v5297_v54, %v5298_v27  ;;  %5086 = vrot.lane.b32.xlu1 %v4801_v33, %s10401_s15  ;;  %v4933_v26 = vpop.permute.xlu0 %4932  ;;  %v2834_v7 = vcombine.high %v11962_v5, %v11962_v5  ;;  %v2948_v54 = vcombine.high %v2946_v40, %v2946_v40  ;;  %v14704_v5 = vld [vmem:[#allocation45_spill] sm:$0xff]  ;;  %v5280_v24 = vsel %vm5246_vm3, %v2871_v55, %v11970_v45 }
 0x323   : > { %v5279_v46 = vsel %vm5246_vm3, %v2857_v28, %v4927_v8  ;;  %v1380_v12 = vadd.f32 %v14704_v5, %v1014_v30  ;;  %v2881_v8 = vcombine.high %v2871_v55, %v2871_v55  ;;  %v2879_v52 = vcombine.high %v2857_v28, %v2857_v28 }
 0x324   : > { %v5722_v33 = vrot.slane %v5708_v61, %v14680_v48  ;;  %v4967_v27 = vpop.permute.xlu1 %4966  ;;  %5056 = vrot.lane.b32.xlu0 %v4741_v3, %s10401_s15  ;;  %v4813_v3 = vrot.slane %v4299_v53, %v11226_v62  ;;  %v2562_v1 = vadd.f32 %v11541_v59, %v1358_v32  ;;  %v5639_v15 = vcombine.low %v5279_v46, %v5280_v24 }
 0x325   : > { %v4737_v53 = vrot.slane %v12057_v17, %v11226_v62  ;;  %v4297_v41 = vcombine.high %v12007_v23, %v12007_v23  ;;  %v12088_v30 = vmax.f32 %v2605_v31, 0.0  ;;  %v5282_v55 = vsel %vm5246_vm3, %v2881_v8, %v4933_v26 }
 0x326   : > { %v5723_v60 = vcombine.low %v5715_v22, %v5722_v33  ;;  %5018 = vrot.lane.b32.xlu1 %v4665_v4, %s10401_s15  ;;  %v12071_v61 = vpop.permute.xlu0 %4936  ;;  %v14705_v33 = vld [vmem:[#allocation101_spill] sm:$0xff]  ;;  %v4170_v28 = vcombine.high %v12068_v18, %v12068_v18  ;;  %v4201_v23 = vcombine.high %v12025_v20, %v12025_v20  ;;  %v2976_v31 = vrot.slane %v2948_v54, %v11200_v21 }
 0x327   : > { %v1699_v45 = vadd.f32 %v14705_v33, %v1380_v12  ;;  %v2848_v26 = vrot.slane %v2834_v7, %v11200_v21  ;;  %v4809_v8 = vrot.slane %v4297_v41, %v11226_v62  ;;  %v12111_v20 = vmax.f32 %v2562_v1, 0.0 }
 0x328   : > { %6091 = vst.msk [vmem:[%s11658_s16 + $0xc0] sm:$0xff] %vm423_vm1, %v5723_v60  ;;  %v4931_v22 = vpop.permute.xlu1 %4930  ;;  %5092 = vrot.lane.b32.xlu0 %v4813_v3, %s10401_s15  ;;  %v4821_v60 = vrot.slane %v12075_v14, %v11226_v62  ;;  %v2962_v3 = vrot.slane %v2946_v40, %v11200_v21  ;;  %v1356_v40 = vadd.f32 %v10920_v34, %v1181_v58 }
 0x329   : > { %v5281_v32 = vsel %vm5246_vm3, %v2879_v52, %v4931_v22  ;;  %v5647_v52 = vrot.slane %v5639_v15, %v14680_v48  ;;  %v12109_v22 = vrot.slane %v12017_v2, %v11200_v21  ;;  %v12116_v7 = vrot.slane %v12088_v30, %v11200_v21 }
 0x32a   : > { %v5640_v4 = vcombine.low %v5281_v32, %v5282_v55  ;;  %5054 = vrot.lane.b32.xlu1 %v4737_v53, %s10401_s15  ;;  %v4973_v46 = vpop.permute.xlu0 %4972  ;;  %v5299_v15 = vsel %vm5246_vm3, %v2962_v3, %v4967_v27  ;;  %v2603_v54 = vadd.f32 %v10999_v44, %v1699_v45  ;;  %v4749_v2 = vrot.slane %v4201_v23, %v11226_v62 }
 0x32b   : > { %v12125_v1 = vrot.slane %v4170_v28, %v11200_v21  ;;  %v5300_v58 = vsel %vm5246_vm3, %v2976_v31, %v12021_v51  ;;  %v2850_v33 = vcombine.high %v2848_v26, %v2848_v26  ;;  %v2980_v55 = vcombine.high %v2976_v31, %v2976_v31 }
 0x32c   : > { %v5654_v12 = vrot.slane %v5640_v4, %v14680_v48  ;;  %v4935_v24 = vpop.permute.xlu1 %4934  ;;  %5096 = vrot.lane.b32.xlu0 %v4821_v60, %s10401_s15  ;;  %v2978_v32 = vcombine.high %v2962_v3, %v2962_v3  ;;  %v5724_v4 = vcombine.low %v5299_v15, %v5300_v58  ;;  %v4817_v45 = vrot.slane %v12109_v22, %v11226_v62 }
 0x32d   : > { %v4199_v60 = vcombine.high %v12057_v17, %v12057_v17  ;;  %v2560_v28 = vadd.f32 %v11541_v59, %v1356_v40  ;;  %v4316_v51 = vcombine.high %v12116_v7, %v12116_v7  ;;  %v5302_v23 = vsel %vm5246_vm3, %v2980_v55, %v4973_v46 }
 0x32e   : > { %v5655_v53 = vcombine.low %v5647_v52, %v5654_v12  ;;  %5090 = vrot.lane.b32.xlu1 %v4809_v8, %s10401_s15  ;;  %v12121_v41 = vpop.permute.xlu0 %4976  ;;  %v12141_v3 = vmax.f32 %v2603_v54, 0.0  ;;  %v4757_v8 = vrot.slane %v12125_v1, %v11226_v62  ;;  %v4300_v17 = vcombine.high %v12075_v14, %v12075_v14 }
 0x32f   : > { %v2878_v59 = vrot.slane %v2850_v33, %v11200_v21  ;;  %v2864_v40 = vrot.slane %v2848_v26, %v11200_v21  ;;  %v2988_v46 = vrot.slane %v12111_v20, %v11200_v21  ;;  %v5732_v15 = vrot.slane %v5724_v4, %v14680_v48 }
 0x330   : > { %6087 = vst.msk [vmem:[%s11658_s16 + $0x80] sm:$0xff] %vm423_vm1, %v5655_v53  ;;  %v4971_v27 = vpop.permute.xlu1 %4970  ;;  %5060 = vrot.lane.b32.xlu0 %v4749_v2, %s10401_s15  ;;  %v4745_v2 = vrot.slane %v4199_v60, %v11226_v62  ;;  %v12158_v14 = vrot.slane %v12068_v18, %v11200_v21  ;;  %v12160_v58 = vmax.f32 %v2560_v28, 0.0  ;;  %v12165_v33 = vrot.slane %v12141_v3, %v11200_v21  ;;  %v14706_v28 = vld [vmem:[#allocation14_spill] sm:$0xff] }
 0x331   : > { %v5301_v31 = vsel %vm5246_vm3, %v2978_v32, %v4971_v27  ;;  %v5283_v26 = vsel %vm5246_vm3, %v2864_v40, %v4935_v24  ;;  %v4829_v4 = vrot.slane %v4300_v17, %v11226_v62  ;;  %v12172_v27 = vrot.slane %v4316_v51, %v11200_v21 }
 0x332   : > { %v5725_v52 = vcombine.low %v5301_v31, %v5302_v23  ;;  %5094 = vrot.lane.b32.xlu1 %v4817_v45, %s10401_s15  ;;  %v4941_v12 = vpop.permute.xlu0 %4940  ;;  %v5284_v18 = vsel %vm5246_vm3, %v2878_v59, %v12071_v61  ;;  %v2996_v45 = vcombine.high %v2988_v46, %v2988_v46  ;;  %v2882_v60 = vcombine.high %v2878_v59, %v2878_v59 }
 0x333   : > { %v2880_v24 = vcombine.high %v2864_v40, %v2864_v40  ;;  %v756_v23 = vadd.f32 %v14706_v28, %v10800_v16  ;;  %v5656_v31 = vcombine.low %v5283_v26, %v5284_v18  ;;  %v4298_v51 = vcombine.high %v12109_v22, %v12109_v22 }
 0x334   : > { %v5739_v54 = vrot.slane %v5725_v52, %v14680_v48  ;;  %v4975_v53 = vpop.permute.xlu1 %4974  ;;  %5064 = vrot.lane.b32.xlu0 %v4757_v8, %s10401_s15  ;;  %v4753_v8 = vrot.slane %v12158_v14, %v11226_v62  ;;  %v4301_v61 = vcombine.high %v12088_v30, %v12088_v30  ;;  %v5286_v17 = vsel %vm5246_vm3, %v2882_v60, %v4941_v12 }
 0x335   : > { %v2890_v16 = vrot.slane %v12160_v58, %v11200_v21  ;;  %v4218_v40 = vcombine.high %v12165_v33, %v12165_v33  ;;  %v4837_v22 = vrot.slane %v12172_v27, %v11226_v62  ;;  %v4202_v30 = vcombine.high %v12125_v1, %v12125_v1  ;;  %v14708_v1 = vld [vmem:[#allocation15_spill] sm:$0xff] }
 0x336   : > { %v5740_v55 = vcombine.low %v5732_v15, %v5739_v54  ;;  %5058 = vrot.lane.b32.xlu1 %v4745_v2, %s10401_s15  ;;  %v12168_v32 = vpop.permute.xlu0 %4944  ;;  %v14707_v2 = vld [vmem:[#allocation32_spill] sm:$0xff]  ;;  %v3018_v26 = vrot.slane %v2996_v45, %v11200_v21  ;;  %v5664_v18 = vrot.slane %v5656_v31, %v14680_v48  ;;  %v4825_v28 = vrot.slane %v4298_v51, %v11226_v62 }
 0x337   : > { %v1186_v12 = vadd.f32 %v14707_v2, %v756_v23  ;;  %v748_v23 = vadd.f32 %v14708_v1, %v10804_v0  ;;  %v4765_v51 = vrot.slane %v4202_v30, %v11226_v62  ;;  %v14709_v0 = vld [vmem:[#allocation71_spill] sm:$0xff]  ;;  %v4200_v30 = vcombine.high %v12158_v14, %v12158_v14 }
 0x338   : > { %6092 = vst.msk [vmem:[%s11658_s16 + $0xc8] sm:$0xff] %vm423_vm1, %v5740_v55  ;;  %v4939_v52 = vpop.permute.xlu1 %4938  ;;  %5100 = vrot.lane.b32.xlu0 %v4829_v4, %s10401_s15  ;;  %v3004_v55 = vrot.slane %v2988_v46, %v11200_v21  ;;  %v12203_v4 = vrot.slane %v12116_v7, %v11200_v21  ;;  %v2981_v46 = vcombine.high %v12111_v20, %v12111_v20 }
 0x339   : > { %v5285_v59 = vsel %vm5246_vm3, %v2880_v24, %v4939_v52  ;;  %v2898_v7 = vcombine.high %v2890_v16, %v2890_v16  ;;  %v12215_v52 = vrot.slane %v4301_v61, %v11200_v21  ;;  %v5304_v20 = vsel %vm5246_vm3, %v3018_v26, %v12121_v41 }
 0x33a   : > { %v5657_v15 = vcombine.low %v5285_v59, %v5286_v17  ;;  %5062 = vrot.lane.b32.xlu1 %v4753_v8, %s10401_s15  ;;  %v4981_v54 = vpop.permute.xlu0 %4980  ;;  %v5303_v45 = vsel %vm5246_vm3, %v3004_v55, %v4975_v53  ;;  %v12222_v17 = vrot.slane %v4218_v40, %v11200_v21  ;;  %v1752_v59 = vadd.f32 %v10879_v6, %v14709_v0 }
 0x33b   : > { %v3028_v53 = vcombine.high %v3018_v26, %v3018_v26  ;;  %v1361_v61 = vadd.f32 %v10926_v38, %v1186_v12  ;;  %v4833_v40 = vrot.slane %v12203_v4, %v11226_v62  ;;  %v4203_v6 = vcombine.high %v12141_v3, %v12141_v3  ;;  %v14710_v3 = vld [vmem:[#allocation33_spill] sm:$0xff] }
 0x33c   : > { %v5671_v60 = vrot.slane %v5657_v15, %v14680_v48  ;;  %v4943_v24 = vpop.permute.xlu1 %4942  ;;  %5104 = vrot.lane.b32.xlu0 %v4837_v22, %s10401_s15  ;;  %v3026_v15 = vcombine.high %v3004_v55, %v3004_v55  ;;  %v5741_v22 = vcombine.low %v5303_v45, %v5304_v20  ;;  %v2295_v41 = vadd.f32 %v11313_v39, %v1752_v59 }
 0x33d   : > { %v5306_v26 = vsel %vm5246_vm3, %v3028_v53, %v4981_v54  ;;  %v4317_v55 = vcombine.high %v12215_v52, %v12215_v52  ;;  %v4773_v1 = vrot.slane %v12222_v17, %v11226_v62  ;;  %v4348_v14 = vcombine.high %v12172_v27, %v12172_v27 }
 0x33e   : > { %v5672_v31 = vcombine.low %v5664_v18, %v5671_v60  ;;  %5098 = vrot.lane.b32.xlu1 %v4825_v28, %s10401_s15  ;;  %v12218_v8 = vpop.permute.xlu0 %4984  ;;  %v1184_v45 = vadd.f32 %v14710_v3, %v748_v23  ;;  %v2920_v39 = vrot.slane %v2898_v7, %v11200_v21  ;;  %v2906_v54 = vrot.slane %v2890_v16, %v11200_v21  ;;  %v12263_v23 = vld [vmem:[%s14456_s4] ss:$0 sm:$0xff] }
 0x33f   : > { %v5749_v0 = vrot.slane %v5741_v22, %v14680_v48  ;;  %v4761_v27 = vrot.slane %v4200_v30, %v11226_v62  ;;  %v2565_v16 = vadd.f32 %v12263_v23, %v1361_v61  ;;  %v12278_v61 = vrot.slane %v4317_v55, %v11200_v21 }
 0x340   : > { %6088 = vst.msk [vmem:[%s11658_s16 + $0x88] sm:$0xff] %vm423_vm1, %v5672_v31  ;;  %v4979_v18 = vpop.permute.xlu1 %4978  ;;  %5068 = vrot.lane.b32.xlu0 %v4765_v51, %s10401_s15  ;;  %v2995_v31 = vrot.slane %v2981_v46, %v11200_v21  ;;  %v12254_v51 = vrot.slane %v12165_v33, %v11200_v21  ;;  %v12267_v33 = vrot.slane %v4203_v6, %v11200_v21  ;;  %v14711_v46 = vld [vmem:[#allocation105_spill] sm:$0xff] }
 0x341   : > { %v5305_v12 = vsel %vm5246_vm3, %v3026_v15, %v4979_v18  ;;  %v2534_v7 = vadd.f32 %v14711_v46, %v2295_v41  ;;  %v5287_v53 = vsel %vm5246_vm3, %v2906_v54, %v4943_v24  ;;  %v2883_v15 = vcombine.high %v12160_v58, %v12160_v58  ;;  %v14712_v24 = vld [vmem:[#allocation73_spill] sm:$0xff] }
 0x342   : > { %v5742_v60 = vcombine.low %v5305_v12, %v5306_v26  ;;  %5102 = vrot.lane.b32.xlu1 %v4833_v40, %s10401_s15  ;;  %v4949_v28 = vpop.permute.xlu0 %4948  ;;  %v4845_v40 = vrot.slane %v4348_v14, %v11226_v62  ;;  %v5288_v30 = vsel %vm5246_vm3, %v2920_v39, %v12168_v32  ;;  %v2997_v6 = vcombine.high %v2995_v31, %v2995_v31  ;;  %v14713_v14 = vld [vmem:[#allocation46_spill] sm:$0xff] }
 0x343   : > { %v2930_v41 = vcombine.high %v2920_v39, %v2920_v39  ;;  %v2928_v26 = vcombine.high %v2906_v54, %v2906_v54  ;;  %v1750_v12 = vadd.f32 %v14712_v24, %v10885_v9  ;;  %v5673_v58 = vcombine.low %v5287_v53, %v5288_v30 }
 0x344   : > { %v5756_v59 = vrot.slane %v5742_v60, %v14680_v48  ;;  %v4983_v20 = vpop.permute.xlu1 %4982  ;;  %5072 = vrot.lane.b32.xlu0 %v4773_v1, %s10401_s15  ;;  %v4769_v1 = vrot.slane %v12254_v51, %v11226_v62  ;;  %v4346_v55 = vcombine.high %v12203_v4, %v12203_v4  ;;  %v4219_v32 = vcombine.high %v12267_v33, %v12267_v33 }
 0x345   : > { %v6148_v39 = vadd.f32 %v14713_v14, %v2534_v7  ;;  %v5290_v54 = vsel %vm5246_vm3, %v2930_v41, %v4949_v28  ;;  %v4853_v46 = vrot.slane %v12278_v61, %v11226_v62  ;;  %v4250_v4 = vcombine.high %v12222_v17, %v12222_v17 }
 0x346   : > { %v5757_v22 = vcombine.low %v5749_v0, %v5756_v59  ;;  %5066 = vrot.lane.b32.xlu1 %v4761_v27, %s10401_s15  ;;  %v12274_v18 = vpop.permute.xlu0 %4952  ;;  %v2293_v0 = vadd.f32 %v11336_v50, %v1750_v12  ;;  %v3025_v53 = vrot.slane %v2997_v6, %v11200_v21  ;;  %v3011_v7 = vrot.slane %v2995_v31, %v11200_v21 }
 0x347   : > { %v2897_v28 = vrot.slane %v2883_v15, %v11200_v21  ;;  %v4841_v30 = vrot.slane %v4346_v55, %v11226_v62  ;;  %v12311_v41 = vrot.slane %v12215_v52, %v11200_v21  ;;  %v12313_v17 = vmax.f32 %v2565_v16, 0.0 }
 0x348   : > { %6093 = vst.msk [vmem:[%s11658_s16 + $0xd0] sm:$0xff] %vm423_vm1, %v5757_v22  ;;  %v4947_v60 = vpop.permute.xlu1 %4946  ;;  %5108 = vrot.lane.b32.xlu0 %v4845_v40, %s10401_s15  ;;  %v5681_v22 = vrot.slane %v5673_v58, %v14680_v48  ;;  %v1359_v31 = vadd.f32 %v10932_v42, %v1184_v45  ;;  %v12316_v6 = vmax.f32 %v6148_v39, 0.0  ;;  %v5307_v15 = vsel %vm5246_vm3, %v3011_v7, %v4983_v20 }
 0x349   : > { %v5289_v9 = vsel %vm5246_vm3, %v2928_v26, %v4947_v60  ;;  %v14714_v26 = vld [vmem:[#allocation107_spill] sm:$0xff]  ;;  %v4781_v60 = vrot.slane %v4250_v4, %v11226_v62  ;;  %v12325_v52 = vrot.slane %v4219_v32, %v11200_v21  ;;  %v5308_v16 = vsel %vm5246_vm3, %v3025_v53, %v12218_v8 }
 0x34a   : > { %v5674_v59 = vcombine.low %v5289_v9, %v5290_v54  ;;  %5070 = vrot.lane.b32.xlu1 %v4769_v1, %s10401_s15  ;;  %v4989_v27 = vpop.permute.xlu0 %4988  ;;  %v2532_v24 = vadd.f32 %v14714_v26, %v2293_v0  ;;  %v2899_v45 = vcombine.high %v2897_v28, %v2897_v28  ;;  %v3029_v1 = vcombine.high %v3025_v53, %v3025_v53 }
 0x34b   : > { %v3027_v55 = vcombine.high %v3011_v7, %v3011_v7  ;;  %v5758_v39 = vcombine.low %v5307_v15, %v5308_v16  ;;  %v4849_v54 = vrot.slane %v12311_v41, %v11226_v62  ;;  %v4248_v9 = vcombine.high %v12254_v51, %v12254_v51 }
 0x34c   : > { %v5688_v50 = vrot.slane %v5674_v59, %v14680_v48  ;;  %v4951_v40 = vpop.permute.xlu1 %4950  ;;  %5112 = vrot.lane.b32.xlu0 %v4853_v46, %s10401_s15  ;;  %v2563_v32 = vadd.f32 %v12263_v23, %v1359_v31  ;;  %v12339_v8 = vrot.slane %v12316_v6, %v11200_v21  ;;  %v5310_v0 = vsel %vm5246_vm3, %v3029_v1, %v4989_v27 }
 0x34d   : > { %v6146_v46 = vadd.f32 %v14713_v14, %v2532_v24  ;;  %v4789_v7 = vrot.slane %v12325_v52, %v11226_v62  ;;  %v4349_v51 = vcombine.high %v12278_v61, %v12278_v61  ;;  %v3135_v27 = vrot.slane %v12313_v17, %v11200_v21 }
 0x34e   : > { %v5689_v12 = vcombine.low %v5681_v22, %v5688_v50  ;;  %5106 = vrot.lane.b32.xlu1 %v4841_v30, %s10401_s15  ;;  %v12321_v58 = vpop.permute.xlu0 %5024  ;;  %v2927_v22 = vrot.slane %v2899_v45, %v11200_v21  ;;  %v2913_v50 = vrot.slane %v2897_v28, %v11200_v21  ;;  %v5766_v30 = vrot.slane %v5758_v39, %v14680_v48 }
 0x34f   : > { %v4777_v26 = vrot.slane %v4248_v9, %v11226_v62  ;;  %v4233_v61 = vrot.slane %v12267_v33, %v11200_v21  ;;  %v12359_v24 = vmax.f32 %v2563_v32, 0.0  ;;  %v4861_v45 = vrot.slane %v4349_v51, %v11226_v62 }
 0x350   : > { %6089 = vst.msk [vmem:[%s11658_s16 + $0x90] sm:$0xff] %vm423_vm1, %v5689_v12  ;;  %v4987_v20 = vpop.permute.xlu1 %4986  ;;  %5076 = vrot.lane.b32.xlu0 %v4781_v60, %s10401_s15  ;;  %v5291_v28 = vsel %vm5246_vm3, %v2913_v50, %v4951_v40  ;;  %v12362_v12 = vmax.f32 %v6146_v46, 0.0  ;;  %v12370_v1 = vrot.slane %v12339_v8, %v11200_v21  ;;  %v5292_v33 = vsel %vm5246_vm3, %v2927_v22, %v12274_v18 }
 0x351   : > { %v5309_v59 = vsel %vm5246_vm3, %v3027_v55, %v4987_v20  ;;  %v3143_v55 = vcombine.high %v3135_v27, %v3135_v27  ;;  %v2931_v39 = vcombine.high %v2927_v22, %v2927_v22  ;;  %v2929_v20 = vcombine.high %v2913_v50, %v2913_v50 }
 0x352   : > { %v5759_v4 = vcombine.low %v5309_v59, %v5310_v0  ;;  %5110 = vrot.lane.b32.xlu1 %v4849_v54, %s10401_s15  ;;  %v4957_v53 = vpop.permute.xlu0 %4956  ;;  %v5690_v40 = vcombine.low %v5291_v28, %v5292_v33  ;;  %v4785_v9 = vrot.slane %v4233_v61, %v11226_v62  ;;  %v4347_v32 = vcombine.high %v12311_v41, %v12311_v41  ;;  %v14715_v0 = vld [vmem:[#allocation16_spill] sm:$0xff]  ;;  %v14717_v33 = vld [vmem:[#allocation34_spill] sm:$0xff] }
 0x353   : > { %v759_v59 = vadd.f32 %v14715_v0, %v10808_v19  ;;  %v5294_v46 = vsel %vm5246_vm3, %v2931_v39, %v4957_v53  ;;  %v7973_v22 = vrot.slane %v12370_v1, %v11226_v62  ;;  %v4251_v41 = vcombine.high %v12325_v52, %v12325_v52 }
 0x354   : > { %v5773_v31 = vrot.slane %v5759_v4, %v14680_v48  ;;  %v5023_v15 = vpop.permute.xlu1 %5022  ;;  %5080 = vrot.lane.b32.xlu0 %v4789_v7, %s10401_s15  ;;  %v7129_v4 = vrot.slane %v12362_v12, %v11200_v21  ;;  %v7235_v19 = vcombine.high %v12339_v8, %v12339_v8  ;;  %v3165_v53 = vrot.slane %v3143_v55, %v11200_v21  ;;  %v14716_v8 = vld [vmem:[#allocation17_spill] sm:$0xff] }
 0x355   : > { %v3151_v50 = vrot.slane %v3135_v27, %v11200_v21  ;;  %v4857_v52 = vrot.slane %v4347_v32, %v11226_v62  ;;  %v3128_v27 = vcombine.high %v12313_v17, %v12313_v17  ;;  %v1187_v55 = vadd.f32 %v14717_v33, %v759_v59 }
 0x356   : > { %v5774_v60 = vcombine.low %v5766_v30, %v5773_v31  ;;  %5074 = vrot.lane.b32.xlu1 %v4777_v26, %s10401_s15  ;;  %v12365_v16 = vpop.permute.xlu0 %4992  ;;  %v3037_v30 = vrot.slane %v12359_v24, %v11200_v21  ;;  %v5698_v31 = vrot.slane %v5690_v40, %v14680_v48  ;;  %v5328_v17 = vsel %vm5246_vm3, %v3165_v53, %v12321_v58 }
 0x357   : > { %v5327_v39 = vsel %vm5246_vm3, %v3151_v50, %v5023_v15  ;;  %v3175_v32 = vcombine.high %v3165_v53, %v3165_v53  ;;  %v3173_v0 = vcombine.high %v3151_v50, %v3151_v50  ;;  %v7137_v15 = vcombine.high %v7129_v4, %v7129_v4 }
 0x358   : > { %6094 = vst.msk [vmem:[%s11658_s16 + $0xd8] sm:$0xff] %vm423_vm1, %v5774_v60  ;;  %v4955_v54 = vpop.permute.xlu1 %4954  ;;  %5116 = vrot.lane.b32.xlu0 %v4861_v45, %s10401_s15  ;;  %v4249_v60 = vcombine.high %v4233_v61, %v4233_v61  ;;  %v751_v45 = vadd.f32 %v14716_v8, %v14678_v36  ;;  %v4797_v61 = vrot.slane %v4251_v41, %v11226_v62 }
 0x359   : > { %v5293_v18 = vsel %vm5246_vm3, %v2929_v20, %v4955_v54  ;;  %v7220_v20 = vcombine.high %v12316_v6, %v12316_v6  ;;  %v12414_v36 = vrot.slane %v7129_v4, %v11200_v21  ;;  %v5843_v59 = vcombine.low %v5327_v39, %v5328_v17 }
 0x35a   : > { %v5691_v7 = vcombine.low %v5293_v18, %v5294_v46  ;;  %5078 = vrot.lane.b32.xlu1 %v4785_v9, %s10401_s15  ;;  %v5029_v51 = vpop.permute.xlu0 %5028  ;;  %v3045_v9 = vcombine.high %v3037_v30, %v3037_v30  ;;  %v4793_v46 = vrot.slane %v4249_v60, %v11226_v62  ;;  %v7257_v18 = vrot.slane %v7235_v19, %v11200_v21 }
 0x35b   : > { %v5330_v58 = vsel %vm5246_vm3, %v3175_v32, %v5029_v51  ;;  %v7234_v4 = vrot.slane %v7220_v20, %v11200_v21  ;;  %v7265_v19 = vcombine.high %v12370_v1, %v12370_v1  ;;  %v3053_v51 = vrot.slane %v3037_v30, %v11200_v21  ;;  %v14719_v1 = vld [vmem:[#allocation36_spill] sm:$0xff] }
 0x35c   : > { %v5705_v26 = vrot.slane %v5691_v7, %v14680_v48  ;;  %v4991_v28 = vpop.permute.xlu1 %4990  ;;  %8450 = vrot.lane.b32.xlu0 %v7973_v22, %s10409_s25  ;;  %v1362_v7 = vadd.f32 %v14675_v35, %v1187_v55  ;;  %v14718_v22 = vld [vmem:[#allocation74_spill] sm:$0xff]  ;;  %v3142_v60 = vrot.slane %v3128_v27, %v11200_v21  ;;  %v5851_v8 = vrot.slane %v5843_v59, %v14680_v48 }
 0x35d   : > { %v1751_v41 = vadd.f32 %v14718_v22, %v10896_v13  ;;  %v3067_v13 = vrot.slane %v3045_v9, %v11200_v21  ;;  %v7977_v20 = vrot.slane %v7257_v18, %v11226_v62  ;;  %v1185_v30 = vadd.f32 %v14719_v1, %v751_v45 }
 0x35e   : > { %v5706_v40 = vcombine.low %v5698_v31, %v5705_v26  ;;  %5114 = vrot.lane.b32.xlu1 %v4857_v52, %s10401_s15  ;;  %v12410_v54 = vpop.permute.xlu0 %5032  ;;  %v7909_v26 = vrot.slane %v12414_v36, %v11226_v62  ;;  %v7122_v17 = vcombine.high %v12362_v12, %v12362_v12  ;;  %v3144_v45 = vcombine.high %v3142_v60, %v3142_v60 }
 0x35f   : > { %v2294_v52 = vadd.f32 %v11342_v56, %v1751_v41  ;;  %v3030_v56 = vcombine.high %v12359_v24, %v12359_v24  ;;  %v5312_v24 = vsel %vm5246_vm3, %v3067_v13, %v12365_v16  ;;  %v3075_v59 = vcombine.high %v3053_v51, %v3053_v51 }
 0x360   : > { %6090 = vst.msk [vmem:[%s11658_s16 + $0x98] sm:$0xff] %vm423_vm1, %v5706_v40  ;;  %v5027_v6 = vpop.permute.xlu1 %5026  ;;  %5084 = vrot.lane.b32.xlu0 %v4797_v61, %s10401_s15  ;;  %v12443_v40 = vrot.slane %v7137_v15, %v11200_v21  ;;  %v5311_v61 = vsel %vm5246_vm3, %v3053_v51, %v4991_v28  ;;  %v12457_v15 = vrot.slane %v7234_v4, %v11200_v21 }
 0x361   : > { %v5329_v53 = vsel %vm5246_vm3, %v3173_v0, %v5027_v6  ;;  %v2533_v27 = vadd.f32 %v11357_v25, %v2294_v52  ;;  %v7981_v0 = vrot.slane %v7265_v19, %v11226_v62  ;;  %v3077_v25 = vcombine.high %v3067_v13, %v3067_v13 }
 0x362   : > { %v5844_v50 = vcombine.low %v5329_v53, %v5330_v58  ;;  %5082 = vrot.lane.b32.xlu1 %v4793_v46, %s10401_s15  ;;  %v4997_v31 = vpop.permute.xlu0 %4996  ;;  %v5775_v28 = vcombine.low %v5311_v61, %v5312_v24  ;;  %v7913_v6 = vrot.slane %v12443_v40, %v11226_v62  ;;  %v7267_v46 = vcombine.high %v7257_v18, %v7257_v18 }
 0x363   : > { %v7236_v22 = vcombine.high %v7234_v4, %v7234_v4  ;;  %v2566_v41 = vadd.f32 %v12263_v23, %v1362_v7  ;;  %v6147_v58 = vadd.f32 %v14713_v14, %v2533_v27  ;;  %v5314_v16 = vsel %vm5246_vm3, %v3077_v25, %v4997_v31 }
 0x364   : > { %v5858_v55 = vrot.slane %v5844_v50, %v14680_v48  ;;  %v5031_v39 = vpop.permute.xlu1 %5030  ;;  %8418 = vrot.lane.b32.xlu0 %v7909_v26, %s10409_s25  ;;  %v7136_v50 = vrot.slane %v7122_v17, %v11200_v21  ;;  %v7989_v52 = vrot.slane %v12457_v15, %v11226_v62  ;;  %v7167_v18 = vcombine.high %v12414_v36, %v12414_v36 }
 0x365   : > { %v3172_v7 = vrot.slane %v3144_v45, %v11200_v21  ;;  %v3158_v4 = vrot.slane %v3142_v60, %v11200_v21  ;;  %v3044_v31 = vrot.slane %v3030_v56, %v11200_v21  ;;  %v5783_v13 = vrot.slane %v5775_v28, %v14680_v48 }
 0x366   : > { %v5859_v9 = vcombine.low %v5851_v8, %v5858_v55  ;;  %8452 = vrot.lane.b32.xlu1 %v7977_v20, %s10409_s25  ;;  %v12453_v32 = vpop.permute.xlu0 %5000  ;;  %v7985_v55 = vrot.slane %v7267_v46, %v11226_v62  ;;  %v12484_v20 = vrot.slane %v7236_v22, %v11200_v21  ;;  %v12486_v36 = vmax.f32 %v2566_v41, 0.0 }
 0x367   : > { %v1360_v27 = vadd.f32 %v14681_v37, %v1185_v30  ;;  %v5331_v60 = vsel %vm5246_vm3, %v3158_v4, %v5031_v39  ;;  %v6163_v56 = vmax.f32 %v6147_v58, 0.0  ;;  %v5332_v24 = vsel %vm5246_vm3, %v3172_v7, %v12410_v54 }
 0x368   : > { %6099 = vst.msk [vmem:[%s11658_s16 + $0x140] sm:$0xff] %vm423_vm1, %v5859_v9  ;;  %v4995_v12 = vpop.permute.xlu1 %4994  ;;  %8454 = vrot.lane.b32.xlu0 %v7981_v0, %s10409_s25  ;;  %v7917_v9 = vrot.slane %v7167_v18, %v11226_v62  ;;  %v7152_v0 = vrot.slane %v7136_v50, %v11200_v21  ;;  %v3046_v45 = vcombine.high %v3044_v31, %v3044_v31 }
 0x369   : > { %v5313_v53 = vsel %vm5246_vm3, %v3075_v59, %v4995_v12  ;;  %v3176_v25 = vcombine.high %v3172_v7, %v3172_v7  ;;  %v3174_v59 = vcombine.high %v3158_v4, %v3158_v4  ;;  %v5860_v28 = vcombine.low %v5331_v60, %v5332_v24 }
 0x36a   : > { %v5776_v26 = vcombine.low %v5313_v53, %v5314_v16  ;;  %8420 = vrot.lane.b32.xlu1 %v7913_v6, %s10409_s25  ;;  %v5037_v19 = vpop.permute.xlu0 %5036  ;;  %v7993_v30 = vrot.slane %v12484_v20, %v11226_v62  ;;  %v7169_v12 = vcombine.high %v12443_v40, %v12443_v40  ;;  %v7138_v6 = vcombine.high %v7136_v50, %v7136_v50 }
 0x36b   : > { %v2564_v46 = vadd.f32 %v12263_v23, %v1360_v27  ;;  %v5334_v54 = vsel %vm5246_vm3, %v3176_v25, %v5037_v19  ;;  %v3184_v22 = vrot.slane %v12486_v36, %v11200_v21  ;;  %v7178_v58 = vrot.slane %v6163_v56, %v11200_v21  ;;  %v14721_v25 = vld [vmem:[#allocation110_spill] sm:$0xff] }
 0x36c   : > { %v5790_v51 = vrot.slane %v5776_v26, %v14680_v48  ;;  %v4999_v8 = vpop.permute.xlu1 %4998  ;;  %8458 = vrot.lane.b32.xlu0 %v7989_v52, %s10409_s25  ;;  %v7925_v26 = vrot.slane %v7152_v0, %v11226_v62  ;;  %v7168_v52 = vcombine.high %v7152_v0, %v7152_v0  ;;  %v3074_v40 = vrot.slane %v3046_v45, %v11200_v21 }
 0x36d   : > { %v3060_v50 = vrot.slane %v3044_v31, %v11200_v21  ;;  %v5868_v19 = vrot.slane %v5860_v28, %v14680_v48  ;;  %v7921_v4 = vrot.slane %v7169_v12, %v11226_v62  ;;  %v3192_v31 = vcombine.high %v3184_v22, %v3184_v22 }
 0x36e   : > { %v5791_v61 = vcombine.low %v5783_v13, %v5790_v51  ;;  %8456 = vrot.lane.b32.xlu1 %v7985_v55, %s10409_s25  ;;  %v12491_v17 = vpop.permute.xlu0 %5040  ;;  %v7166_v13 = vrot.slane %v7138_v6, %v11200_v21  ;;  %v12519_v51 = vmax.f32 %v2564_v46, 0.0  ;;  %v14720_v55 = vld [vmem:[#allocation72_spill] sm:$0xff]  ;;  %v7933_v45 = vrot.slane %v7168_v52, %v11226_v62  ;;  %v14722_v46 = vld [vmem:[#allocation113_spill] sm:$0xff] }
 0x36f   : > { %v1753_v27 = vadd.f32 %v10890_v11, %v14720_v55  ;;  %v5315_v60 = vsel %vm5246_vm3, %v3060_v50, %v4999_v8  ;;  %v5316_v28 = vsel %vm5246_vm3, %v3074_v40, %v12453_v32  ;;  %v3076_v11 = vcombine.high %v3060_v50, %v3060_v50 }
 0x370   : > { %6095 = vst.msk [vmem:[%s11658_s16 + $0x100] sm:$0xff] %vm423_vm1, %v5791_v61  ;;  %v5035_v39 = vpop.permute.xlu1 %5034  ;;  %8422 = vrot.lane.b32.xlu0 %v7917_v9, %s10409_s25  ;;  %v7171_v61 = vcombine.high %v6163_v56, %v6163_v56  ;;  %v7194_v9 = vrot.slane %v7178_v58, %v11200_v21  ;;  %v5792_v8 = vcombine.low %v5315_v60, %v5316_v28  ;;  %v14723_v60 = vld [vmem:[#allocation5_spill] sm:$0xff] }
 0x371   : > { %v5333_v41 = vsel %vm5246_vm3, %v3174_v59, %v5035_v39  ;;  %v2296_v59 = vadd.f32 %v14721_v25, %v1753_v27  ;;  %v3078_v39 = vcombine.high %v3074_v40, %v3074_v40  ;;  %v7929_v12 = vrot.slane %v7166_v13, %v11226_v62 }
 0x372   : > { %v5861_v16 = vcombine.low %v5333_v41, %v5334_v54  ;;  %8460 = vrot.lane.b32.xlu1 %v7993_v30, %s10409_s25  ;;  %v5005_v53 = vpop.permute.xlu0 %5004  ;;  %v7186_v30 = vcombine.high %v7178_v58, %v7178_v58  ;;  %v7170_v6 = vcombine.high %v7166_v13, %v7166_v13  ;;  %v7185_v32 = vrot.slane %v7171_v61, %v11200_v21  ;;  %v14724_v61 = vld [vmem:[#allocation18_spill] sm:$0xff] }
 0x373   : > { %v2535_v54 = vadd.f32 %v14722_v46, %v2296_v59  ;;  %v5318_v41 = vsel %vm5246_vm3, %v3078_v39, %v5005_v53  ;;  %v7941_v52 = vrot.slane %v7194_v9, %v11226_v62  ;;  %v7216_v40 = vcombine.high %v7194_v9, %v7194_v9  ;;  %v14725_v46 = vld [vmem:[#allocation38_spill] sm:$0xff] }
 0x374   : > { %v5875_v18 = vrot.slane %v5861_v16, %v14680_v48  ;;  %v5039_v7 = vpop.permute.xlu1 %5038  ;;  %8426 = vrot.lane.b32.xlu0 %v7925_v26, %s10409_s25  ;;  %v3214_v50 = vrot.slane %v3192_v31, %v11200_v21  ;;  %v5800_v53 = vrot.slane %v5792_v8, %v14680_v48  ;;  %v7937_v55 = vrot.slane %v7170_v6, %v11226_v62 }
 0x375   : > { %v7208_v27 = vrot.slane %v7186_v30, %v11200_v21  ;;  %v772_v31 = vadd.f32 %v14724_v61, %v14723_v60  ;;  %v7949_v59 = vrot.slane %v7216_v40, %v11226_v62  ;;  %v7201_v28 = vrot.slane %v7185_v32, %v11200_v21 }
 0x376   : > { %v5876_v0 = vcombine.low %v5868_v19, %v5875_v18  ;;  %8424 = vrot.lane.b32.xlu1 %v7921_v4, %s10409_s25  ;;  %v12526_v24 = vpop.permute.xlu0 %5008  ;;  %v3200_v19 = vrot.slane %v3184_v22, %v11200_v21  ;;  %v3086_v18 = vrot.slane %v12519_v51, %v11200_v21  ;;  %v6149_v22 = vadd.f32 %v14713_v14, %v2535_v54 }
 0x377   : > { %v5336_v39 = vsel %vm5246_vm3, %v3214_v50, %v12491_v17  ;;  %v3224_v30 = vcombine.high %v3214_v50, %v3214_v50  ;;  %v7218_v6 = vcombine.high %v7208_v27, %v7208_v27  ;;  %v1190_v54 = vadd.f32 %v14725_v46, %v772_v31 }
 0x378   : > { %6100 = vst.msk [vmem:[%s11658_s16 + $0x148] sm:$0xff] %vm423_vm1, %v5876_v0  ;;  %v5003_v56 = vpop.permute.xlu1 %5002  ;;  %8430 = vrot.lane.b32.xlu0 %v7933_v45, %s10409_s25  ;;  %v5335_v9 = vsel %vm5246_vm3, %v3200_v19, %v5039_v7  ;;  %v3177_v0 = vcombine.high %v12486_v36, %v12486_v36  ;;  %v3222_v8 = vcombine.high %v3200_v19, %v3200_v19 }
 0x379   : > { %v5317_v16 = vsel %vm5246_vm3, %v3076_v11, %v5003_v56  ;;  %v3094_v11 = vcombine.high %v3086_v18, %v3086_v18  ;;  %v7187_v56 = vcombine.high %v7185_v32, %v7185_v32  ;;  %v5877_v7 = vcombine.low %v5335_v9, %v5336_v39 }
 0x37a   : > { %v5793_v26 = vcombine.low %v5317_v16, %v5318_v41  ;;  %8428 = vrot.lane.b32.xlu1 %v7929_v12, %s10409_s25  ;;  %v5045_v58 = vpop.permute.xlu0 %5044  ;;  %v7945_v12 = vrot.slane %v7208_v27, %v11226_v62  ;;  %v12569_v41 = vmax.f32 %v6149_v22, 0.0  ;;  %v7957_v50 = vrot.slane %v7201_v28, %v11226_v62 }
 0x37b   : > { %v5338_v16 = vsel %vm5246_vm3, %v3224_v30, %v5045_v58  ;;  %v7217_v19 = vcombine.high %v7201_v28, %v7201_v28  ;;  %v3102_v27 = vrot.slane %v3086_v18, %v11200_v21  ;;  %v3191_v58 = vrot.slane %v3177_v0, %v11200_v21 }
 0x37c   : > { %v5807_v4 = vrot.slane %v5793_v26, %v14680_v48  ;;  %v5007_v13 = vpop.permute.xlu1 %5006  ;;  %8434 = vrot.lane.b32.xlu0 %v7941_v52, %s10409_s25  ;;  %v14726_v26 = vld [vmem:[#allocation19_spill] sm:$0xff]  ;;  %v5885_v60 = vrot.slane %v5877_v7, %v14680_v48  ;;  %v7953_v31 = vrot.slane %v7218_v6, %v11226_v62  ;;  %v7215_v22 = vrot.slane %v7187_v56, %v11200_v21 }
 0x37d   : > { %v764_v32 = vadd.f32 %v14726_v26, %v14691_v10  ;;  %v1365_v9 = vadd.f32 %v14689_v43, %v1190_v54  ;;  %v7276_v18 = vrot.slane %v12569_v41, %v11200_v21  ;;  %v5319_v0 = vsel %vm5246_vm3, %v3102_v27, %v5007_v13 }
 0x37e   : > { %v5808_v45 = vcombine.low %v5800_v53, %v5807_v4  ;;  %8432 = vrot.lane.b32.xlu1 %v7937_v55, %s10409_s25  ;;  %v12558_v25 = vpop.permute.xlu0 %5048  ;;  %v14727_v53 = vld [vmem:[#allocation81_spill] sm:$0xff]  ;;  %v3116_v55 = vrot.slane %v3094_v11, %v11200_v21  ;;  %v7965_v11 = vrot.slane %v7217_v19, %v11226_v62  ;;  %v3124_v7 = vcombine.high %v3102_v27, %v3102_v27 }
 0x37f   : > { %v1754_v4 = vadd.f32 %v14727_v53, %v10908_v47  ;;  %v3079_v47 = vcombine.high %v12519_v51, %v12519_v51  ;;  %v7266_v51 = vcombine.high %v12457_v15, %v12457_v15  ;;  %v7961_v54 = vrot.slane %v7215_v22, %v11226_v62 }
 0x380   : > { %6096 = vst.msk [vmem:[%s11658_s16 + $0x108] sm:$0xff] %vm423_vm1, %v5808_v45  ;;  %v5043_v36 = vpop.permute.xlu1 %5042  ;;  %8438 = vrot.lane.b32.xlu0 %v7949_v59, %s10409_s25  ;;  %v14728_v45 = vld [vmem:[#allocation122_spill] sm:$0xff]  ;;  %v5320_v30 = vsel %vm5246_vm3, %v3116_v55, %v12526_v24  ;;  %v3126_v56 = vcombine.high %v3116_v55, %v3116_v55  ;;  %v7269_v15 = vcombine.high %v12569_v41, %v12569_v41 }
 0x381   : > { %v5337_v17 = vsel %vm5246_vm3, %v3222_v8, %v5043_v36  ;;  %v2297_v59 = vadd.f32 %v14728_v45, %v1754_v4  ;;  %v3193_v8 = vcombine.high %v3191_v58, %v3191_v58  ;;  %v14729_v36 = vld [vmem:[#allocation40_spill] sm:$0xff]  ;;  %v7997_v4 = vrot.slane %v7266_v51, %v11226_v62 }
 0x382   : > { %v5878_v52 = vcombine.low %v5337_v17, %v5338_v16  ;;  %8436 = vrot.lane.b32.xlu1 %v7945_v12, %s10409_s25  ;;  %v5013_v40 = vpop.permute.xlu0 %5012  ;;  %v1188_v13 = vadd.f32 %v14729_v36, %v764_v32  ;;  %v5809_v12 = vcombine.low %v5319_v0, %v5320_v30  ;;  %v7219_v16 = vcombine.high %v7215_v22, %v7215_v22 }
 0x383   : > { %v2569_v17 = vadd.f32 %v12263_v23, %v1365_v9  ;;  %v5322_v24 = vsel %vm5246_vm3, %v3126_v56, %v5013_v40  ;;  %v7292_v32 = vrot.slane %v7276_v18, %v11200_v21  ;;  %v7284_v55 = vcombine.high %v7276_v18, %v7276_v18 }
 0x384   : > { %v5892_v10 = vrot.slane %v5878_v52, %v14680_v48  ;;  %v5047_v61 = vpop.permute.xlu1 %5046  ;;  %8442 = vrot.lane.b32.xlu0 %v7957_v50, %s10409_s25  ;;  %v14730_v52 = vld [vmem:[#allocation115_spill] sm:$0xff]  ;;  %v3221_v27 = vrot.slane %v3193_v8, %v11200_v21  ;;  %v3093_v41 = vrot.slane %v3079_v47, %v11200_v21  ;;  %v5817_v40 = vrot.slane %v5809_v12, %v14680_v48 }
 0x385   : > { %v2536_v50 = vadd.f32 %v14730_v52, %v2297_v59  ;;  %v7969_v22 = vrot.slane %v7219_v16, %v11226_v62  ;;  %v7268_v9 = vcombine.high %v12484_v20, %v12484_v20  ;;  %v12625_v18 = vmax.f32 %v2569_v17, 0.0 }
 0x386   : > { %v5893_v28 = vcombine.low %v5885_v60, %v5892_v10  ;;  %8440 = vrot.lane.b32.xlu1 %v7953_v31, %s10409_s25  ;;  %v12595_v39 = vpop.permute.xlu0 %5016  ;;  %v3207_v60 = vrot.slane %v3191_v58, %v11200_v21  ;;  %v1363_v0 = vadd.f32 %v14693_v49, %v1188_v13  ;;  %v7283_v58 = vrot.slane %v7269_v15, %v11200_v21 }
 0x387   : > { %v6150_v45 = vadd.f32 %v14713_v14, %v2536_v50  ;;  %v7314_v51 = vcombine.high %v7292_v32, %v7292_v32  ;;  %v5340_v20 = vsel %vm5246_vm3, %v3221_v27, %v12558_v25  ;;  %v3095_v30 = vcombine.high %v3093_v41, %v3093_v41 }
 0x388   : > { %6101 = vst.msk [vmem:[%s11658_s16 + $0x150] sm:$0xff] %vm423_vm1, %v5893_v28  ;;  %v5011_v6 = vpop.permute.xlu1 %5010  ;;  %8446 = vrot.lane.b32.xlu0 %v7965_v11, %s10409_s25  ;;  %v5339_v47 = vsel %vm5246_vm3, %v3207_v60, %v5047_v61  ;;  %v8005_v11 = vrot.slane %v7292_v32, %v11226_v62  ;;  %v3225_v8 = vcombine.high %v3221_v27, %v3221_v27 }
 0x389   : > { %v5321_v26 = vsel %vm5246_vm3, %v3124_v7, %v5011_v6  ;;  %v3223_v56 = vcombine.high %v3207_v60, %v3207_v60  ;;  %v5894_v7 = vcombine.low %v5339_v47, %v5340_v20  ;;  %v8001_v13 = vrot.slane %v7268_v9, %v11226_v62 }
 0x38a   : > { %v5810_v19 = vcombine.low %v5321_v26, %v5322_v24  ;;  %8444 = vrot.lane.b32.xlu1 %v7961_v54, %s10409_s25  ;;  %v5053_v53 = vpop.permute.xlu0 %5052  ;;  %v7306_v12 = vrot.slane %v7284_v55, %v11200_v21  ;;  %v2567_v6 = vadd.f32 %v12263_v23, %v1363_v0  ;;  %v6166_v25 = vmax.f32 %v6150_v45, 0.0 }
 0x38b   : > { %v5342_v54 = vsel %vm5246_vm3, %v3225_v8, %v5053_v53  ;;  %v8013_v24 = vrot.slane %v7314_v51, %v11226_v62  ;;  %v7299_v26 = vrot.slane %v7283_v58, %v11200_v21  ;;  %v7285_v32 = vcombine.high %v7283_v58, %v7283_v58 }
 0x38c   : > { %v5824_v10 = vrot.slane %v5810_v19, %v14680_v48  ;;  %v5015_v31 = vpop.permute.xlu1 %5014  ;;  %8462 = vrot.lane.b32.xlu0 %v7997_v4, %s10409_s25  ;;  %v3123_v52 = vrot.slane %v3095_v30, %v11200_v21  ;;  %v3109_v50 = vrot.slane %v3093_v41, %v11200_v21  ;;  %v3331_v19 = vrot.slane %v12625_v18, %v11200_v21  ;;  %v14732_v30 = vld [vmem:[#allocation123_spill] sm:$0xff] }
 0x38d   : > { %v5902_v53 = vrot.slane %v5894_v7, %v14680_v48  ;;  %v8009_v27 = vrot.slane %v7306_v12, %v11226_v62  ;;  %v7316_v60 = vcombine.high %v7306_v12, %v7306_v12  ;;  %v7325_v9 = vrot.slane %v6166_v25, %v11200_v21  ;;  %v14733_v12 = vld [vmem:[#allocation126_spill] sm:$0xff] }
 0x38e   : > { %v5825_v59 = vcombine.low %v5817_v40, %v5824_v10  ;;  %8448 = vrot.lane.b32.xlu1 %v7969_v22, %s10409_s25  ;;  %v12632_v28 = vpop.permute.xlu0 %5088  ;;  %v12656_v40 = vmax.f32 %v2567_v6, 0.0  ;;  %v14731_v10 = vld [vmem:[#allocation82_spill] sm:$0xff]  ;;  %v5323_v41 = vsel %vm5246_vm3, %v3109_v50, %v5015_v31  ;;  %v8021_v47 = vrot.slane %v7299_v26, %v11226_v62 }
 0x38f   : > { %v1755_v22 = vadd.f32 %v14731_v10, %v10920_v34  ;;  %v7315_v45 = vcombine.high %v7299_v26, %v7299_v26  ;;  %v3127_v51 = vcombine.high %v3123_v52, %v3123_v52  ;;  %v3125_v20 = vcombine.high %v3109_v50, %v3109_v50 }
 0x390   : > { %6097 = vst.msk [vmem:[%s11658_s16 + $0x110] sm:$0xff] %vm423_vm1, %v5825_v59  ;;  %v5051_v61 = vpop.permute.xlu1 %5050  ;;  %8466 = vrot.lane.b32.xlu0 %v8005_v11, %s10409_s25  ;;  %v5324_v59 = vsel %vm5246_vm3, %v3123_v52, %v12595_v39  ;;  %v3339_v11 = vcombine.high %v3331_v19, %v3331_v19  ;;  %v7313_v7 = vrot.slane %v7285_v32, %v11200_v21 }
 0x391   : > { %v5341_v16 = vsel %vm5246_vm3, %v3223_v56, %v5051_v61  ;;  %v2298_v34 = vadd.f32 %v14732_v30, %v1755_v22  ;;  %v5826_v8 = vcombine.low %v5323_v41, %v5324_v59  ;;  %v8017_v56 = vrot.slane %v7316_v60, %v11226_v62  ;;  %v14734_v60 = vld [vmem:[#allocation20_spill] sm:$0xff] }
 0x392   : > { %v5895_v17 = vcombine.low %v5341_v16, %v5342_v54  ;;  %8464 = vrot.lane.b32.xlu1 %v8001_v13, %s10409_s25  ;;  %v5021_v15 = vpop.permute.xlu0 %5020  ;;  %v7318_v61 = vcombine.high %v6166_v25, %v6166_v25  ;;  %v7333_v26 = vcombine.high %v7325_v9, %v7325_v9  ;;  %v3361_v52 = vrot.slane %v3339_v11, %v11200_v21 }
 0x393   : > { %v5326_v13 = vsel %vm5246_vm3, %v3127_v51, %v5021_v15  ;;  %v2537_v6 = vadd.f32 %v14733_v12, %v2298_v34  ;;  %v3347_v32 = vrot.slane %v3331_v19, %v11200_v21  ;;  %v3233_v25 = vrot.slane %v12656_v40, %v11200_v21 }
 0x394   : > { %v5909_v4 = vrot.slane %v5895_v17, %v14680_v48  ;;  %v5087_v55 = vpop.permute.xlu1 %5086  ;;  %8470 = vrot.lane.b32.xlu0 %v8013_v24, %s10409_s25  ;;  %v8029_v17 = vrot.slane %v7315_v45, %v11226_v62  ;;  %v7341_v24 = vrot.slane %v7325_v9, %v11200_v21  ;;  %v5834_v15 = vrot.slane %v5826_v8, %v14680_v48 }
 0x395   : > { %v775_v10 = vadd.f32 %v14734_v60, %v14697_v63  ;;  %v3324_v19 = vcombine.high %v12625_v18, %v12625_v18  ;;  %v7332_v22 = vrot.slane %v7318_v61, %v11200_v21  ;;  %v5359_v41 = vsel %vm5246_vm3, %v3347_v32, %v5087_v55 }
 0x396   : > { %v5910_v0 = vcombine.low %v5902_v53, %v5909_v4  ;;  %8468 = vrot.lane.b32.xlu1 %v8009_v27, %s10409_s25  ;;  %v12663_v58 = vpop.permute.xlu0 %5056  ;;  %v8025_v4 = vrot.slane %v7313_v7, %v11226_v62  ;;  %v7317_v27 = vcombine.high %v7313_v7, %v7313_v7  ;;  %v6151_v9 = vadd.f32 %v14713_v14, %v2537_v6 }
 0x397   : > { %v8037_v45 = vrot.slane %v7341_v24, %v11226_v62  ;;  %v7363_v59 = vcombine.high %v7341_v24, %v7341_v24  ;;  %v5360_v63 = vsel %vm5246_vm3, %v3361_v52, %v12632_v28  ;;  %v3241_v11 = vcombine.high %v3233_v25, %v3233_v25  ;;  %v14738_v24 = vld [vmem:[#allocation27_spill] sm:$0xff] }
 0x398   : > { %6102 = vst.msk [vmem:[%s11658_s16 + $0x158] sm:$0xff] %vm423_vm1, %v5910_v0  ;;  %v5019_v31 = vpop.permute.xlu1 %5018  ;;  %8474 = vrot.lane.b32.xlu0 %v8021_v47, %s10409_s25  ;;  %v3371_v51 = vcombine.high %v3361_v52, %v3361_v52  ;;  %v3369_v18 = vcombine.high %v3347_v32, %v3347_v32  ;;  %v5979_v55 = vcombine.low %v5359_v41, %v5360_v63  ;;  %v14739_v41 = vld [vmem:[#allocation118_spill] sm:$0xff] }
 0x399   : > { %v5325_v39 = vsel %vm5246_vm3, %v3125_v20, %v5019_v31  ;;  %v14735_v20 = vld [vmem:[#allocation21_spill] sm:$0xff]  ;;  %v8033_v8 = vrot.slane %v7317_v27, %v11226_v62  ;;  %v7355_v31 = vrot.slane %v7333_v26, %v11200_v21  ;;  %v3338_v61 = vrot.slane %v3324_v19, %v11200_v21 }
 0x39a   : > { %v5827_v54 = vcombine.low %v5325_v39, %v5326_v13  ;;  %8472 = vrot.lane.b32.xlu1 %v8017_v56, %s10409_s25  ;;  %v5093_v16 = vpop.permute.xlu0 %5092  ;;  %v767_v30 = vadd.f32 %v14735_v20, %v14702_v29  ;;  %v14736_v56 = vld [vmem:[#allocation42_spill] sm:$0xff]  ;;  %v6167_v39 = vmax.f32 %v6151_v9, 0.0  ;;  %v8045_v6 = vrot.slane %v7363_v59, %v11226_v62  ;;  %v14740_v20 = vld [vmem:[#allocation44_spill] sm:$0xff] }
 0x39b   : > { %v1191_v7 = vadd.f32 %v14736_v56, %v775_v10  ;;  %v5362_v28 = vsel %vm5246_vm3, %v3371_v51, %v5093_v16  ;;  %v3263_v52 = vrot.slane %v3241_v11, %v11200_v21  ;;  %v3249_v16 = vrot.slane %v3233_v25, %v11200_v21  ;;  %v14782_v56 = vld [vmem:[#allocation61_spill] sm:$0xff] }
 0x39c   : > { %v5841_v50 = vrot.slane %v5827_v54, %v14680_v48  ;;  %v5055_v53 = vpop.permute.xlu1 %5054  ;;  %8478 = vrot.lane.b32.xlu0 %v8029_v17, %s10409_s25  ;;  %v7348_v54 = vrot.slane %v7332_v22, %v11200_v21  ;;  %v14737_v17 = vld [vmem:[#allocation79_spill] sm:$0xff]  ;;  %v7334_v32 = vcombine.high %v7332_v22, %v7332_v22  ;;  %v8041_v27 = vrot.slane %v7355_v31, %v11226_v62 }
 0x39d   : > { %v1756_v26 = vadd.f32 %v14738_v24, %v14737_v17  ;;  %v7365_v60 = vcombine.high %v7355_v31, %v7355_v31  ;;  %v3226_v10 = vcombine.high %v12656_v40, %v12656_v40  ;;  %v1366_v19 = vadd.f32 %v14699_v57, %v1191_v7 }
 0x39e   : > { %v5842_v0 = vcombine.low %v5834_v15, %v5841_v50  ;;  %8476 = vrot.lane.b32.xlu1 %v8025_v4, %s10409_s25  ;;  %v12696_v47 = vpop.permute.xlu0 %5096  ;;  %v5987_v15 = vrot.slane %v5979_v55, %v14680_v48  ;;  %v5343_v25 = vsel %vm5246_vm3, %v3249_v16, %v5055_v53  ;;  %v7374_v22 = vrot.slane %v6167_v39, %v11200_v21 }
 0x39f   : > { %v2299_v9 = vadd.f32 %v14739_v41, %v1756_v26  ;;  %v8053_v59 = vrot.slane %v7348_v54, %v11226_v62  ;;  %v7364_v63 = vcombine.high %v7348_v54, %v7348_v54  ;;  %v5344_v40 = vsel %vm5246_vm3, %v3263_v52, %v12663_v58 }
 0x3a0   : > { %6098 = vst.msk [vmem:[%s11658_s16 + $0x118] sm:$0xff] %vm423_vm1, %v5842_v0  ;;  %v5091_v34 = vpop.permute.xlu1 %5090  ;;  %8482 = vrot.lane.b32.xlu0 %v8037_v45, %s10409_s25  ;;  %v3340_v11 = vcombine.high %v3338_v61, %v3338_v61  ;;  %v3273_v51 = vcombine.high %v3263_v52, %v3263_v52  ;;  %v1189_v55 = vadd.f32 %v14740_v20, %v767_v30 }
 0x3a1   : > { %v5361_v13 = vsel %vm5246_vm3, %v3369_v18, %v5091_v34  ;;  %v3271_v18 = vcombine.high %v3249_v16, %v3249_v16  ;;  %v5911_v34 = vcombine.low %v5343_v25, %v5344_v40  ;;  %v7362_v31 = vrot.slane %v7334_v32, %v11200_v21 }
 0x3a2   : > { %v5980_v29 = vcombine.low %v5361_v13, %v5362_v28  ;;  %8480 = vrot.lane.b32.xlu1 %v8033_v8, %s10409_s25  ;;  %v5061_v12 = vpop.permute.xlu0 %5060  ;;  %v8049_v8 = vrot.slane %v7365_v60, %v11226_v62  ;;  %v2570_v7 = vadd.f32 %v12263_v23, %v1366_v19  ;;  %v14741_v28 = vld [vmem:[#allocation114_spill] sm:$0xff]  ;;  %v7390_v30 = vrot.slane %v7374_v22, %v11200_v21 }
 0x3a3   : > { %v2538_v13 = vadd.f32 %v14741_v28, %v2299_v9  ;;  %v5346_v58 = vsel %vm5246_vm3, %v3273_v51, %v5061_v12  ;;  %v8061_v24 = vrot.slane %v7364_v63, %v11226_v62  ;;  %v7382_v26 = vcombine.high %v7374_v22, %v7374_v22 }
 0x3a4   : > { %v5994_v50 = vrot.slane %v5980_v29, %v14680_v48  ;;  %v5095_v4 = vpop.permute.xlu1 %5094  ;;  %8486 = vrot.lane.b32.xlu0 %v8045_v6, %s10409_s25  ;;  %v7367_v6 = vcombine.high %v6167_v39, %v6167_v39  ;;  %v3368_v52 = vrot.slane %v3340_v11, %v11200_v21  ;;  %v3354_v23 = vrot.slane %v3338_v61, %v11200_v21 }
 0x3a5   : > { %v3240_v16 = vrot.slane %v3226_v10, %v11200_v21  ;;  %v5919_v12 = vrot.slane %v5911_v34, %v14680_v48  ;;  %v1364_v60 = vadd.f32 %v14704_v5, %v1189_v55  ;;  %v6152_v19 = vadd.f32 %v14713_v14, %v2538_v13  ;;  %v10354_v55 = vld [vmem:[%s14456_s4] ss:$0 sm:$0xff] }
 0x3a6   : > { %v5995_v0 = vcombine.low %v5987_v15, %v5994_v50  ;;  %8484 = vrot.lane.b32.xlu1 %v8041_v27, %s10409_s25  ;;  %v12730_v45 = vpop.permute.xlu0 %5064  ;;  %v8057_v15 = vrot.slane %v7362_v31, %v11226_v62  ;;  %v7366_v50 = vcombine.high %v7362_v31, %v7362_v31  ;;  %v12755_v27 = vmax.f32 %v2570_v7, 0.0 }
 0x3a7   : > { %v5363_v61 = vsel %vm5246_vm3, %v3354_v23, %v5095_v4  ;;  %v7381_v10 = vrot.slane %v7367_v6, %v11200_v21  ;;  %v8069_v25 = vrot.slane %v7390_v30, %v11226_v62  ;;  %v7412_v22 = vcombine.high %v7390_v30, %v7390_v30 }
 0x3a8   : > { %6107 = vst.msk [vmem:[%s11658_s16 + $0x1c0] sm:$0xff] %vm423_vm1, %v5995_v0  ;;  %v5059_v53 = vpop.permute.xlu1 %5058  ;;  %8490 = vrot.lane.b32.xlu0 %v8053_v59, %s10409_s25  ;;  %v5364_v0 = vsel %vm5246_vm3, %v3368_v52, %v12696_v47  ;;  %v3242_v59 = vcombine.high %v3240_v16, %v3240_v16  ;;  %v3372_v63 = vcombine.high %v3368_v52, %v3368_v52 }
 0x3a9   : > { %v5345_v29 = vsel %vm5246_vm3, %v3271_v18, %v5059_v53  ;;  %v3370_v40 = vcombine.high %v3354_v23, %v3354_v23  ;;  %v5996_v11 = vcombine.low %v5363_v61, %v5364_v0  ;;  %v8065_v51 = vrot.slane %v7366_v50, %v11226_v62 }
 0x3aa   : > { %v5912_v54 = vcombine.low %v5345_v29, %v5346_v58  ;;  %8488 = vrot.lane.b32.xlu1 %v8049_v8, %s10409_s25  ;;  %v5101_v17 = vpop.permute.xlu0 %5100  ;;  %v7404_v18 = vrot.slane %v7382_v26, %v11200_v21  ;;  %v2568_v34 = vadd.f32 %v10354_v55, %v1364_v60  ;;  %v6168_v8 = vmax.f32 %v6152_v19, 0.0 }
 0x3ab   : > { %v5366_v47 = vsel %vm5246_vm3, %v3372_v63, %v5101_v17  ;;  %v8077_v28 = vrot.slane %v7412_v22, %v11226_v62  ;;  %v7397_v13 = vrot.slane %v7381_v10, %v11200_v21  ;;  %v7383_v58 = vcombine.high %v7381_v10, %v7381_v10 }
 0x3ac   : > { %v5926_v32 = vrot.slane %v5912_v54, %v14680_v48  ;;  %v5063_v39 = vpop.permute.xlu1 %5062  ;;  %8494 = vrot.lane.b32.xlu0 %v8061_v24, %s10409_s25  ;;  %v3270_v29 = vrot.slane %v3242_v59, %v11200_v21  ;;  %v3256_v6 = vrot.slane %v3240_v16, %v11200_v21  ;;  %v3380_v30 = vrot.slane %v12755_v27, %v11200_v21  ;;  %v14744_v59 = vld [vmem:[#allocation119_spill] sm:$0xff] }
 0x3ad   : > { %v6004_v54 = vrot.slane %v5996_v11, %v14680_v48  ;;  %v8073_v26 = vrot.slane %v7404_v18, %v11226_v62  ;;  %v7414_v52 = vcombine.high %v7404_v18, %v7404_v18  ;;  %v12788_v23 = vmax.f32 %v2568_v34, 0.0  ;;  %v14745_v34 = vld [vmem:[#allocation124_spill] sm:$0xff] }
 0x3ae   : > { %v5927_v41 = vcombine.low %v5919_v12, %v5926_v32  ;;  %8492 = vrot.lane.b32.xlu1 %v8057_v15, %s10409_s25  ;;  %v12762_v9 = vpop.permute.xlu0 %5104  ;;  %v14742_v12 = vld [vmem:[#allocation80_spill] sm:$0xff]  ;;  %v14743_v32 = vld [vmem:[#allocation30_spill] sm:$0xff]  ;;  %v5347_v16 = vsel %vm5246_vm3, %v3256_v6, %v5063_v39  ;;  %v7423_v50 = vrot.slane %v6168_v8, %v11200_v21  ;;  %v8085_v61 = vrot.slane %v7397_v13, %v11226_v62 }
 0x3af   : > { %v1757_v15 = vadd.f32 %v14743_v32, %v14742_v12  ;;  %v7413_v10 = vcombine.high %v7397_v13, %v7397_v13  ;;  %v3274_v22 = vcombine.high %v3270_v29, %v3270_v29  ;;  %v3272_v0 = vcombine.high %v3256_v6, %v3256_v6 }
 0x3b0   : > { %6103 = vst.msk [vmem:[%s11658_s16 + $0x180] sm:$0xff] %vm423_vm1, %v5927_v41  ;;  %v5099_v4 = vpop.permute.xlu1 %5098  ;;  %8498 = vrot.lane.b32.xlu0 %v8069_v25, %s10409_s25  ;;  %v5348_v41 = vsel %vm5246_vm3, %v3270_v29, %v12730_v45  ;;  %v3388_v25 = vcombine.high %v3380_v30, %v3380_v30  ;;  %v8081_v11 = vrot.slane %v7414_v52, %v11226_v62 }
 0x3b1   : > { %v5365_v53 = vsel %vm5246_vm3, %v3370_v40, %v5099_v4  ;;  %v2300_v63 = vadd.f32 %v14744_v59, %v1757_v15  ;;  %v5928_v40 = vcombine.low %v5347_v16, %v5348_v41  ;;  %v7411_v4 = vrot.slane %v7383_v58, %v11200_v21 }
 0x3b2   : > { %v5997_v31 = vcombine.low %v5365_v53, %v5366_v47  ;;  %8496 = vrot.lane.b32.xlu1 %v8065_v51, %s10409_s25  ;;  %v5069_v7 = vpop.permute.xlu0 %5068  ;;  %v7416_v51 = vcombine.high %v6168_v8, %v6168_v8  ;;  %v3282_v45 = vrot.slane %v12788_v23, %v11200_v21  ;;  %v7439_v13 = vrot.slane %v7423_v50, %v11200_v21 }
 0x3b3   : > { %v5350_v18 = vsel %vm5246_vm3, %v3274_v22, %v5069_v7  ;;  %v2539_v47 = vadd.f32 %v14745_v34, %v2300_v63  ;;  %v7431_v29 = vcombine.high %v7423_v50, %v7423_v50  ;;  %v3410_v8 = vrot.slane %v3388_v25, %v11200_v21 }
 0x3b4   : > { %v6011_v17 = vrot.slane %v5997_v31, %v14680_v48  ;;  %v5103_v24 = vpop.permute.xlu1 %5102  ;;  %8502 = vrot.lane.b32.xlu0 %v8077_v28, %s10409_s25  ;;  %v8093_v28 = vrot.slane %v7413_v10, %v11226_v62  ;;  %v3396_v7 = vrot.slane %v3380_v30, %v11200_v21  ;;  %v5936_v58 = vrot.slane %v5928_v40, %v14680_v48 }
 0x3b5   : > { %v3373_v52 = vcombine.high %v12755_v27, %v12755_v27  ;;  %v7430_v12 = vrot.slane %v7416_v51, %v11200_v21  ;;  %v3290_v15 = vcombine.high %v3282_v45, %v3282_v45  ;;  %v6153_v30 = vadd.f32 %v14713_v14, %v2539_v47 }
 0x3b6   : > { %v6012_v60 = vcombine.low %v6004_v54, %v6011_v17  ;;  %8500 = vrot.lane.b32.xlu1 %v8073_v26, %s10409_s25  ;;  %v12795_v19 = vpop.permute.xlu0 %5072  ;;  %v8089_v17 = vrot.slane %v7411_v4, %v11226_v62  ;;  %v7415_v26 = vcombine.high %v7411_v4, %v7411_v4  ;;  %v5367_v32 = vsel %vm5246_vm3, %v3396_v7, %v5103_v24 }
 0x3b7   : > { %v5368_v10 = vsel %vm5246_vm3, %v3410_v8, %v12762_v9  ;;  %v3420_v41 = vcombine.high %v3410_v8, %v3410_v8  ;;  %v3418_v27 = vcombine.high %v3396_v7, %v3396_v7  ;;  %v7453_v25 = vrot.slane %v7431_v29, %v11200_v21  ;;  %v14747_v8 = vld [vmem:[#allocation134_spill] sm:$0xff] }
 0x3b8   : > { %6108 = vst.msk [vmem:[%s11658_s16 + $0x1c8] sm:$0xff] %vm423_vm1, %v6012_v60  ;;  %v5067_v39 = vpop.permute.xlu1 %5066  ;;  %8506 = vrot.lane.b32.xlu0 %v8085_v61, %s10409_s25  ;;  %v8101_v60 = vrot.slane %v7439_v13, %v11226_v62  ;;  %v7461_v61 = vcombine.high %v7439_v13, %v7439_v13  ;;  %v6013_v22 = vcombine.low %v5367_v32, %v5368_v10 }
 0x3b9   : > { %v5349_v55 = vsel %vm5246_vm3, %v3272_v0, %v5067_v39  ;;  %v8097_v0 = vrot.slane %v7415_v26, %v11226_v62  ;;  %v3275_v59 = vcombine.high %v12788_v23, %v12788_v23  ;;  %v3298_v40 = vrot.slane %v3282_v45, %v11200_v21 }
 0x3ba   : > { %v5929_v53 = vcombine.low %v5349_v55, %v5350_v18  ;;  %8504 = vrot.lane.b32.xlu1 %v8081_v11, %s10409_s25  ;;  %v5109_v31 = vpop.permute.xlu0 %5108  ;;  %v6169_v39 = vmax.f32 %v6153_v30, 0.0  ;;  %v8109_v51 = vrot.slane %v7461_v61, %v11226_v62  ;;  %v7446_v18 = vrot.slane %v7430_v12, %v11200_v21  ;;  %v14746_v55 = vld [vmem:[#allocation91_spill] sm:$0xff] }
 0x3bb   : > { %v5370_v63 = vsel %vm5246_vm3, %v3420_v41, %v5109_v31  ;;  %v1758_v34 = vadd.f32 %v14746_v55, %v10932_v42  ;;  %v3312_v23 = vrot.slane %v3290_v15, %v11200_v21  ;;  %v3387_v47 = vrot.slane %v3373_v52, %v11200_v21  ;;  %v14748_v41 = vld [vmem:[#allocation127_spill] sm:$0xff] }
 0x3bc   : > { %v5943_v6 = vrot.slane %v5929_v53, %v14680_v48  ;;  %v5071_v54 = vpop.permute.xlu1 %5070  ;;  %8510 = vrot.lane.b32.xlu0 %v8093_v28, %s10409_s25  ;;  %v8105_v45 = vrot.slane %v7453_v25, %v11226_v62  ;;  %v6021_v53 = vrot.slane %v6013_v22, %v14680_v48  ;;  %v7463_v13 = vcombine.high %v7453_v25, %v7453_v25 }
 0x3bd   : > { %v7432_v29 = vcombine.high %v7430_v12, %v7430_v12  ;;  %v2301_v7 = vadd.f32 %v14747_v8, %v1758_v34  ;;  %v5351_v42 = vsel %vm5246_vm3, %v3298_v40, %v5071_v54  ;;  %v8117_v52 = vrot.slane %v7446_v18, %v11226_v62 }
 0x3be   : > { %v5944_v16 = vcombine.low %v5936_v58, %v5943_v6  ;;  %8508 = vrot.lane.b32.xlu1 %v8089_v17, %s10409_s25  ;;  %v12826_v50 = vpop.permute.xlu0 %5112  ;;  %v3289_v58 = vrot.slane %v3275_v59, %v11200_v21  ;;  %v7472_v6 = vrot.slane %v6169_v39, %v11200_v21  ;;  %v7462_v32 = vcombine.high %v7446_v18, %v7446_v18 }
 0x3bf   : > { %v5352_v15 = vsel %vm5246_vm3, %v3312_v23, %v12795_v19  ;;  %v3389_v12 = vcombine.high %v3387_v47, %v3387_v47  ;;  %v3322_v30 = vcombine.high %v3312_v23, %v3312_v23  ;;  %v8113_v61 = vrot.slane %v7463_v13, %v11226_v62 }
 0x3c0   : > { %6104 = vst.msk [vmem:[%s11658_s16 + $0x188] sm:$0xff] %vm423_vm1, %v5944_v16  ;;  %v5107_v24 = vpop.permute.xlu1 %5106  ;;  %8514 = vrot.lane.b32.xlu0 %v8101_v60, %s10409_s25  ;;  %v3320_v16 = vcombine.high %v3298_v40, %v3298_v40  ;;  %v5945_v60 = vcombine.low %v5351_v42, %v5352_v15  ;;  %v7460_v10 = vrot.slane %v7432_v29, %v11200_v21 }
 0x3c1   : > { %v5369_v9 = vsel %vm5246_vm3, %v3418_v27, %v5107_v24  ;;  %v2540_v27 = vadd.f32 %v14748_v41, %v2301_v7  ;;  %v3403_v22 = vrot.slane %v3387_v47, %v11200_v21  ;;  %v7465_v24 = vcombine.high %v6169_v39, %v6169_v39 }
 0x3c2   : > { %v6014_v11 = vcombine.low %v5369_v9, %v5370_v63  ;;  %8512 = vrot.lane.b32.xlu1 %v8097_v0, %s10409_s25  ;;  %v5077_v4 = vpop.permute.xlu0 %5076  ;;  %v7488_v0 = vrot.slane %v7472_v6, %v11200_v21  ;;  %v8125_v40 = vrot.slane %v7462_v32, %v11226_v62  ;;  %v7480_v9 = vcombine.high %v7472_v6, %v7472_v6 }
 0x3c3   : > { %v5354_v25 = vsel %vm5246_vm3, %v3322_v30, %v5077_v4  ;;  %v5953_v18 = vrot.slane %v5945_v60, %v14680_v48  ;;  %v8121_v39 = vrot.slane %v7460_v10, %v11226_v62  ;;  %v7464_v34 = vcombine.high %v7460_v10, %v7460_v10 }
 0x3c4   : > { %v6028_v31 = vrot.slane %v6014_v11, %v14680_v48  ;;  %v5111_v28 = vpop.permute.xlu1 %5110  ;;  %8518 = vrot.lane.b32.xlu0 %v8109_v51, %s10409_s25  ;;  %v3417_v11 = vrot.slane %v3389_v12, %v11200_v21  ;;  %v3291_v51 = vcombine.high %v3289_v58, %v3289_v58  ;;  %v6154_v23 = vadd.f32 %v14713_v14, %v2540_v27 }
 0x3c5   : > { %v5371_v47 = vsel %vm5246_vm3, %v3403_v22, %v5111_v28  ;;  %v8133_v8 = vrot.slane %v7488_v0, %v11226_v62  ;;  %v7510_v7 = vcombine.high %v7488_v0, %v7488_v0  ;;  %v7502_v28 = vrot.slane %v7480_v9, %v11200_v21 }
 0x3c6   : > { %v6029_v17 = vcombine.low %v6021_v53, %v6028_v31  ;;  %8516 = vrot.lane.b32.xlu1 %v8105_v45, %s10409_s25  ;;  %v12857_v26 = vpop.permute.xlu0 %5080  ;;  %v3305_v45 = vrot.slane %v3289_v58, %v11200_v21  ;;  %v3419_v53 = vcombine.high %v3403_v22, %v3403_v22  ;;  %v7479_v31 = vrot.slane %v7465_v24, %v11200_v21 }
 0x3c7   : > { %v5372_v42 = vsel %vm5246_vm3, %v3417_v11, %v12826_v50  ;;  %v3319_v6 = vrot.slane %v3291_v51, %v11200_v21  ;;  %v8129_v32 = vrot.slane %v7464_v34, %v11226_v62  ;;  %v6170_v15 = vmax.f32 %v6154_v23, 0.0  ;;  %v14750_v23 = vld [vmem:[#allocation135_spill] sm:$0xff] }
 0x3c8   : > { %6109 = vst.msk [vmem:[%s11658_s16 + $0x1d0] sm:$0xff] %vm423_vm1, %v6029_v17  ;;  %v5075_v54 = vpop.permute.xlu1 %5074  ;;  %8522 = vrot.lane.b32.xlu0 %v8117_v52, %s10409_s25  ;;  %v3421_v17 = vcombine.high %v3417_v11, %v3417_v11  ;;  %v6030_v58 = vcombine.low %v5371_v47, %v5372_v42  ;;  %v7495_v10 = vrot.slane %v7479_v31, %v11200_v21 }
 0x3c9   : > { %v5353_v19 = vsel %vm5246_vm3, %v3320_v16, %v5075_v54  ;;  %v3321_v54 = vcombine.high %v3305_v45, %v3305_v45  ;;  %v7481_v41 = vcombine.high %v7479_v31, %v7479_v31  ;;  %v5356_v27 = vsel %vm5246_vm3, %v3319_v6, %v12857_v26 }
 0x3ca   : > { %v5946_v59 = vcombine.low %v5353_v19, %v5354_v25  ;;  %8520 = vrot.lane.b32.xlu1 %v8113_v61, %s10409_s25  ;;  %v5117_v63 = vpop.permute.xlu0 %5116  ;;  %v8141_v61 = vrot.slane %v7510_v7, %v11226_v62  ;;  %v3323_v25 = vcombine.high %v3319_v6, %v3319_v6  ;;  %v8137_v22 = vrot.slane %v7502_v28, %v11226_v62 }
 0x3cb   : > { %v5374_v12 = vsel %vm5246_vm3, %v3421_v17, %v5117_v63  ;;  %v6038_v19 = vrot.slane %v6030_v58, %v14680_v48  ;;  %v7512_v63 = vcombine.high %v7502_v28, %v7502_v28  ;;  %v7521_v11 = vrot.slane %v6170_v15, %v11200_v21 }
 0x3cc   : > { %v5960_v4 = vrot.slane %v5946_v59, %v14680_v48  ;;  %v5079_v55 = vpop.permute.xlu1 %5078  ;;  %8526 = vrot.lane.b32.xlu0 %v8125_v40, %s10409_s25  ;;  %v14749_v40 = vld [vmem:[#allocation92_spill] sm:$0xff]  ;;  %v7511_v34 = vcombine.high %v7495_v10, %v7495_v10  ;;  %v7514_v42 = vcombine.high %v6170_v15, %v6170_v15 }
 0x3cd   : > { %v5355_v30 = vsel %vm5246_vm3, %v3305_v45, %v5079_v55  ;;  %v1759_v9 = vadd.f32 %v14749_v40, %v14681_v37  ;;  %v8145_v31 = vrot.slane %v7512_v63, %v11226_v62  ;;  %v7537_v58 = vrot.slane %v7521_v11, %v11200_v21 }
 0x3ce   : > { %v5961_v13 = vcombine.low %v5953_v18, %v5960_v4  ;;  %8524 = vrot.lane.b32.xlu1 %v8121_v39, %s10409_s25  ;;  %v12884_v29 = vpop.permute.xlu0 %8450  ;;  %v5962_v24 = vcombine.low %v5355_v30, %v5356_v27  ;;  %v8149_v39 = vrot.slane %v7495_v10, %v11226_v62  ;;  %v8157_v28 = vrot.slane %v7511_v34, %v11226_v62 }
 0x3cf   : > { %v2302_v47 = vadd.f32 %v14750_v23, %v1759_v9  ;;  %v7528_v15 = vrot.slane %v7514_v42, %v11200_v21 }
 0x3d0   : > { %6105 = vst.msk [vmem:[%s11658_s16 + $0x190] sm:$0xff] %vm423_vm1, %v5961_v13  ;;  %v5115_v52 = vpop.permute.xlu1 %5114  ;;  %8530 = vrot.lane.b32.xlu0 %v8133_v8, %s10409_s25  ;;  %v5970_v37 = vrot.slane %v5962_v24, %v14680_v48  ;;  %v7509_v13 = vrot.slane %v7481_v41, %v11200_v21  ;;  %v14751_v8 = vld [vmem:[#allocation138_spill] sm:$0xff]  ;;  %v14753_v24 = vld [vmem:[#allocation88_spill] sm:$0xff] }
 0x3d1   : > { %v5373_v50 = vsel %vm5246_vm3, %v3419_v53, %v5115_v52  ;;  %v2541_v7 = vadd.f32 %v14751_v8, %v2302_v47  ;;  %v7529_v52 = vcombine.high %v7521_v11, %v7521_v11  ;;  %v7530_v9 = vcombine.high %v7528_v15, %v7528_v15  ;;  %v14754_v11 = vld [vmem:[#allocation130_spill] sm:$0xff]  ;;  %v14756_v47 = vld [vmem:[#allocation125_spill] sm:$0xff] }
 0x3d2   : > { %v6031_v16 = vcombine.low %v5373_v50, %v5374_v12  ;;  %8528 = vrot.lane.b32.xlu1 %v8129_v32, %s10409_s25  ;;  %v5085_v60 = vpop.permute.xlu0 %5084  ;;  %v8153_v12 = vrot.slane %v7509_v13, %v11226_v62  ;;  %v7513_v30 = vcombine.high %v7509_v13, %v7509_v13 }
 0x3d3   : > { %v5358_v26 = vsel %vm5246_vm3, %v3323_v25, %v5085_v60  ;;  %v6155_v50 = vadd.f32 %v14713_v14, %v2541_v7  ;;  %v8165_v60 = vrot.slane %v7537_v58, %v11226_v62  ;;  %v7551_v41 = vrot.slane %v7529_v52, %v11200_v21 }
 0x3d4   : > { %v6045_v0 = vrot.slane %v6031_v16, %v14680_v48  ;;  %v5083_v59 = vpop.permute.xlu1 %5082  ;;  %8534 = vrot.lane.b32.xlu0 %v8141_v61, %s10409_s25  ;;  %v8161_v10 = vrot.slane %v7513_v30, %v11226_v62  ;;  %v7558_v23 = vrot.slane %v7530_v9, %v11200_v21 }
 0x3d5   : > { %v5357_v51 = vsel %vm5246_vm3, %v3321_v54, %v5083_v59  ;;  %v7559_v54 = vcombine.high %v7537_v58, %v7537_v58  ;;  %v6171_v27 = vmax.f32 %v6155_v50, 0.0  ;;  %v8169_v63 = vrot.slane %v7551_v41, %v11226_v62 }
 0x3d6   : > { %v6046_v18 = vcombine.low %v6038_v19, %v6045_v0  ;;  %v5963_v4 = vcombine.low %v5357_v51, %v5358_v26  ;;  %8532 = vrot.lane.b32.xlu1 %v8137_v22, %s10409_s25  ;;  %v12913_v55 = vpop.permute.xlu0 %8418  ;;  %v7544_v19 = vrot.slane %v7528_v15, %v11200_v21  ;;  %v1760_v0 = vadd.f32 %v10926_v38, %v14753_v24 }
 0x3d7   : > { %v8173_v22 = vrot.slane %v7559_v54, %v11226_v62  ;;  %v7561_v40 = vcombine.high %v7551_v41, %v7551_v41  ;;  %v7570_v51 = vrot.slane %v6171_v27, %v11200_v21 }
 0x3d8   : > { %6110 = vst.msk [vmem:[%s11658_s16 + $0x1d8] sm:$0xff] %vm423_vm1, %v6046_v18  ;;  %v5977_v45 = vrot.slane %v5963_v4, %v14680_v48  ;;  %v12921_v53 = vpop.permute.xlu1 %8452  ;;  %8538 = vrot.lane.b32.xlu0 %v8149_v39, %s10409_s25  ;;  %v2303_v26 = vadd.f32 %v14754_v11, %v1760_v0  ;;  %v8181_v4 = vrot.slane %v7544_v19, %v11226_v62 }
 0x3d9   : > { %v7560_v39 = vcombine.high %v7544_v19, %v7544_v19  ;;  %v8177_v34 = vrot.slane %v7561_v40, %v11226_v62  ;;  %v7578_v7 = vcombine.high %v7570_v51, %v7570_v51  ;;  %v14759_v40 = vld [vmem:[#allocation89_spill] sm:$0xff] }
 0x3da   : > { %v5978_v6 = vcombine.low %v5970_v37, %v5977_v45  ;;  %8536 = vrot.lane.b32.xlu1 %v8145_v31, %s10409_s25  ;;  %v12928_v17 = vpop.permute.xlu0 %8454  ;;  %v2542_v37 = vadd.f32 %v14756_v47, %v2303_v26  ;;  %v7563_v45 = vcombine.high %v6171_v27, %v6171_v27  ;;  %v7586_v31 = vrot.slane %v7570_v51, %v11200_v21 }
 0x3db   : > { %v8189_v8 = vrot.slane %v7560_v39, %v11226_v62  ;;  %v7600_v54 = vrot.slane %v7578_v7, %v11200_v21  ;;  %v1761_v9 = vadd.f32 %v14675_v35, %v14759_v40  ;;  %v14761_v39 = vld [vmem:[#allocation131_spill] sm:$0xff] }
 0x3dc   : > { %6106 = vst.msk [vmem:[%s11658_s16 + $0x198] sm:$0xff] %vm423_vm1, %v5978_v6  ;;  %v12934_v32 = vpop.permute.xlu1 %8420  ;;  %8542 = vrot.lane.b32.xlu0 %v8157_v28, %s10409_s25  ;;  %v8185_v6 = vrot.slane %v7558_v23, %v11226_v62  ;;  %v7562_v28 = vcombine.high %v7558_v23, %v7558_v23  ;;  %v6156_v58 = vadd.f32 %v14713_v14, %v2542_v37 }
 0x3dd   : > { %v7577_v52 = vrot.slane %v7563_v45, %v11200_v21  ;;  %v8197_v30 = vrot.slane %v7586_v31, %v11226_v62  ;;  %v7608_v15 = vcombine.high %v7586_v31, %v7586_v31  ;;  %v8201_v0 = vrot.slane %v7600_v54, %v11226_v62  ;;  %v14762_v45 = vld [vmem:[#allocation136_spill] sm:$0xff] }
 0x3de   : > { %8540 = vrot.lane.b32.xlu1 %v8153_v12, %s10409_s25  ;;  %v12941_v16 = vpop.permute.xlu0 %8458 }
 0x3df   : > { %14752 = vst [vmem:[#allocation9_spill] sm:$0xff] %v12941_v16  ;;  %v8205_v27 = vrot.slane %v7608_v15, %v11226_v62  ;;  %v7579_v19 = vcombine.high %v7577_v52, %v7577_v52  ;;  %v14765_v15 = vld [vmem:[#allocation52_spill] sm:$0xff] }
 0x3e0   : > { %v12944_v61 = vpop.permute.xlu1 %8456  ;;  %8546 = vrot.lane.b32.xlu0 %v8165_v60, %s10409_s25  ;;  %v8193_v60 = vrot.slane %v7562_v28, %v11226_v62 }
 0x3e1   : > { %v7607_v37 = vrot.slane %v7579_v19, %v11200_v21  ;;  %v14769_v19 = vld [vmem:[#allocation55_spill] sm:$0xff] }
 0x3e2   : > { %8544 = vrot.lane.b32.xlu1 %v8161_v10, %s10409_s25  ;;  %v12950_v25 = vpop.permute.xlu0 %8422  ;;  %v6172_v10 = vmax.f32 %v6156_v58, 0.0 }
 0x3e4   : > { %v12956_v59 = vpop.permute.xlu1 %8460  ;;  %8550 = vrot.lane.b32.xlu0 %v8173_v22, %s10409_s25  ;;  %v7593_v22 = vrot.slane %v7577_v52, %v11200_v21  ;;  %v7619_v11 = vrot.slane %v6172_v10, %v11200_v21  ;;  %v7612_v35 = vcombine.high %v6172_v10, %v6172_v10  ;;  %v8217_v52 = vrot.slane %v7607_v37, %v11226_v62  ;;  %v14767_v10 = vld [vmem:[#allocation23_spill] sm:$0xff] }
 0x3e6   : > { %8548 = vrot.lane.b32.xlu1 %v8169_v63, %s10409_s25  ;;  %v12963_v18 = vpop.permute.xlu0 %8426  ;;  %v7610_v63 = vcombine.high %v7600_v54, %v7600_v54  ;;  %v8213_v51 = vrot.slane %v7593_v22, %v11226_v62  ;;  %v7627_v28 = vcombine.high %v7619_v11, %v7619_v11  ;;  %v7626_v40 = vrot.slane %v7612_v35, %v11200_v21  ;;  %v14779_v35 = vld [vmem:[#allocation29_spill] sm:$0xff] }
 0x3e7   : > { %14755 = vst [vmem:[#allocation35_spill] sm:$0xff] %v12963_v18 }
 0x3e8   : > { %v12966_v38 = vpop.permute.xlu1 %8424  ;;  %8554 = vrot.lane.b32.xlu0 %v8181_v4, %s10409_s25  ;;  %v7609_v4 = vcombine.high %v7593_v22, %v7593_v22  ;;  %v8209_v47 = vrot.slane %v7610_v63, %v11226_v62 }
 0x3ea   : > { %8552 = vrot.lane.b32.xlu1 %v8177_v34, %s10409_s25  ;;  %v12974_v13 = vpop.permute.xlu0 %8430  ;;  %v2304_v34 = vadd.f32 %v14761_v39, %v1761_v9  ;;  %v8221_v7 = vrot.slane %v7609_v4, %v11226_v62  ;;  %v14772_v39 = vld [vmem:[#allocation56_spill] sm:$0xff] }
 0x3ec   : > { %v12977_v42 = vpop.permute.xlu1 %8428  ;;  %8558 = vrot.lane.b32.xlu0 %v8189_v8, %s10409_s25  ;;  %v2543_v31 = vadd.f32 %v14762_v45, %v2304_v34  ;;  %v14773_v34 = vld [vmem:[#allocation26_spill] sm:$0xff]  ;;  %v14775_v45 = vld [vmem:[#allocation57_spill] sm:$0xff] }
 0x3ee   : > { %8556 = vrot.lane.b32.xlu1 %v8185_v6, %s10409_s25  ;;  %v12984_v12 = vpop.permute.xlu0 %8434  ;;  %v7635_v6 = vrot.slane %v7619_v11, %v11200_v21  ;;  %v6157_v9 = vadd.f32 %v14713_v14, %v2543_v31  ;;  %v14780_v31 = vld [vmem:[#allocation60_spill] sm:$0xff] }
 0x3ef   : > { %14757 = vst [vmem:[#allocation87_spill] sm:$0xff] %v12984_v12 }
 0x3f0   : > { %v12987_v50 = vpop.permute.xlu1 %8432  ;;  %8562 = vrot.lane.b32.xlu0 %v8197_v30, %s10409_s25  ;;  %v7611_v30 = vcombine.high %v7607_v37, %v7607_v37  ;;  %v7657_v4 = vcombine.high %v7635_v6, %v7635_v6  ;;  %v14774_v37 = vld [vmem:[#allocation25_spill] sm:$0xff] }
 0x3f2   : > { %8560 = vrot.lane.b32.xlu1 %v8193_v60, %s10409_s25  ;;  %v12993_v41 = vpop.permute.xlu0 %8438  ;;  %v14766_v60 = vld [vmem:[#allocation22_spill] sm:$0xff] }
 0x3f3   : > { %14758 = vst [vmem:[#allocation4_spill] sm:$0xff] %v12993_v41  ;;  %v1449_v54 = vadd.f32 %v14766_v60, %v14765_v15  ;;  %v14776_v15 = vld [vmem:[#allocation28_spill] sm:$0xff]  ;;  %v14777_v60 = vld [vmem:[#allocation58_spill] sm:$0xff] }
 0x3f4   : > { %v12997_v24 = vpop.permute.xlu1 %8436  ;;  %8566 = vrot.lane.b32.xlu0 %v8205_v27, %s10409_s25  ;;  %v14768_v27 = vld [vmem:[#allocation54_spill] sm:$0xff] }
 0x3f5   : > { %v1447_v22 = vadd.f32 %v14768_v27, %v14767_v10  ;;  %v1451_v10 = vadd.f32 %v14777_v60, %v14776_v15  ;;  %v14778_v27 = vld [vmem:[#allocation59_spill] sm:$0xff]  ;;  %v14786_v60 = vld [vmem:[#allocation65_spill] sm:$0xff] }
 0x3f6   : > { %8564 = vrot.lane.b32.xlu1 %v8201_v0, %s10409_s25  ;;  %v13005_v26 = vpop.permute.xlu0 %8442  ;;  %v14770_v0 = vld [vmem:[#allocation24_spill] sm:$0xff] }
 0x3f7   : > { %14760 = vst [vmem:[#allocation49_spill] sm:$0xff] %v13005_v26  ;;  %v1450_v63 = vadd.f32 %v14770_v0, %v14769_v19  ;;  %v1454_v19 = vadd.f32 %v14779_v35, %v14778_v27  ;;  %v14781_v0 = vld [vmem:[#allocation31_spill] sm:$0xff]  ;;  %v14787_v27 = vld [vmem:[#allocation68_spill] sm:$0xff] }
 0x3f8   : > { %v13009_v23 = vpop.permute.xlu1 %8440  ;;  %8570 = vrot.lane.b32.xlu0 %v8213_v51, %s10409_s25  ;;  %v8229_v51 = vrot.slane %v7635_v6, %v11226_v62  ;;  %v1452_v46 = vadd.f32 %v14782_v56, %v14781_v0  ;;  %v8225_v6 = vrot.slane %v7611_v30, %v11226_v62  ;;  %v1992_v35 = vadd.f32 %v14787_v27, %v1449_v54  ;;  %v14788_v56 = vld [vmem:[#allocation66_spill] sm:$0xff] }
 0x3f9   : > { %v6173_v0 = vmax.f32 %v6157_v9, 0.0  ;;  %v14794_v27 = vld [vmem:[#allocation102_spill] sm:$0xff] }
 0x3fa   : > { %8568 = vrot.lane.b32.xlu1 %v8209_v47, %s10409_s25  ;;  %v13016_v8 = vpop.permute.xlu0 %8446  ;;  %v1453_v47 = vadd.f32 %v14773_v34, %v14772_v39  ;;  %v7649_v39 = vrot.slane %v7627_v28, %v11200_v21  ;;  %v14784_v34 = vld [vmem:[#allocation62_spill] sm:$0xff]  ;;  %v8237_v28 = vrot.slane %v7657_v4, %v11226_v62 }
 0x3fb   : > { %14763 = vst [vmem:[#allocation3_spill] sm:$0xff] %v13016_v8 }
 0x3fc   : > { %v13020_v58 = vpop.permute.xlu1 %8444  ;;  %8574 = vrot.lane.b32.xlu0 %v8221_v7, %s10409_s25  ;;  %v1448_v7 = vadd.f32 %v14775_v45, %v14774_v37  ;;  %v1455_v37 = vadd.f32 %v14784_v34, %v14710_v3  ;;  %v14785_v45 = vld [vmem:[#allocation63_spill] sm:$0xff]  ;;  %v7642_v3 = vrot.slane %v7626_v40, %v11200_v21  ;;  %v7659_v4 = vcombine.high %v7649_v39, %v7649_v39 }
 0x3fd   : > { %14764 = vst [vmem:[#allocation37_spill] sm:$0xff] %v13020_v58  ;;  %v1458_v15 = vadd.f32 %v14717_v33, %v14785_v45  ;;  %v14791_v33 = vld [vmem:[#allocation75_spill] sm:$0xff] }
 0x3fe   : > { %8572 = vrot.lane.b32.xlu1 %v8217_v52, %s10409_s25  ;;  %v13033_v11 = vpop.permute.xlu0 %8462  ;;  %v1457_v52 = vadd.f32 %v14707_v2, %v14780_v31  ;;  %v1456_v2 = vadd.f32 %v14786_v60, %v14719_v1  ;;  %v1459_v31 = vadd.f32 %v14788_v56, %v14729_v36  ;;  %v1993_v45 = vadd.f32 %v14791_v33, %v1450_v63  ;;  %v14793_v60 = vld [vmem:[#allocation108_spill] sm:$0xff]  ;;  %v14798_v63 = vld [vmem:[#allocation109_spill] sm:$0xff] }
 0x3ff   : > { %14771 = vst [vmem:[#allocation90_spill] sm:$0xff] %v13033_v11  ;;  %v14792_v11 = vld [vmem:[#allocation76_spill] sm:$0xff]  ;;  %v2231_v54 = vadd.f32 %v14793_v60, %v1992_v35  ;;  %v1762_v36 = vadd.f32 %v14794_v27, %v14693_v49  ;;  %v7628_v56 = vcombine.high %v7626_v40, %v7626_v40  ;;  %v7668_v33 = vrot.slane %v6173_v0, %v11200_v21  ;;  %v14800_v49 = vld [vmem:[#allocation146_spill] sm:$0xff]  ;;  %v14802_v27 = vld [vmem:[#allocation83_spill] sm:$0xff] }
 0x400   : > { %v13048_v20 = vpop.permute.xlu1 %8448  ;;  %8578 = vrot.lane.b32.xlu0 %v8229_v51, %s10409_s25  ;;  %v14790_v51 = vld [vmem:[#allocation70_spill] sm:$0xff]  ;;  %v1996_v1 = vadd.f32 %v14792_v11, %v1453_v47  ;;  %v2232_v11 = vadd.f32 %v14798_v63, %v1993_v45  ;;  %v14799_v47 = vld [vmem:[#allocation111_spill] sm:$0xff]  ;;  %v7658_v40 = vcombine.high %v7642_v3, %v7642_v3  ;;  %v14805_v63 = vld [vmem:[#allocation85_spill] sm:$0xff] }
 0x401   : > { %14783 = vst [vmem:[#allocation10_spill] sm:$0xff] %v13048_v20  ;;  %v1990_v34 = vadd.f32 %v14790_v51, %v1447_v22  ;;  %v14797_v22 = vld [vmem:[#allocation78_spill] sm:$0xff]  ;;  %v2305_v60 = vadd.f32 %v14800_v49, %v1762_v36  ;;  %v6113_v45 = vadd.f32 %v10999_v44, %v2231_v54 }
 0x402   : > { %8576 = vrot.lane.b32.xlu1 %v8225_v6, %s10409_s25  ;;  %v13063_v30 = vpop.permute.xlu0 %8466  ;;  %v8233_v6 = vrot.slane %v7649_v39, %v11226_v62  ;;  %v13079_v51 = vadd.f32 %v14797_v22, %v1451_v10  ;;  %v8245_v39 = vrot.slane %v7642_v3, %v11226_v62  ;;  %v14804_v22 = vld [vmem:[#allocation112_spill] sm:$0xff]  ;;  %v14806_v36 = vld [vmem:[#allocation86_spill] sm:$0xff]  ;;  %v8241_v3 = vrot.slane %v7659_v4, %v11226_v62 }
 0x403   : > { %14789 = vst [vmem:[#allocation11_spill] sm:$0xff] %v13063_v30  ;;  %v14796_v30 = vld [vmem:[#allocation77_spill] sm:$0xff]  ;;  %v2229_v35 = vadd.f32 %v14799_v47, %v1990_v34  ;;  %v13096_v47 = vadd.f32 %v14805_v63, %v1452_v46  ;;  %v13099_v49 = vadd.f32 %v14806_v36, %v1455_v37  ;;  %v6114_v54 = vadd.f32 %v10999_v44, %v2232_v11  ;;  %v14809_v46 = vld [vmem:[#allocation116_spill] sm:$0xff]  ;;  %v14810_v63 = vld [vmem:[#allocation139_spill] sm:$0xff] }
 0x404   : > { %v13073_v9 = vpop.permute.xlu1 %8464  ;;  %8582 = vrot.lane.b32.xlu0 %v8237_v28, %s10409_s25  ;;  %v1991_v26 = vadd.f32 %v14796_v30, %v1448_v7  ;;  %v1997_v7 = vadd.f32 %v14802_v27, %v1454_v19  ;;  %v14803_v30 = vld [vmem:[#allocation84_spill] sm:$0xff]  ;;  %v7656_v19 = vrot.slane %v7628_v56, %v11200_v21  ;;  %v7684_v37 = vrot.slane %v7668_v33, %v11200_v21  ;;  %v14812_v56 = vld [vmem:[#allocation95_spill] sm:$0xff] }
 0x405   : > { %14795 = vst [vmem:[#allocation48_spill] sm:$0xff] %v13073_v9  ;;  %v13091_v10 = vadd.f32 %v14803_v30, %v1457_v52  ;;  %v14808_v52 = vld [vmem:[#allocation93_spill] sm:$0xff]  ;;  %v2235_v30 = vadd.f32 %v14809_v46, %v1996_v1  ;;  %v2544_v36 = vadd.f32 %v14810_v63, %v2305_v60  ;;  %v8253_v4 = vrot.slane %v7658_v40, %v11226_v62  ;;  %v14817_v63 = vld [vmem:[#allocation99_spill] sm:$0xff] }
 0x406   : > { %8580 = vrot.lane.b32.xlu1 %v8233_v6, %s10409_s25  ;;  %v13086_v28 = vpop.permute.xlu0 %8470  ;;  %v2230_v34 = vadd.f32 %v14804_v22, %v1991_v26  ;;  %v13107_v27 = vadd.f32 %v14808_v52, %v1458_v15  ;;  %v6111_v26 = vadd.f32 %v10999_v44, %v2229_v35  ;;  %v7661_v22 = vcombine.high %v6173_v0, %v6173_v0  ;;  %v14813_v52 = vld [vmem:[#allocation96_spill] sm:$0xff]  ;;  %v14815_v1 = vld [vmem:[#allocation117_spill] sm:$0xff] }
 0x407   : > { %14801 = vst [vmem:[#allocation39_spill] sm:$0xff] %v13086_v28  ;;  %v13119_v15 = vadd.f32 %v14812_v56, %v1456_v2  ;;  %v13122_v11 = vadd.f32 %v14813_v52, %v1459_v31  ;;  %v13124_v35 = vmax.f32 %v6113_v45, 0.0  ;;  %v2236_v46 = vadd.f32 %v14815_v1, %v1997_v7  ;;  %v14819_v52 = vld [vmem:[#allocation100_spill] sm:$0xff]  ;;  %v14832_v9 = vld [vmem:[#allocation137_spill] sm:$0xff] }
 0x408   : > { %v13101_v6 = vpop.permute.xlu1 %8468  ;;  %8586 = vrot.lane.b32.xlu0 %v8245_v39, %s10409_s25  ;;  %v6112_v0 = vadd.f32 %v10999_v44, %v2230_v34  ;;  %v7660_v40 = vcombine.high %v7656_v19, %v7656_v19  ;;  %v1764_v2 = vadd.f32 %v14689_v43, %v14817_v63  ;;  %v13134_v56 = vmax.f32 %v6114_v54, 0.0  ;;  %v14820_v54 = vld [vmem:[#allocation103_spill] sm:$0xff] }
 0x409   : > { %14807 = vst [vmem:[#allocation97_spill] sm:$0xff] %v13101_v6  ;;  %14814 = vst [vmem:[#allocation50_spill] sm:$0xff] %v13122_v11  ;;  %v7676_v6 = vcombine.high %v7668_v33, %v7668_v33  ;;  %v13136_v31 = vmax.f32 %v6111_v26, 0.0  ;;  %v6117_v45 = vadd.f32 %v10999_v44, %v2235_v30  ;;  %v7675_v34 = vrot.slane %v7661_v22, %v11200_v21  ;;  %v14823_v30 = vld [vmem:[#allocation120_spill] sm:$0xff]  ;;  %v14824_v11 = vld [vmem:[#allocation142_spill] sm:$0xff] }
 0x40a   : > { %8584 = vrot.lane.b32.xlu1 %v8241_v3, %s10409_s25  ;;  %v13115_v39 = vpop.permute.xlu0 %8474  ;;  %v8249_v3 = vrot.slane %v7656_v19, %v11226_v62  ;;  %v6158_v33 = vadd.f32 %v14713_v14, %v2544_v36  ;;  %v7706_v19 = vcombine.high %v7684_v37, %v7684_v37  ;;  %v1765_v43 = vadd.f32 %v14699_v57, %v14819_v52 }
 0x40b   : > { %14811 = vst [vmem:[#allocation6_spill] sm:$0xff] %v13115_v39  ;;  %v1763_v26 = vadd.f32 %v14820_v54, %v14704_v5  ;;  %v13151_v1 = vmax.f32 %v6112_v0, 0.0  ;;  %v13155_v22 = vrot.slane %v13124_v35, %v11200_v21  ;;  %v6118_v36 = vadd.f32 %v10999_v44, %v2236_v46 }
 0x40c   : > { %v13128_v60 = vpop.permute.xlu1 %8472  ;;  %8590 = vrot.lane.b32.xlu0 %v8253_v4, %s10409_s25  ;;  %v8261_v4 = vrot.slane %v7684_v37, %v11226_v62  ;;  %v8257_v57 = vrot.slane %v7660_v40, %v11226_v62  ;;  %v7698_v37 = vrot.slane %v7676_v6, %v11200_v21  ;;  %v13167_v0 = vrot.slane %v13134_v56, %v11200_v21 }
 0x40d   : > { %14816 = vst [vmem:[#allocation41_spill] sm:$0xff] %v13128_v60  ;;  %v13171_v52 = vmax.f32 %v6117_v45, 0.0  ;;  %v13175_v46 = vrot.slane %v13136_v31, %v11200_v21  ;;  %v8269_v40 = vrot.slane %v7706_v19, %v11226_v62  ;;  %v7691_v54 = vrot.slane %v7675_v34, %v11200_v21 }
 0x40e   : > { %8588 = vrot.lane.b32.xlu1 %v8249_v3, %s10409_s25  ;;  %v13142_v7 = vpop.permute.xlu0 %8478  ;;  %v13186_v45 = vrot.slane %v13151_v1, %v11200_v21  ;;  %v2233_v63 = vadd.f32 %v14823_v30, %v13079_v51  ;;  %v13191_v39 = vmax.f32 %v6118_v36, 0.0  ;;  %v8265_v19 = vrot.slane %v7698_v37, %v11226_v62  ;;  %v14827_v51 = vld [vmem:[#allocation128_spill] sm:$0xff]  ;;  %v14829_v36 = vld [vmem:[#allocation147_spill] sm:$0xff] }
 0x40f   : > { %14818 = vst [vmem:[#allocation12_spill] sm:$0xff] %v13142_v7  ;;  %v14826_v7 = vld [vmem:[#allocation121_spill] sm:$0xff]  ;;  %v2239_v30 = vadd.f32 %v14827_v51, %v13091_v10  ;;  %v7707_v60 = vcombine.high %v7691_v54, %v7691_v54  ;;  %v14833_v51 = vld [vmem:[#allocation148_spill] sm:$0xff] }
 0x410   : > { %v13158_v3 = vpop.permute.xlu1 %8476  ;;  %8594 = vrot.lane.b32.xlu0 %v8261_v4, %s10409_s25  ;;  %v6174_v4 = vmax.f32 %v6158_v33, 0.0  ;;  %v2307_v33 = vadd.f32 %v14824_v11, %v1764_v2  ;;  %v2234_v28 = vadd.f32 %v14826_v7, %v13096_v47  ;;  %v14828_v11 = vld [vmem:[#allocation143_spill] sm:$0xff]  ;;  %v6115_v5 = vadd.f32 %v10999_v44, %v2233_v63  ;;  %v14831_v47 = vld [vmem:[#allocation129_spill] sm:$0xff] }
 0x411   : > { %14821 = vst [vmem:[#allocation51_spill] sm:$0xff] %v13158_v3  ;;  %v7708_v3 = vcombine.high %v7698_v37, %v7698_v37  ;;  %v2308_v2 = vadd.f32 %v14828_v11, %v1765_v43  ;;  %v8277_v37 = vrot.slane %v7691_v54, %v11226_v62  ;;  %v2240_v7 = vadd.f32 %v14831_v47, %v13107_v27  ;;  %v14837_v47 = vld [vmem:[#allocation133_spill] sm:$0xff] }
 0x412   : > { %8592 = vrot.lane.b32.xlu1 %v8257_v57, %s10409_s25  ;;  %v13178_v6 = vpop.permute.xlu0 %8482  ;;  %v7677_v57 = vcombine.high %v7675_v34, %v7675_v34  ;;  %v7717_v34 = vrot.slane %v6174_v4, %v11200_v21  ;;  %v2546_v10 = vadd.f32 %v14832_v9, %v2307_v33  ;;  %v13217_v11 = vrot.slane %v13171_v52, %v11200_v21  ;;  %v14836_v33 = vld [vmem:[#allocation132_spill] sm:$0xff] }
 0x413   : > { %14822 = vst [vmem:[#allocation7_spill] sm:$0xff] %v13178_v6  ;;  %v2547_v43 = vadd.f32 %v14833_v51, %v2308_v2  ;;  %v8273_v54 = vrot.slane %v7708_v3, %v11226_v62  ;;  %v6116_v9 = vadd.f32 %v10999_v44, %v2234_v28  ;;  %v2237_v2 = vadd.f32 %v14836_v33, %v13099_v49 }
 0x414   : > { %v13193_v6 = vpop.permute.xlu1 %8480  ;;  %8598 = vrot.lane.b32.xlu0 %v8269_v40, %s10409_s25  ;;  %v7705_v63 = vrot.slane %v7677_v57, %v11200_v21  ;;  %v2238_v51 = vadd.f32 %v14837_v47, %v13119_v15  ;;  %v8285_v3 = vrot.slane %v7707_v60, %v11226_v62  ;;  %v7733_v57 = vrot.slane %v7717_v34, %v11200_v21 }
 0x415   : > { %14825 = vst [vmem:[#allocation13_spill] sm:$0xff] %v13193_v6  ;;  %v2306_v6 = vadd.f32 %v14829_v36, %v1763_v26  ;;  %v14834_v26 = vld [vmem:[#allocation149_spill] sm:$0xff]  ;;  %v13238_v27 = vmax.f32 %v6115_v5, 0.0  ;;  %v6122_v28 = vadd.f32 %v10999_v44, %v2240_v7  ;;  %v6160_v49 = vadd.f32 %v14713_v14, %v2546_v10 }
 0x416   : > { %8596 = vrot.lane.b32.xlu1 %v8265_v19, %s10409_s25  ;;  %v13207_v40 = vpop.permute.xlu0 %8486  ;;  %v6161_v33 = vadd.f32 %v14713_v14, %v2547_v43  ;;  %v7725_v15 = vcombine.high %v7717_v34, %v7717_v34  ;;  %v7709_v60 = vcombine.high %v7705_v63, %v7705_v63  ;;  %v13250_v5 = vrot.slane %v13191_v39, %v11200_v21 }
 0x417   : > { %14830 = vst [vmem:[#allocation43_spill] sm:$0xff] %v13207_v40  ;;  %v2545_v19 = vadd.f32 %v14834_v26, %v2306_v6  ;;  %v6121_v6 = vadd.f32 %v10999_v44, %v2239_v30  ;;  %v7710_v26 = vcombine.high %v6174_v4, %v6174_v4  ;;  %v13252_v47 = vmax.f32 %v6116_v9, 0.0 }
 0x418   : > { %v13220_v36 = vpop.permute.xlu1 %8484  ;;  %8602 = vrot.lane.b32.xlu0 %v8277_v37, %s10409_s25  ;;  %v6119_v7 = vadd.f32 %v10999_v44, %v2237_v2  ;;  %v6120_v10 = vadd.f32 %v10999_v44, %v2238_v51  ;;  %v13265_v9 = vmax.f32 %v6122_v28, 0.0  ;;  %v6177_v2 = vmax.f32 %v6161_v33, 0.0 }
 0x419   : > { %14835 = vst [vmem:[#allocation98_spill] sm:$0xff] %v13220_v36  ;;  %v6159_v30 = vadd.f32 %v14713_v14, %v2545_v19  ;;  %v13256_v34 = vmax.f32 %v6121_v6, 0.0  ;;  %v7724_v14 = vrot.slane %v7710_v26, %v11200_v21  ;;  %v8293_v19 = vrot.slane %v7733_v57, %v11226_v62 }
 0x41a   : > { %8600 = vrot.lane.b32.xlu1 %v8273_v54, %s10409_s25  ;;  %v13234_v37 = vpop.permute.xlu0 %8490  ;;  %v8281_v54 = vrot.slane %v7705_v63, %v11226_v62  ;;  %v7755_v63 = vcombine.high %v7733_v57, %v7733_v57  ;;  %14841 = vst [vmem:[#allocation101_spill] sm:$0xff] %v13265_v9  ;;  %v13269_v51 = vrot.slane %v13238_v27, %v11200_v21  ;;  %v13284_v33 = vmax.f32 %v6120_v10, 0.0 }
 0x41b   : > { %14838 = vst [vmem:[#allocation8_spill] sm:$0xff] %v13234_v37  ;;  %v6176_v37 = vmax.f32 %v6160_v49, 0.0  ;;  %v6175_v6 = vmax.f32 %v6159_v30, 0.0  ;;  %v7747_v57 = vrot.slane %v7725_v15, %v11200_v21  ;;  %v13280_v28 = vrot.slane %v13252_v47, %v11200_v21 }
 0x41c   : > { %v13244_v4 = vpop.permute.xlu1 %8488  ;;  %8606 = vrot.lane.b32.xlu0 %v8285_v3, %s10409_s25  ;;  %v13282_v49 = vmax.f32 %v6119_v7, 0.0  ;;  %v7740_v3 = vrot.slane %v7724_v14, %v11200_v21  ;;  %v13299_v7 = vrot.slane %v13265_v9, %v11200_v21  ;;  %v7857_v30 = vcombine.high %v6177_v2, %v6177_v2 }
 0x41d   : > { %14839 = vst [vmem:[#allocation53_spill] sm:$0xff] %v13244_v4  ;;  %v7808_v10 = vcombine.high %v6176_v37, %v6176_v37  ;;  %v13302_v44 = vrot.slane %v6176_v37, %v11200_v21  ;;  %v13317_v9 = vrot.slane %v6177_v2, %v11200_v21  ;;  %v7766_v40 = vrot.slane %v6175_v6, %v11200_v21 }
 0x41e   : > { %8604 = vrot.lane.b32.xlu1 %v8281_v54, %s10409_s25  ;;  %v13260_v43 = vpop.permute.xlu0 %8494  ;;  %v8289_v54 = vrot.slane %v7709_v60, %v11226_v62  ;;  %v8301_v60 = vrot.slane %v7755_v63, %v11226_v62  ;;  %14844 = vst [vmem:[#allocation15_spill] sm:$0xff] %v13299_v7  ;;  %v7726_v63 = vcombine.high %v7724_v14, %v7724_v14 }
 0x41f   : > { %14840 = vst [vmem:[#allocation45_spill] sm:$0xff] %v13260_v43  ;;  %v13312_v7 = vrot.slane %v13282_v49, %v11200_v21  ;;  %v7756_v36 = vcombine.high %v7740_v3, %v7740_v3  ;;  %v13331_v37 = vrot.slane %v7808_v10, %v11200_v21  ;;  %v13334_v2 = vrot.slane %v7857_v30, %v11200_v21 }
 0x420   : > { %v13271_v26 = vpop.permute.xlu1 %8492  ;;  %8610 = vrot.lane.b32.xlu0 %v8293_v19, %s10409_s25  ;;  %v13290_v19 = vrot.slane %v13256_v34, %v11200_v21  ;;  %v7754_v30 = vrot.slane %v7726_v63, %v11200_v21  ;;  %v14850_v63 = vcombine.high %v13151_v1, %v13151_v1  ;;  %v7774_v1 = vcombine.high %v7766_v40, %v7766_v40 }
 0x421   : > { %14842 = vst [vmem:[#allocation14_spill] sm:$0xff] %v13271_v26  ;;  %v7759_v26 = vcombine.high %v6175_v6, %v6175_v6  ;;  %v14847_v6 = vcombine.high %v13136_v31, %v13136_v31  ;;  %v13354_v31 = vrot.slane %v13155_v22, %v11200_v21 }
 0x422   : > { %8608 = vrot.lane.b32.xlu1 %v8289_v54, %s10409_s25  ;;  %v13293_v15 = vpop.permute.xlu0 %8498  ;;  %v8297_v54 = vrot.slane %v7747_v57, %v11226_v62  ;;  %v6257_v58 = vrot.slane %v14850_v63, %v11200_v21 }
 0x423   : > { %14843 = vst [vmem:[#allocation32_spill] sm:$0xff] %v13293_v15  ;;  %v7757_v15 = vcombine.high %v7747_v57, %v7747_v57  ;;  %v8309_v57 = vrot.slane %v7740_v3, %v11226_v62  ;;  %v13343_v3 = vrot.slane %v7759_v26, %v11200_v21  ;;  %v14849_v26 = vcombine.high %v13124_v35, %v13124_v35 }
 0x424   : > { %v13304_v43 = vpop.permute.xlu1 %8496  ;;  %8614 = vrot.lane.b32.xlu0 %v8301_v60, %s10409_s25  ;;  %v6307_v60 = vcombine.high %v13155_v22, %v13155_v22  ;;  %v7758_v35 = vcombine.high %v7754_v30, %v7754_v30  ;;  %v6259_v12 = vcombine.high %v6257_v58, %v6257_v58 }
 0x425   : > { %14845 = vst [vmem:[#allocation71_spill] sm:$0xff] %v13304_v43  ;;  %v13328_v43 = vrot.slane %v13284_v33, %v11200_v21  ;;  %v8305_v10 = vrot.slane %v7757_v15, %v11226_v62 }
 0x426   : > { %8612 = vrot.lane.b32.xlu1 %v8297_v54, %s10409_s25  ;;  %v13323_v14 = vpop.permute.xlu0 %8502  ;;  %v6208_v54 = vrot.slane %v14847_v6, %v11200_v21  ;;  %v6209_v6 = vcombine.high %v13175_v46, %v13175_v46  ;;  %v13364_v15 = vrot.slane %v6307_v60, %v11200_v21  ;;  %v13382_v60 = vrot.slane %v13175_v46, %v11200_v21 }
 0x427   : > { %14846 = vst [vmem:[#allocation33_spill] sm:$0xff] %v13323_v14  ;;  %v6306_v14 = vrot.slane %v14849_v26, %v11200_v21  ;;  %v13378_v26 = vrot.slane %v13317_v9, %v11200_v21 }
 0x428   : > { %v13345_v4 = vpop.permute.xlu1 %8500  ;;  %8618 = vrot.lane.b32.xlu0 %v8309_v57, %s10409_s25  ;;  %v7782_v57 = vrot.slane %v7766_v40, %v11200_v21  ;;  %v6210_v8 = vcombine.high %v6208_v54, %v6208_v54  ;;  %v13393_v16 = vrot.slane %v6209_v6, %v11200_v21  ;;  %v6258_v40 = vcombine.high %v13186_v45, %v13186_v45 }
 0x429   : > { %14848 = vst [vmem:[#allocation105_spill] sm:$0xff] %v13345_v4  ;;  %v8317_v4 = vrot.slane %v7756_v36, %v11226_v62  ;;  %v8313_v36 = vrot.slane %v7754_v30, %v11226_v62  ;;  %v6308_v46 = vcombine.high %v6306_v14, %v6306_v14  ;;  %v13407_v6 = vrot.slane %v6208_v54, %v11200_v21 }
 0x42a   : > { %8616 = vrot.lane.b32.xlu1 %v8305_v10, %s10409_s25  ;;  %v13371_v22 = vpop.permute.xlu0 %8506  ;;  %v8325_v30 = vrot.slane %v7782_v57, %v11226_v62  ;;  %v13410_v20 = vrot.slane %v6210_v8, %v11200_v21  ;;  %v13414_v10 = vrot.slane %v13186_v45, %v11200_v21  ;;  %v8321_v54 = vrot.slane %v7758_v35, %v11226_v62 }
 0x42b   : > { %14851 = vst [vmem:[#allocation73_spill] sm:$0xff] %v13371_v22  ;;  %v13404_v22 = vrot.slane %v6306_v14, %v11200_v21  ;;  %v7796_v8 = vrot.slane %v7774_v1, %v11200_v21  ;;  %v13428_v41 = vrot.slane %v6308_v46, %v11200_v21  ;;  %v14858_v35 = vcombine.high %v13238_v27, %v13238_v27 }
 0x42c   : > { %v13386_v63 = vpop.permute.xlu1 %8504  ;;  %8622 = vrot.lane.b32.xlu0 %v8317_v4, %s10409_s25  ;;  %14854 = vst [vmem:[#allocation16_spill] sm:$0xff] %v13414_v10  ;;  %v6356_v27 = vcombine.high %v13167_v0, %v13167_v0  ;;  %v13473_v10 = vrot.slane %v13167_v0, %v11200_v21  ;;  %v13489_v0 = vrot.slane %v13269_v51, %v11200_v21 }
 0x42d   : > { %14852 = vst [vmem:[#allocation46_spill] sm:$0xff] %v13386_v63  ;;  %v7804_v63 = vcombine.high %v7782_v57, %v7782_v57  ;;  %v14855_v57 = vcombine.high %v13134_v56, %v13134_v56  ;;  %v13436_v56 = vrot.slane %v6257_v58, %v11200_v21  ;;  %v6404_v1 = vrot.slane %v14858_v35, %v11200_v21 }
 0x42e   : > { %8620 = vrot.lane.b32.xlu1 %v8313_v36, %s10409_s25  ;;  %v13400_v4 = vpop.permute.xlu0 %8510  ;;  %v13433_v36 = vrot.slane %v6258_v40, %v11200_v21  ;;  %v7789_v40 = vrot.slane %v13343_v3, %v11200_v21  ;;  %v6405_v35 = vcombine.high %v13269_v51, %v13269_v51  ;;  %v7806_v58 = vcombine.high %v7796_v8, %v7796_v8 }
 0x42f   : > { %14853 = vst [vmem:[#allocation107_spill] sm:$0xff] %v13400_v4  ;;  %v6355_v4 = vrot.slane %v14855_v57, %v11200_v21  ;;  %14857 = vst [vmem:[#allocation34_spill] sm:$0xff] %v13436_v56  ;;  %v13439_v57 = vrot.slane %v6259_v12, %v11200_v21  ;;  %v13482_v45 = vrot.slane %v6356_v27, %v11200_v21 }
 0x430   : > { %v13422_v14 = vpop.permute.xlu1 %8508  ;;  %8626 = vrot.lane.b32.xlu0 %v8325_v30, %s10409_s25  ;;  %v8333_v30 = vrot.slane %v7804_v63, %v11226_v62  ;;  %v8341_v12 = vrot.slane %v7789_v40, %v11226_v62  ;;  %v7805_v18 = vcombine.high %v7789_v40, %v7789_v40  ;;  %14862 = vst [vmem:[#allocation110_spill] sm:$0xff] %v13489_v0 }
 0x431   : > { %14856 = vst [vmem:[#allocation17_spill] sm:$0xff] %v13422_v14  ;;  %v13485_v14 = vrot.slane %v6355_v4, %v11200_v21  ;;  %v13499_v40 = vrot.slane %v6405_v35, %v11200_v21  ;;  %v14866_v51 = vcombine.high %v13343_v3, %v13343_v3  ;;  %v13514_v35 = vrot.slane %v6404_v1, %v11200_v21 }
 0x432   : > { %8624 = vrot.lane.b32.xlu1 %v8321_v54, %s10409_s25  ;;  %v13446_v46 = vpop.permute.xlu0 %8514  ;;  %v6357_v54 = vcombine.high %v6355_v4, %v6355_v4  ;;  %v8337_v4 = vrot.slane %v7806_v58, %v11226_v62  ;;  %v6454_v3 = vcombine.high %v13280_v28, %v13280_v28 }
 0x433   : > { %14859 = vst [vmem:[#allocation74_spill] sm:$0xff] %v13446_v46  ;;  %v8329_v46 = vrot.slane %v7796_v8, %v11226_v62  ;;  %14864 = vst [vmem:[#allocation113_spill] sm:$0xff] %v13499_v40  ;;  %v7803_v56 = vrot.slane %v14866_v51, %v11200_v21 }
 0x434   : > { %v13461_v63 = vpop.permute.xlu1 %8512  ;;  %8630 = vrot.lane.b32.xlu0 %v8333_v30, %s10409_s25  ;;  %v6406_v30 = vcombine.high %v6404_v1, %v6404_v1  ;;  %14867 = vst [vmem:[#allocation18_spill] sm:$0xff] %v13514_v35  ;;  %v7831_v1 = vrot.slane %v13302_v44, %v11200_v21 }
 0x435   : > { %14860 = vst [vmem:[#allocation36_spill] sm:$0xff] %v13461_v63  ;;  %v14863_v63 = vcombine.high %v13252_v47, %v13252_v47  ;;  %v7807_v47 = vcombine.high %v7803_v56, %v7803_v56 }
 0x436   : > { %8628 = vrot.lane.b32.xlu1 %v8329_v46, %s10409_s25  ;;  %v13478_v8 = vpop.permute.xlu0 %8518  ;;  %v13521_v58 = vrot.slane %v6406_v30, %v11200_v21  ;;  %v13549_v30 = vrot.slane %v13280_v28, %v11200_v21 }
 0x437   : > { %14861 = vst [vmem:[#allocation72_spill] sm:$0xff] %v13478_v8  ;;  %v6453_v46 = vrot.slane %v14863_v63, %v11200_v21  ;;  %v13496_v8 = vrot.slane %v6357_v54, %v11200_v21  ;;  %v8349_v54 = vrot.slane %v7805_v18, %v11226_v62 }
 0x438   : > { %v13501_v27 = vpop.permute.xlu1 %8516  ;;  %8634 = vrot.lane.b32.xlu0 %v8341_v12, %s10409_s25  ;;  %v14868_v12 = vcombine.high %v13171_v52, %v13171_v52  ;;  %14869 = vst [vmem:[#allocation19_spill] sm:$0xff] %v13521_v58  ;;  %v7853_v52 = vcombine.high %v7831_v1, %v7831_v1 }
 0x439   : > { %14865 = vst [vmem:[#allocation5_spill] sm:$0xff] %v13501_v27  ;;  %v8345_v27 = vrot.slane %v7803_v56, %v11226_v62  ;;  %v13563_v28 = vrot.slane %v6453_v46, %v11200_v21 }
 0x43a   : > { %v6502_v63 = vrot.slane %v14868_v12, %v11200_v21  ;;  %8632 = vrot.lane.b32.xlu1 %v8337_v4, %s10409_s25  ;;  %v13526_v51 = vpop.permute.xlu0 %8522  ;;  %v6455_v12 = vcombine.high %v6453_v46, %v6453_v46  ;;  %v6503_v4 = vcombine.high %v13217_v11, %v13217_v11  ;;  %v8353_v46 = vrot.slane %v7807_v47, %v11226_v62 }
 0x43b   : > { %14870 = vst [vmem:[#allocation81_spill] sm:$0xff] %v13526_v51  ;;  %v14873_v51 = vcombine.high %v13302_v44, %v13302_v44  ;;  %v14875_v44 = vcombine.high %v13191_v39, %v13191_v39  ;;  %v7838_v47 = vrot.slane %v13331_v37, %v11200_v21  ;;  %v13606_v39 = vrot.slane %v13250_v5, %v11200_v21 }
 0x43c   : > { %v13541_v18 = vpop.permute.xlu1 %8520  ;;  %8638 = vrot.lane.b32.xlu0 %v8349_v54, %s10409_s25  ;;  %v6504_v0 = vcombine.high %v6502_v63, %v6502_v63  ;;  %v8357_v54 = vrot.slane %v7831_v1, %v11226_v62  ;;  %v13566_v35 = vrot.slane %v6455_v12, %v11200_v21  ;;  %v6552_v1 = vcombine.high %v13250_v5, %v13250_v5 }
 0x43d   : > { %14871 = vst [vmem:[#allocation122_spill] sm:$0xff] %v13541_v18  ;;  %v13556_v18 = vrot.slane %v6454_v3, %v11200_v21  ;;  %v7845_v58 = vrot.slane %v14873_v51, %v11200_v21  ;;  %v7824_v3 = vcombine.high %v13331_v37, %v13331_v37  ;;  %v6551_v51 = vrot.slane %v14875_v44, %v11200_v21 }
 0x43e   : > { %8636 = vrot.lane.b32.xlu1 %v8345_v27, %s10409_s25  ;;  %v13559_v56 = vpop.permute.xlu0 %8526  ;;  %v13576_v27 = vrot.slane %v13217_v11, %v11200_v21  ;;  %v13589_v12 = vrot.slane %v6503_v4, %v11200_v21  ;;  %v13592_v11 = vrot.slane %v6502_v63, %v11200_v21  ;;  %14877 = vst [vmem:[#allocation123_spill] sm:$0xff] %v13606_v39 }
 0x43f   : > { %14872 = vst [vmem:[#allocation40_spill] sm:$0xff] %v13559_v56  ;;  %v7855_v44 = vcombine.high %v7845_v58, %v7845_v58  ;;  %v8361_v5 = vrot.slane %v7845_v58, %v11226_v62  ;;  %v14883_v37 = vcombine.high %v13282_v49, %v13282_v49 }
 0x440   : > { %v13578_v56 = vpop.permute.xlu1 %8524  ;;  %8642 = vrot.lane.b32.xlu0 %v8357_v54, %s10409_s25  ;;  %14876 = vst [vmem:[#allocation82_spill] sm:$0xff] %v13592_v11  ;;  %v7852_v54 = vrot.slane %v7824_v3, %v11200_v21 }
 0x441   : > { %14874 = vst [vmem:[#allocation115_spill] sm:$0xff] %v13578_v56  ;;  %v13595_v56 = vrot.slane %v6504_v0, %v11200_v21  ;;  %v8365_v0 = vrot.slane %v7853_v52, %v11226_v62  ;;  %v13623_v52 = vrot.slane %v6552_v1, %v11200_v21  ;;  %v8373_v1 = vrot.slane %v7838_v47, %v11226_v62 }
 0x442   : > { %8640 = vrot.lane.b32.xlu1 %v8353_v46, %s10409_s25  ;;  %v13608_v63 = vpop.permute.xlu0 %8530  ;;  %v7854_v46 = vcombine.high %v7838_v47, %v7838_v47  ;;  %v6600_v4 = vrot.slane %v14883_v37, %v11200_v21  ;;  %v8369_v3 = vrot.slane %v7855_v44, %v11226_v62  ;;  %v7856_v11 = vcombine.high %v7852_v54, %v7852_v54 }
 0x443   : > { %14878 = vst [vmem:[#allocation126_spill] sm:$0xff] %v13608_v63  ;;  %14880 = vst [vmem:[#allocation21_spill] sm:$0xff] %v13623_v52  ;;  %v6553_v63 = vcombine.high %v6551_v51, %v6551_v51  ;;  %v6601_v47 = vcombine.high %v13312_v7, %v13312_v7  ;;  %v13663_v37 = vrot.slane %v13312_v7, %v11200_v21 }
 0x444   : > { %v13618_v40 = vpop.permute.xlu1 %8528  ;;  %8646 = vrot.lane.b32.xlu0 %v8365_v0, %s10409_s25  ;;  %v8381_v44 = vrot.slane %v7854_v46, %v11226_v62  ;;  %v8389_v46 = vrot.slane %v13378_v26, %v11226_v62  ;;  %v6602_v52 = vcombine.high %v6600_v4, %v6600_v4 }
 0x445   : > { %14879 = vst [vmem:[#allocation20_spill] sm:$0xff] %v13618_v40  ;;  %v13638_v40 = vrot.slane %v6551_v51, %v11200_v21  ;;  %v13659_v51 = vrot.slane %v6553_v63, %v11200_v21  ;;  %14887 = vst [vmem:[#allocation80_spill] sm:$0xff] %v13663_v37  ;;  %v14888_v63 = vcombine.high %v13284_v33, %v13284_v33 }
 0x446   : > { %8644 = vrot.lane.b32.xlu1 %v8361_v5, %s10409_s25  ;;  %v13634_v58 = vpop.permute.xlu0 %8534  ;;  %v14884_v5 = vcombine.high %v13317_v9, %v13317_v9  ;;  %v7902_v9 = vcombine.high %v13378_v26, %v13378_v26  ;;  %v8385_v33 = vrot.slane %v7856_v11, %v11226_v62 }
 0x447   : > { %14881 = vst [vmem:[#allocation79_spill] sm:$0xff] %v13634_v58  ;;  %14882 = vst [vmem:[#allocation27_spill] sm:$0xff] %v13638_v40  ;;  %v6649_v49 = vrot.slane %v14888_v63, %v11200_v21  ;;  %v13692_v63 = vrot.slane %v6601_v47, %v11200_v21  ;;  %v13727_v47 = vrot.slane %v13328_v43, %v11200_v21 }
 0x448   : > { %v13649_v0 = vrot.slane %v14884_v5, %v11200_v21  ;;  %v13653_v39 = vpop.permute.xlu1 %8532  ;;  %8650 = vrot.lane.b32.xlu0 %v8373_v1, %s10409_s25  ;;  %14886 = vst [vmem:[#allocation114_spill] sm:$0xff] %v13659_v51  ;;  %v8377_v5 = vrot.slane %v7852_v54, %v11226_v62  ;;  %v13671_v1 = vrot.slane %v13334_v2, %v11200_v21 }
 0x449   : > { %14885 = vst [vmem:[#allocation118_spill] sm:$0xff] %v13653_v39  ;;  %v14890_v54 = vcombine.high %v13334_v2, %v13334_v2  ;;  %14891 = vst [vmem:[#allocation119_spill] sm:$0xff] %v13692_v63  ;;  %v6650_v39 = vcombine.high %v13328_v43, %v13328_v43  ;;  %v8397_v26 = vrot.slane %v7902_v9, %v11226_v62 }
 0x44a   : > { %8648 = vrot.lane.b32.xlu1 %v8369_v3, %s10409_s25  ;;  %v13678_v7 = vpop.permute.xlu0 %8538  ;;  %v7904_v3 = vcombine.high %v13649_v0, %v13649_v0  ;;  %v8393_v11 = vrot.slane %v13649_v0, %v11226_v62  ;;  %v8405_v0 = vrot.slane %v13671_v1, %v11226_v62  ;;  %v13721_v9 = vrot.slane %v6602_v52, %v11200_v21 }
 0x44b   : > { %14889 = vst [vmem:[#allocation30_spill] sm:$0xff] %v13678_v7  ;;  %v13688_v58 = vrot.slane %v14890_v54, %v11200_v21  ;;  %v13709_v54 = vrot.slane %v6600_v4, %v11200_v21  ;;  %v7903_v7 = vcombine.high %v13671_v1, %v13671_v1  ;;  %v13737_v1 = vrot.slane %v13290_v19, %v11200_v21 }
 0x44c   : > { %v13698_v40 = vpop.permute.xlu1 %8536  ;;  %8654 = vrot.lane.b32.xlu0 %v8381_v44, %s10409_s25  ;;  %v6699_v44 = vcombine.high %v13290_v19, %v13290_v19  ;;  %v8401_v37 = vrot.slane %v7904_v3, %v11226_v62  ;;  %v8819_v52 = vsel %vm5246_vm3, %v13364_v15, %v12921_v53  ;;  %v13748_v3 = vrot.slane %v6649_v49, %v11200_v21 }
 0x44d   : > { %14892 = vst [vmem:[#allocation124_spill] sm:$0xff] %v13698_v40  ;;  %v6651_v40 = vcombine.high %v6649_v49, %v6649_v49  ;;  %v7905_v4 = vcombine.high %v13688_v58, %v13688_v58  ;;  %v8818_v49 = vsel %vm5246_vm3, %v13354_v31, %v12884_v29 }
 0x44e   : > { %8652 = vrot.lane.b32.xlu1 %v8377_v5, %s10409_s25  ;;  %v13716_v2 = vpop.permute.xlu0 %8542  ;;  %v8413_v5 = vrot.slane %v7903_v7, %v11226_v62  ;;  %v9126_v53 = vcombine.low %v8818_v49, %v8819_v52  ;;  %v8803_v7 = vsel %vm5246_vm3, %v13393_v16, %v12934_v32 }
 0x44f   : > { %14893 = vst [vmem:[#allocation91_spill] sm:$0xff] %v13716_v2  ;;  %v13733_v2 = vrot.slane %v6650_v39, %v11200_v21  ;;  %v14894_v39 = vcombine.high %v13256_v34, %v13256_v34  ;;  %v13760_v63 = vrot.slane %v6651_v40, %v11200_v21  ;;  %v8802_v40 = vsel %vm5246_vm3, %v13382_v60, %v12913_v55 }
 0x450   : > { %v13742_v51 = vpop.permute.xlu1 %8540  ;;  %8658 = vrot.lane.b32.xlu0 %v8389_v46, %s10409_s25  ;;  %v13763_v46 = vrot.slane %v6699_v44, %v11200_v21  ;;  %v14895_v44 = vcombine.high %v13393_v16, %v13393_v16  ;;  %v14897_v16 = vcombine.high %v13382_v60, %v13382_v60  ;;  %v13832_v52 = vrot.slane %v9126_v53, %v14680_v48 }
 0x451   : > { %v13754_v19 = vrot.slane %v14894_v39, %v11200_v21  ;;  %v13772_v39 = vrot.slane %v7905_v4, %v11226_v62  ;;  %v9058_v55 = vcombine.low %v8802_v40, %v8803_v7 }
 0x452   : > { %8656 = vrot.lane.b32.xlu1 %v8385_v33, %s10409_s25  ;;  %v13769_v34 = vpop.permute.xlu0 %8546  ;;  %v8805_v29 = vsel %vm5246_vm3, %v14895_v44, %v12966_v38  ;;  %v6682_v33 = vcombine.high %v13733_v2, %v13733_v2  ;;  %v14896_v44 = vcombine.high %v13364_v15, %v13364_v15 }
 0x453   : > { %v13797_v38 = vrot.slane %v13754_v19, %v11200_v21  ;;  %v6700_v49 = vcombine.high %v13754_v19, %v13754_v19 }
 0x454   : > { %v13790_v43 = vpop.permute.xlu1 %8544  ;;  %8662 = vrot.lane.b32.xlu0 %v8397_v26, %s10409_s25  ;;  %v8821_v32 = vsel %vm5246_vm3, %v14896_v44, %v12944_v61  ;;  %v8804_v26 = vsel %vm5246_vm3, %v14897_v16, %v12950_v25  ;;  %v14898_v61 = vcombine.high %v13354_v31, %v13354_v31  ;;  %v14899_v25 = vcombine.high %v13410_v20, %v13410_v20 }
 0x455   : > { %v9059_v44 = vcombine.low %v8804_v26, %v8805_v29  ;;  %v8807_v31 = vsel %vm5246_vm3, %v13410_v20, %v12977_v42  ;;  %v8811_v20 = vsel %vm5246_vm3, %v13433_v36, %v12997_v24 }
 0x456   : > { %v8820_v15 = vsel %vm5246_vm3, %v14898_v61, %v12928_v17  ;;  %v8809_v16 = vsel %vm5246_vm3, %v14899_v25, %v12987_v50  ;;  %8660 = vrot.lane.b32.xlu1 %v8393_v11, %s10409_s25  ;;  %v13829_v4 = vpop.permute.xlu0 %8550  ;;  %v14900_v17 = vcombine.high %v13433_v36, %v13433_v36  ;;  %v8823_v50 = vsel %vm5246_vm3, %v13428_v41, %v12956_v59  ;;  %v14903_v59 = vld [vmem:[#allocation4_spill] sm:$0xff]  ;;  %v14908_v25 = vld [vmem:[#allocation87_spill] sm:$0xff] }
 0x457   : > { %v9127_v29 = vcombine.low %v8820_v15, %v8821_v32  ;;  %v14901_v11 = vcombine.high %v13407_v6, %v13407_v6  ;;  %v14904_v32 = vld [vmem:[#allocation16_spill] sm:$0xff]  ;;  %v14907_v15 = vcombine.high %v13439_v57, %v13439_v57  ;;  %v9073_v36 = vrot.slane %v9059_v44, %v14680_v48 }
 0x458   : > { %v8813_v60 = vsel %vm5246_vm3, %v14900_v17, %v13009_v23  ;;  %v13853_v42 = vpop.permute.xlu1 %8548  ;;  %8666 = vrot.lane.b32.xlu0 %v8405_v0, %s10409_s25  ;;  %v14902_v23 = vld [vmem:[#allocation35_spill] sm:$0xff]  ;;  %v14905_v26 = vcombine.high %v14904_v32, %v14904_v32 }
 0x459   : > { %v8808_v53 = vsel %vm5246_vm3, %v14901_v11, %v12974_v13  ;;  %v8806_v7 = vsel %vm5246_vm3, %v13407_v6, %v14902_v23  ;;  %v14906_v13 = vld [vmem:[#allocation10_spill] sm:$0xff]  ;;  %v8810_v6 = vsel %vm5246_vm3, %v14904_v32, %v14908_v25  ;;  %v14909_v11 = vld [vmem:[#allocation9_spill] sm:$0xff] }
 0x45a   : > { %v9076_v40 = vcombine.low %v8808_v53, %v8809_v16  ;;  %v8812_v61 = vsel %vm5246_vm3, %v14905_v26, %v14903_v59  ;;  %v8817_v24 = vsel %vm5246_vm3, %v14907_v15, %v14906_v13  ;;  %v9075_v0 = vcombine.low %v8806_v7, %v8807_v31  ;;  %8664 = vrot.lane.b32.xlu1 %v8401_v37, %s10409_s25  ;;  %v13874_v17 = vpop.permute.xlu0 %8554  ;;  %v14910_v59 = vld [vmem:[#allocation3_spill] sm:$0xff]  ;;  %v14911_v26 = vld [vmem:[#allocation34_spill] sm:$0xff]  ;;  %v14913_v31 = vld [vmem:[#allocation37_spill] sm:$0xff] }
 0x45b   : > { %v9093_v16 = vcombine.low %v8812_v61, %v8813_v60  ;;  %v8822_v53 = vsel %vm5246_vm3, %v13404_v22, %v14909_v11  ;;  %v9092_v23 = vcombine.low %v8810_v6, %v8811_v20  ;;  %v14912_v13 = vcombine.high %v14911_v26, %v14911_v26  ;;  %v14914_v25 = vld [vmem:[#allocation49_spill] sm:$0xff]  ;;  %v14915_v11 = vld [vmem:[#allocation48_spill] sm:$0xff] }
 0x45c   : > { %v8815_v7 = vsel %vm5246_vm3, %v13439_v57, %v14913_v31  ;;  %v9066_v60 = vrot.slane %v9058_v55, %v14680_v48  ;;  %v13889_v37 = vrot.slane %v9127_v29, %v14680_v48  ;;  %v9143_v32 = vcombine.low %v8822_v53, %v8823_v50  ;;  %v13891_v15 = vpop.permute.xlu1 %8552  ;;  %8670 = vrot.lane.b32.xlu0 %v8413_v5, %s10409_s25  ;;  %v14917_v29 = vld [vmem:[#allocation41_spill] sm:$0xff] }
 0x45d   : > { %v8816_v44 = vsel %vm5246_vm3, %v14912_v13, %v14910_v59  ;;  %v9090_v20 = vrot.slane %v9076_v40, %v14680_v48  ;;  %v8814_v6 = vsel %vm5246_vm3, %v14911_v26, %v14914_v25  ;;  %v14916_v57 = vcombine.high %v13428_v41, %v13428_v41 }
 0x45e   : > { %v9110_v61 = vcombine.low %v8816_v44, %v8817_v24  ;;  %v14918_v50 = vcombine.high %v13482_v45, %v13482_v45  ;;  %v9074_v53 = vcombine.low %v9066_v60, %v9073_v36  ;;  %v9083_v5 = vrot.slane %v9075_v0, %v14680_v48  ;;  %v13914_v41 = vpop.permute.xlu0 %8558  ;;  %v14920_v44 = vld [vmem:[#allocation90_spill] sm:$0xff]  ;;  %v14922_v60 = vld [vmem:[#allocation39_spill] sm:$0xff] }
 0x45f   : > { %v8825_v55 = vsel %vm5246_vm3, %v14916_v57, %v14915_v11  ;;  %v9107_v40 = vrot.slane %v9093_v16, %v14680_v48  ;;  %v9109_v59 = vcombine.low %v8814_v6, %v8815_v7  ;;  %v14919_v26 = vrot.slane %v13688_v58, %v11226_v62  ;;  %v14924_v7 = vld [vmem:[#allocation97_spill] sm:$0xff] }
 0x460   : > { %v8829_v24 = vsel %vm5246_vm3, %v14918_v50, %v14917_v29  ;;  %v9100_v13 = vrot.slane %v9092_v23, %v14680_v48  ;;  %v14921_v31 = vcombine.high %v13404_v22, %v13404_v22  ;;  %v14923_v0 = vcombine.high %v13473_v10, %v13473_v10  ;;  %v14925_v6 = vld [vmem:[#allocation13_spill] sm:$0xff]  ;;  %v13936_v57 = vpop.permute.xlu1 %8556  ;;  %9602 = vrot.lane.b32.xlu0 %v9074_v53, %s10401_s15 }
 0x461   : > { %8668 = vrot.lane.b32.xlu1 %v14919_v26, %s10409_s25  ;;  %v8827_v62 = vsel %vm5246_vm3, %v13482_v45, %v14924_v7  ;;  %v9124_v58 = vrot.slane %v9110_v61, %v14680_v48  ;;  %v14926_v22 = vcombine.high %v13496_v8, %v13496_v8  ;;  %v9142_v29 = vcombine.low %v13832_v52, %v13889_v37  ;;  %v14927_v61 = vld [vmem:[#allocation11_spill] sm:$0xff] }
 0x462   : > { %v8824_v36 = vsel %vm5246_vm3, %v14921_v31, %v14920_v44  ;;  %v8828_v16 = vsel %vm5246_vm3, %v14923_v0, %v14922_v60  ;;  %v13942_v50 = vrot.slane %v9143_v32, %v14680_v48  ;;  %v9091_v45 = vcombine.low %v9083_v5, %v9090_v20  ;;  %v14928_v31 = vld [vmem:[#allocation12_spill] sm:$0xff]  ;;  %v13955_v52 = vpop.permute.xlu0 %8562  ;;  %v14930_v37 = vld [vmem:[#allocation51_spill] sm:$0xff]  ;;  %v14931_v20 = vld [vmem:[#allocation53_spill] sm:$0xff] }
 0x463   : > { %v9144_v25 = vcombine.low %v8824_v36, %v8825_v55  ;;  %v9161_v23 = vcombine.low %v8828_v16, %v8829_v24  ;;  %v8833_v11 = vsel %vm5246_vm3, %v14926_v22, %v14925_v6  ;;  %v8826_v55 = vsel %vm5246_vm3, %v13473_v10, %v14927_v61  ;;  %v14932_v5 = vld [vmem:[#allocation113_spill] sm:$0xff]  ;;  %v14935_v60 = vld [vmem:[#allocation19_spill] sm:$0xff]  ;;  %v14939_v61 = vld [vmem:[#allocation110_spill] sm:$0xff] }
 0x464   : > { %v9108_v24 = vcombine.low %v9100_v13, %v9107_v40  ;;  %v9117_v26 = vrot.slane %v9109_v59, %v14680_v48  ;;  %v9160_v44 = vcombine.low %v8826_v55, %v8827_v62  ;;  %v14929_v36 = vcombine.high %v13485_v14, %v13485_v14  ;;  %v14934_v13 = vld [vmem:[#allocation71_spill] sm:$0xff]  ;;  %v14937_v62 = vld [vmem:[#allocation6_spill] sm:$0xff]  ;;  %v13975_v22 = vpop.permute.xlu1 %8560 }
 0x465   : > { %8672 = vrot.lane.b32.xlu1 %v13772_v39, %s10409_s25  ;;  %v8831_v32 = vsel %vm5246_vm3, %v13496_v8, %v14930_v37  ;;  %v14933_v40 = vcombine.high %v14932_v5, %v14932_v5  ;;  %v14936_v0 = vcombine.high %v14935_v60, %v14935_v60  ;;  %v9158_v7 = vrot.slane %v9144_v25, %v14680_v48  ;;  %v14942_v25 = vld [vmem:[#allocation45_spill] sm:$0xff] }
 0x466   : > { %v8832_v53 = vsel %vm5246_vm3, %v14929_v36, %v14928_v31  ;;  %v9125_v39 = vcombine.low %v9117_v26, %v9124_v58  ;;  %v8830_v8 = vsel %vm5246_vm3, %v13485_v14, %v14937_v62  ;;  %v9175_v6 = vrot.slane %v9161_v23, %v14680_v48  ;;  %9606 = vrot.lane.b32.xlu0 %v9108_v24, %s10401_s15  ;;  %v14941_v36 = vld [vmem:[#allocation98_spill] sm:$0xff] }
 0x467   : > { %v9178_v10 = vcombine.low %v8832_v53, %v8833_v11  ;;  %v8837_v59 = vsel %vm5246_vm3, %v14933_v40, %v14931_v20  ;;  %v8841_v16 = vsel %vm5246_vm3, %v14936_v0, %v14934_v13  ;;  %v14938_v11 = vld [vmem:[#allocation43_spill] sm:$0xff]  ;;  %v14940_v55 = vcombine.high %v14939_v61, %v14939_v61  ;;  %v14943_v26 = vld [vmem:[#allocation18_spill] sm:$0xff] }
 0x468   : > { %v8835_v58 = vsel %vm5246_vm3, %v14932_v5, %v14941_v36  ;;  %v14944_v14 = vcombine.high %v14943_v26, %v14943_v26  ;;  %v14945_v53 = vld [vmem:[#allocation14_spill] sm:$0xff]  ;;  %v9177_v37 = vcombine.low %v8830_v8, %v8831_v32  ;;  %v14947_v0 = vcombine.high %v13556_v18, %v13556_v18  ;;  %v14000_v5 = vpop.permute.xlu0 %8566 }
 0x469   : > { %v8836_v31 = vsel %vm5246_vm3, %v14940_v55, %v14938_v11  ;;  %v8839_v24 = vsel %vm5246_vm3, %v14935_v60, %v14945_v53  ;;  %v14946_v13 = vld [vmem:[#allocation46_spill] sm:$0xff]  ;;  %9604 = vrot.lane.b32.xlu1 %v9091_v45, %s10401_s15  ;;  %v9168_v11 = vrot.slane %v9160_v44, %v14680_v48  ;;  %v14948_v55 = vld [vmem:[#allocation7_spill] sm:$0xff]  ;;  %v9192_v32 = vrot.slane %v9178_v10, %v14680_v48 }
 0x46a   : > { %v8840_v23 = vsel %vm5246_vm3, %v14944_v14, %v14942_v25  ;;  %v9195_v20 = vcombine.low %v8836_v31, %v8837_v59  ;;  %v8845_v62 = vsel %vm5246_vm3, %v14947_v0, %v14946_v13  ;;  %v8834_v36 = vsel %vm5246_vm3, %v14939_v61, %v14948_v55  ;;  %v14949_v59 = vld [vmem:[#allocation8_spill] sm:$0xff]  ;;  %v14950_v31 = vld [vmem:[#allocation33_spill] sm:$0xff]  ;;  %9610 = vrot.lane.b32.xlu0 %v9142_v29, %s10401_s15 }
 0x46b   : > { %v9212_v40 = vcombine.low %v8840_v23, %v8841_v16  ;;  %v8838_v60 = vsel %vm5246_vm3, %v14943_v26, %v14949_v59  ;;  %v9194_v16 = vcombine.low %v8834_v36, %v8835_v58  ;;  %v14951_v45 = vcombine.high %v13549_v30, %v13549_v30  ;;  %v14952_v14 = vld [vmem:[#allocation105_spill] sm:$0xff]  ;;  %v14018_v23 = vpop.permute.xlu1 %8564  ;;  %v14953_v58 = vld [vmem:[#allocation122_spill] sm:$0xff]  ;;  %v14955_v55 = vld [vmem:[#allocation32_spill] sm:$0xff] }
 0x46c   : > { %v9211_v8 = vcombine.low %v8838_v60, %v8839_v24  ;;  %v8843_v44 = vsel %vm5246_vm3, %v13556_v18, %v14952_v14  ;;  %v9159_v10 = vcombine.low %v13942_v50, %v9158_v7  ;;  %v9176_v61 = vcombine.low %v9168_v11, %v9175_v6  ;;  %v14034_v50 = vpop.permute.xlu0 %8570  ;;  %v14956_v6 = vld [vmem:[#allocation17_spill] sm:$0xff]  ;;  %v14957_v11 = vld [vmem:[#allocation72_spill] sm:$0xff] }
 0x46d   : > { %v8844_v25 = vsel %vm5246_vm3, %v14951_v45, %v14950_v31  ;;  %v14954_v53 = vcombine.high %v13589_v12, %v13589_v12  ;;  %v9185_v13 = vrot.slane %v9177_v37, %v14680_v48  ;;  %v9209_v0 = vrot.slane %v9195_v20, %v14680_v48  ;;  %9608 = vrot.lane.b32.xlu1 %v9125_v39, %s10401_s15  ;;  %v14959_v36 = vld [vmem:[#allocation5_spill] sm:$0xff] }
 0x46e   : > { %v9229_v26 = vcombine.low %v8844_v25, %v8845_v62  ;;  %v8842_v18 = vsel %vm5246_vm3, %v13549_v30, %v14955_v55  ;;  %v9226_v29 = vrot.slane %v9212_v40, %v14680_v48  ;;  %v8847_v62 = vsel %vm5246_vm3, %v13566_v35, %v14956_v6  ;;  %9614 = vrot.lane.b32.xlu0 %v9176_v61, %s10401_s15  ;;  %v14960_v45 = vld [vmem:[#allocation73_spill] sm:$0xff]  ;;  %v14964_v61 = vld [vmem:[#allocation20_spill] sm:$0xff]  ;;  %v14966_v6 = vld [vmem:[#allocation107_spill] sm:$0xff] }
 0x46f   : > { %v8853_v24 = vsel %vm5246_vm3, %v14954_v53, %v14953_v58  ;;  %v9228_v7 = vcombine.low %v8842_v18, %v8843_v44  ;;  %v14958_v37 = vcombine.high %v13576_v27, %v13576_v27  ;;  %v8851_v30 = vsel %vm5246_vm3, %v13589_v12, %v14959_v36  ;;  %v8569_v31 = vpop.permute.xlu1 %8568  ;;  %v14961_v44 = vld [vmem:[#allocation74_spill] sm:$0xff]  ;;  %v14962_v12 = vld [vmem:[#allocation36_spill] sm:$0xff] }
 0x470   : > { %v9193_v40 = vcombine.low %v9185_v13, %v9192_v32  ;;  %v9202_v39 = vrot.slane %v9194_v16, %v14680_v48  ;;  %v9219_v59 = vrot.slane %v9211_v8, %v14680_v48  ;;  %v8846_v25 = vsel %vm5246_vm3, %v13563_v28, %v14960_v45 }
 0x471   : > { %v8852_v20 = vsel %vm5246_vm3, %v14958_v37, %v14957_v11  ;;  %v9243_v14 = vrot.slane %v9229_v26, %v14680_v48  ;;  %v8850_v58 = vsel %vm5246_vm3, %v13576_v27, %v14961_v44  ;;  %v14963_v32 = vcombine.high %v13566_v35, %v13566_v35  ;;  %9612 = vrot.lane.b32.xlu1 %v9159_v10, %s10401_s15  ;;  %v14068_v26 = vpop.permute.xlu0 %8574  ;;  %v14969_v11 = vld [vmem:[#allocation21_spill] sm:$0xff] }
 0x472   : > { %v9263_v60 = vcombine.low %v8852_v20, %v8853_v24  ;;  %v9210_v8 = vcombine.low %v9202_v39, %v9209_v0  ;;  %v9245_v53 = vcombine.low %v8846_v25, %v8847_v62  ;;  %v9262_v24 = vcombine.low %v8850_v58, %v8851_v30  ;;  %v14968_v62 = vld [vmem:[#allocation124_spill] sm:$0xff]  ;;  %v14972_v39 = vld [vmem:[#allocation82_spill] sm:$0xff]  ;;  %v14975_v58 = vld [vmem:[#allocation79_spill] sm:$0xff] }
 0x473   : > { %v8849_v16 = vsel %vm5246_vm3, %v14963_v32, %v14962_v12  ;;  %v14965_v13 = vcombine.high %v13595_v56, %v13595_v56  ;;  %v9227_v27 = vcombine.low %v9219_v59, %v9226_v29  ;;  %v9236_v18 = vrot.slane %v9228_v7, %v14680_v48  ;;  %v14971_v30 = vld [vmem:[#allocation40_spill] sm:$0xff]  ;;  %v14974_v59 = vld [vmem:[#allocation115_spill] sm:$0xff]  ;;  %v14090_v45 = vpop.permute.xlu1 %8572 }
 0x474   : > { %v14967_v35 = vcombine.high %v13563_v28, %v13563_v28  ;;  %v14970_v37 = vcombine.high %v14969_v11, %v14969_v11  ;;  %v9277_v10 = vrot.slane %v9263_v60, %v14680_v48  ;;  %v14973_v29 = vcombine.high %v14972_v39, %v14972_v39  ;;  %9618 = vrot.lane.b32.xlu0 %v9210_v8, %s10401_s15  ;;  %v14976_v12 = vld [vmem:[#allocation123_spill] sm:$0xff] }
 0x475   : > { %v8857_v55 = vsel %vm5246_vm3, %v14965_v13, %v14964_v61  ;;  %v8855_v28 = vsel %vm5246_vm3, %v13595_v56, %v14974_v59  ;;  %v9244_v25 = vcombine.low %v9236_v18, %v9243_v14  ;;  %v14977_v60 = vcombine.high %v14976_v12, %v14976_v12  ;;  %9616 = vrot.lane.b32.xlu1 %v9193_v40, %s10401_s15  ;;  %v14985_v59 = vld [vmem:[#allocation30_spill] sm:$0xff] }
 0x476   : > { %v8848_v0 = vsel %vm5246_vm3, %v14967_v35, %v14966_v6  ;;  %v8861_v20 = vsel %vm5246_vm3, %v14970_v37, %v14968_v62  ;;  %v8856_v7 = vsel %vm5246_vm3, %v14973_v29, %v14971_v30  ;;  %v9253_v13 = vrot.slane %v9245_v53, %v14680_v48  ;;  %v14979_v6 = vld [vmem:[#allocation81_spill] sm:$0xff]  ;;  %v14980_v35 = vld [vmem:[#allocation126_spill] sm:$0xff] }
 0x477   : > { %v9246_v36 = vcombine.low %v8848_v0, %v8849_v16  ;;  %v9280_v44 = vcombine.low %v8856_v7, %v8857_v55  ;;  %v8860_v32 = vsel %vm5246_vm3, %v14977_v60, %v14975_v58  ;;  %v14978_v16 = vld [vmem:[#allocation118_spill] sm:$0xff]  ;;  %v9270_v56 = vrot.slane %v9262_v24, %v14680_v48  ;;  %v14107_v55 = vpop.permute.xlu0 %8578  ;;  %v14982_v24 = vld [vmem:[#allocation119_spill] sm:$0xff]  ;;  %v8577_v7 = vpop.permute.xlu1 %8576 }
 0x478   : > { %v8859_v61 = vsel %vm5246_vm3, %v14969_v11, %v14978_v16  ;;  %v8854_v8 = vsel %vm5246_vm3, %v14972_v39, %v14979_v6  ;;  %v9297_v14 = vcombine.low %v8860_v32, %v8861_v20  ;;  %v8858_v0 = vsel %vm5246_vm3, %v14976_v12, %v14980_v35  ;;  %v14981_v62 = vld [vmem:[#allocation114_spill] sm:$0xff]  ;;  %9622 = vrot.lane.b32.xlu0 %v9244_v25, %s10401_s15  ;;  %v14989_v60 = vld [vmem:[#allocation91_spill] sm:$0xff] }
 0x479   : > { %v9279_v18 = vcombine.low %v8854_v8, %v8855_v28  ;;  %v8863_v53 = vsel %vm5246_vm3, %v14981_v62, %v13742_v51  ;;  %v14983_v11 = vcombine.high %v14982_v24, %v14982_v24  ;;  %v9260_v20 = vrot.slane %v9246_v36, %v14680_v48  ;;  %v14986_v28 = vld [vmem:[#allocation27_spill] sm:$0xff]  ;;  %9620 = vrot.lane.b32.xlu1 %v9227_v27, %s10401_s15 }
 0x47a   : > { %v9278_v40 = vcombine.low %v9270_v56, %v9277_v10  ;;  %v9296_v30 = vcombine.low %v8858_v0, %v8859_v61  ;;  %v14984_v39 = vcombine.high %v14981_v62, %v14981_v62  ;;  %v9294_v51 = vrot.slane %v9280_v44, %v14680_v48 }
 0x47b   : > { %v8869_v37 = vsel %vm5246_vm3, %v14983_v11, %v13891_v15  ;;  %v8862_v58 = vsel %vm5246_vm3, %v14986_v28, %v14985_v59  ;;  %v14987_v15 = vld [vmem:[#allocation80_spill] sm:$0xff]  ;;  %v8867_v12 = vsel %vm5246_vm3, %v14982_v24, %v13853_v42  ;;  %v14990_v25 = vcombine.high %v14986_v28, %v14986_v28  ;;  %v8583_v61 = vpop.permute.xlu0 %8582  ;;  %v8581_v0 = vpop.permute.xlu1 %8580 }
 0x47c   : > { %v8865_v29 = vsel %vm5246_vm3, %v14984_v39, %v13790_v43  ;;  %v14988_v36 = vcombine.high %v14987_v15, %v14987_v15  ;;  %v9311_v43 = vrot.slane %v9297_v14, %v14680_v48  ;;  %v9313_v32 = vcombine.low %v8862_v58, %v8863_v53  ;;  %9626 = vrot.lane.b32.xlu0 %v9278_v40, %s10401_s15 }
 0x47d   : > { %v8864_v44 = vsel %vm5246_vm3, %v14990_v25, %v14989_v60  ;;  %v9287_v56 = vrot.slane %v9279_v18, %v14680_v48  ;;  %v8877_v6 = vsel %vm5246_vm3, %v6682_v33, %v8569_v31  ;;  %v9261_v8 = vcombine.low %v9253_v13, %v9260_v20 }
 0x47e   : > { %v8868_v10 = vsel %vm5246_vm3, %v14988_v36, %v13829_v4  ;;  %v8866_v4 = vsel %vm5246_vm3, %v14987_v15, %v13769_v34  ;;  %v9314_v42 = vcombine.low %v8864_v44, %v8865_v29  ;;  %v9304_v14 = vrot.slane %v9296_v30, %v14680_v48 }
 0x47f   : > { %v9331_v16 = vcombine.low %v8868_v10, %v8869_v37  ;;  %v9330_v35 = vcombine.low %v8866_v4, %v8867_v12  ;;  %v14160_v27 = vrot.slane %v6700_v49, %v11200_v21  ;;  %v9295_v34 = vcombine.low %v9287_v56, %v9294_v51  ;;  %9624 = vrot.lane.b32.xlu1 %v9261_v8, %s10401_s15  ;;  %v8587_v11 = vpop.permute.xlu0 %8586  ;;  %v8585_v29 = vpop.permute.xlu1 %8584  ;;  %v15000_v56 = vld [vmem:[#allocation144_spill] sm:$0xff] }
 0x480   : > { %v14991_v18 = vcombine.high %v13721_v9, %v13721_v9  ;;  %v14992_v31 = vcombine.high %v13727_v47, %v13727_v47  ;;  %v8875_v62 = vsel %vm5246_vm3, %v13733_v2, %v14018_v23  ;;  %v9312_v19 = vcombine.low %v9304_v14, %v9311_v43 }
 0x481   : > { %v9321_v49 = vrot.slane %v9313_v32, %v14680_v48  ;;  %v9345_v53 = vrot.slane %v9331_v16, %v14680_v48  ;;  %v14993_v37 = vcombine.high %v13709_v54, %v13709_v54  ;;  %v8871_v2 = vsel %vm5246_vm3, %v13721_v9, %v13936_v57  ;;  %v14998_v16 = vld [vmem:[#allocation101_spill] sm:$0xff] }
 0x482   : > { %v8873_v33 = vsel %vm5246_vm3, %v14991_v18, %v13975_v22  ;;  %v8876_v13 = vsel %vm5246_vm3, %v14992_v31, %v14000_v5  ;;  %v9328_v22 = vrot.slane %v9314_v42, %v14680_v48  ;;  %v8874_v23 = vsel %vm5246_vm3, %v13727_v47, %v13955_v52  ;;  %9630 = vrot.lane.b32.xlu0 %v9312_v19, %s10401_s15  ;;  %v15002_v31 = vld [vmem:[#allocation47_spill] sm:$0xff] }
 0x483   : > { %v9365_v24 = vcombine.low %v8876_v13, %v8877_v6  ;;  %v8872_v5 = vsel %vm5246_vm3, %v14993_v37, %v13914_v41  ;;  %v9338_v20 = vrot.slane %v9330_v35, %v14680_v48  ;;  %v8870_v40 = vsel %vm5246_vm3, %v13709_v54, %v13874_v17  ;;  %9628 = vrot.lane.b32.xlu1 %v9295_v34, %s10401_s15  ;;  %v8589_v32 = vpop.permute.xlu1 %8588 }
 0x484   : > { %v9348_v30 = vcombine.low %v8872_v5, %v8873_v33  ;;  %v9364_v39 = vcombine.low %v8874_v23, %v8875_v62  ;;  %v14994_v41 = vcombine.high %v13760_v63, %v13760_v63  ;;  %v14995_v57 = vcombine.high %v13737_v1, %v13737_v1 }
 0x485   : > { %v8883_v52 = vsel %vm5246_vm3, %v13763_v46, %v8581_v0  ;;  %v14996_v54 = vcombine.high %v13763_v46, %v13763_v46  ;;  %v9346_v51 = vcombine.low %v9338_v20, %v9345_v53  ;;  %v9347_v59 = vcombine.low %v8870_v40, %v8871_v2  ;;  %v15001_v0 = vld [vmem:[#allocation15_spill] sm:$0xff] }
 0x486   : > { %v8881_v9 = vsel %vm5246_vm3, %v14994_v41, %v8577_v7  ;;  %v8884_v47 = vsel %vm5246_vm3, %v14995_v57, %v8583_v61  ;;  %v9379_v28 = vrot.slane %v9365_v24, %v14680_v48  ;;  %v8591_v7 = vpop.permute.xlu0 %8590  ;;  %v9329_v15 = vcombine.low %v9321_v49, %v9328_v22  ;;  %v14999_v61 = vld [vmem:[#allocation50_spill] sm:$0xff] }
 0x487   : > { %v8885_v17 = vsel %vm5246_vm3, %v14996_v54, %v8585_v29  ;;  %v14997_v36 = vcombine.high %v13748_v3, %v13748_v3  ;;  %v8879_v46 = vsel %vm5246_vm3, %v13760_v63, %v14090_v45  ;;  %v8882_v12 = vsel %vm5246_vm3, %v13737_v1, %v14107_v55  ;;  %9634 = vrot.lane.b32.xlu0 %v9346_v51, %s10401_s15  ;;  %v8593_v33 = vpop.permute.xlu1 %8592 }
 0x488   : > { %v9399_v58 = vcombine.low %v8884_v47, %v8885_v17  ;;  %v9362_v43 = vrot.slane %v9348_v30, %v14680_v48  ;;  %v9372_v60 = vrot.slane %v9364_v39, %v14680_v48  ;;  %v9398_v44 = vcombine.low %v8882_v12, %v8883_v52  ;;  %9632 = vrot.lane.b32.xlu1 %v9329_v15, %s10401_s15 }
 0x489   : > { %v8880_v10 = vsel %vm5246_vm3, %v14997_v36, %v14068_v26  ;;  %v6733_v26 = vcombine.high %v14998_v16, %v14998_v16  ;;  %v2241_v4 = vadd.f32 %v15000_v56, %v14999_v61  ;;  %v8878_v63 = vsel %vm5246_vm3, %v13748_v3, %v14034_v50  ;;  %v15006_v61 = vld [vmem:[#allocation145_spill] sm:$0xff] }
 0x48a   : > { %v9382_v25 = vcombine.low %v8880_v10, %v8881_v9  ;;  %v9355_v1 = vrot.slane %v9347_v59, %v14680_v48  ;;  %v9380_v45 = vcombine.low %v9372_v60, %v9379_v28  ;;  %v9381_v55 = vcombine.low %v8878_v63, %v8879_v46  ;;  %v8595_v6 = vpop.permute.xlu0 %8594  ;;  %v15003_v28 = vld [vmem:[#allocation44_spill] sm:$0xff] }
 0x48b   : > { %v9413_v42 = vrot.slane %v9399_v58, %v14680_v48  ;;  %v6730_v8 = vcombine.high %v13797_v38, %v13797_v38  ;;  %v8887_v14 = vsel %vm5246_vm3, %v14160_v27, %v8589_v32  ;;  %v6732_v35 = vcombine.high %v14160_v27, %v14160_v27  ;;  %v8597_v20 = vpop.permute.xlu1 %8596  ;;  %v15004_v58 = vld [vmem:[#allocation69_spill] sm:$0xff] }
 0x48c   : > { %v6748_v3 = vcombine.high %v15001_v0, %v15001_v0  ;;  %v9363_v50 = vcombine.low %v9355_v1, %v9362_v43  ;;  %v9396_v34 = vrot.slane %v9382_v25, %v14680_v48  ;;  %v9406_v18 = vrot.slane %v9398_v44, %v14680_v48  ;;  %9638 = vrot.lane.b32.xlu0 %v9380_v45, %s10401_s15  ;;  %v15005_v43 = vld [vmem:[#allocation106_spill] sm:$0xff] }
 0x48d   : > { %v6123_v13 = vadd.f32 %v15002_v31, %v2241_v4  ;;  %v8886_v62 = vsel %vm5246_vm3, %v13797_v38, %v8587_v11  ;;  %v8888_v19 = vsel %vm5246_vm3, %v6730_v8, %v8591_v7  ;;  %v8889_v27 = vsel %vm5246_vm3, %v6732_v35, %v8593_v33 }
 0x48e   : > { %v9389_v49 = vrot.slane %v9381_v55, %v14680_v48  ;;  %v9414_v53 = vcombine.low %v9406_v18, %v9413_v42  ;;  %v9415_v24 = vcombine.low %v8886_v62, %v8887_v14  ;;  %v9416_v22 = vcombine.low %v8888_v19, %v8889_v27  ;;  %9636 = vrot.lane.b32.xlu1 %v9363_v50, %s10401_s15  ;;  %v8599_v37 = vpop.permute.xlu0 %8598 }
 0x48f   : > { %v6756_v5 = vrot.slane %v15001_v0, %v11200_v21  ;;  %v6770_v2 = vrot.slane %v6748_v3, %v11200_v21  ;;  %v6747_v23 = vrot.slane %v6733_v26, %v11200_v21  ;;  %v6139_v30 = vmax.f32 %v6123_v13, 0.0  ;;  %v8601_v17 = vpop.permute.xlu1 %8600 }
 0x490   : > { %v9397_v38 = vcombine.low %v9389_v49, %v9396_v34  ;;  %v9430_v11 = vrot.slane %v9416_v22, %v14680_v48  ;;  %9642 = vrot.lane.b32.xlu0 %v9414_v53, %s10401_s15  ;;  %v9423_v39 = vrot.slane %v9415_v24, %v14680_v48  ;;  %v1460_v7 = vadd.f32 %v15004_v58, %v15003_v28  ;;  %v15010_v58 = vld [vmem:[#allocation140_spill] sm:$0xff] }
 0x491   : > { %v8891_v40 = vsel %vm5246_vm3, %v6770_v2, %v8597_v20  ;;  %v8890_v41 = vsel %vm5246_vm3, %v6756_v5, %v8595_v6  ;;  %v6778_v9 = vcombine.high %v6756_v5, %v6756_v5  ;;  %v6780_v57 = vcombine.high %v6770_v2, %v6770_v2 }
 0x492   : > { %9640 = vrot.lane.b32.xlu1 %v9397_v38, %s10401_s15  ;;  %v8603_v29 = vpop.permute.xlu0 %8602  ;;  %v6749_v47 = vcombine.high %v6747_v23, %v6747_v23  ;;  %v9431_v52 = vcombine.low %v9423_v39, %v9430_v11  ;;  %v9432_v54 = vcombine.low %v8890_v41, %v8891_v40  ;;  %v6789_v10 = vrot.slane %v6139_v30, %v11200_v21  ;;  %v15007_v40 = vld [vmem:[#allocation64_spill] sm:$0xff] }
 0x493   : > { %v8892_v51 = vsel %vm5246_vm3, %v6778_v9, %v8599_v37  ;;  %v8893_v59 = vsel %vm5246_vm3, %v6780_v57, %v8601_v17  ;;  %v6763_v46 = vrot.slane %v6747_v23, %v11200_v21  ;;  %v2003_v60 = vadd.f32 %v15005_v43, %v1460_v7  ;;  %v8605_v32 = vpop.permute.xlu1 %8604 }
 0x494   : > { %v9433_v15 = vcombine.low %v8892_v51, %v8893_v59  ;;  %v6777_v12 = vrot.slane %v6749_v47, %v11200_v21  ;;  %v9440_v25 = vrot.slane %v9432_v54, %v14680_v48  ;;  %v6782_v26 = vcombine.high %v6139_v30, %v6139_v30  ;;  %v15008_v30 = vld [vmem:[#allocation38_spill] sm:$0xff] }
 0x495   : > { %v2242_v56 = vadd.f32 %v15006_v61, %v2003_v60  ;;  %v8894_v1 = vsel %vm5246_vm3, %v6763_v46, %v8603_v29  ;;  %v6779_v45 = vcombine.high %v6763_v46, %v6763_v46  ;;  %v6797_v42 = vcombine.high %v6789_v10, %v6789_v10 }
 0x496   : > { %9644 = vrot.lane.b32.xlu1 %v9431_v52, %s10401_s15  ;;  %v8607_v36 = vpop.permute.xlu0 %8606  ;;  %v9447_v44 = vrot.slane %v9433_v15, %v14680_v48  ;;  %v8895_v16 = vsel %vm5246_vm3, %v6777_v12, %v8605_v32  ;;  %v6781_v55 = vcombine.high %v6777_v12, %v6777_v12  ;;  %v6805_v34 = vrot.slane %v6789_v10, %v11200_v21  ;;  %v15009_v52 = vld [vmem:[#allocation94_spill] sm:$0xff] }
 0x497   : > { %v9449_v6 = vcombine.low %v8894_v1, %v8895_v16  ;;  %v8609_v8 = vpop.permute.xlu1 %8608  ;;  %v8896_v14 = vsel %vm5246_vm3, %v6779_v45, %v8607_v36  ;;  %v6124_v0 = vadd.f32 %v15002_v31, %v2242_v56  ;;  %v6819_v18 = vrot.slane %v6797_v42, %v11200_v21 }
 0x498   : > { %v9448_v4 = vcombine.low %v9440_v25, %v9447_v44  ;;  %v8897_v35 = vsel %vm5246_vm3, %v6781_v55, %v8609_v8  ;;  %v6796_v33 = vrot.slane %v6782_v26, %v11200_v21  ;;  %v6827_v37 = vcombine.high %v6805_v34, %v6805_v34 }
 0x499   : > { %v9450_v3 = vcombine.low %v8896_v14, %v8897_v35  ;;  %v9457_v13 = vrot.slane %v9449_v6, %v14680_v48  ;;  %v6140_v49 = vmax.f32 %v6124_v0, 0.0  ;;  %v6829_v5 = vcombine.high %v6819_v18, %v6819_v18 }
 0x49a   : > { %v8611_v63 = vpop.permute.xlu0 %8610  ;;  %9646 = vrot.lane.b32.xlu0 %v9448_v4, %s10401_s15  ;;  %v6798_v2 = vcombine.high %v6796_v33, %v6796_v33  ;;  %v1461_v39 = vadd.f32 %v15008_v30, %v15007_v40  ;;  %v6812_v57 = vrot.slane %v6796_v33, %v11200_v21 }
 0x49b   : > { %v9464_v62 = vrot.slane %v9450_v3, %v14680_v48  ;;  %v8613_v19 = vpop.permute.xlu1 %8612  ;;  %v8898_v22 = vsel %vm5246_vm3, %v6805_v34, %v8611_v63  ;;  %v6838_v9 = vrot.slane %v6140_v49, %v11200_v21  ;;  %v6831_v15 = vcombine.high %v6140_v49, %v6140_v49 }
 0x49c   : > { %v8899_v27 = vsel %vm5246_vm3, %v6819_v18, %v8613_v19  ;;  %v6826_v47 = vrot.slane %v6798_v2, %v11200_v21  ;;  %v2004_v54 = vadd.f32 %v15009_v52, %v1461_v39  ;;  %v6828_v12 = vcombine.high %v6812_v57, %v6812_v57  ;;  %v15011_v19 = vld [vmem:[#allocation67_spill] sm:$0xff]  ;;  %v15013_v2 = vld [vmem:[#allocation104_spill] sm:$0xff]  ;;  %v15014_v39 = vld [vmem:[#allocation141_spill] sm:$0xff] }
 0x49d   : > { %v9465_v53 = vcombine.low %v9457_v13, %v9464_v62  ;;  %v9466_v23 = vcombine.low %v8898_v22, %v8899_v27  ;;  %v6846_v60 = vcombine.high %v6838_v9, %v6838_v9  ;;  %v6854_v4 = vrot.slane %v6838_v9, %v11200_v21  ;;  %v15012_v27 = vld [vmem:[#allocation42_spill] sm:$0xff] }
 0x49e   : > { %v8615_v50 = vpop.permute.xlu0 %8614  ;;  %v2243_v7 = vadd.f32 %v15010_v58, %v2004_v54  ;;  %v6830_v43 = vcombine.high %v6826_v47, %v6826_v47  ;;  %v6845_v1 = vrot.slane %v6831_v15, %v11200_v21  ;;  %v1462_v49 = vadd.f32 %v15012_v27, %v15011_v19 }
 0x49f   : > { %v8617_v38 = vpop.permute.xlu1 %8616  ;;  %9648 = vrot.lane.b32.xlu1 %v9465_v53, %s10401_s15  ;;  %v8900_v11 = vsel %vm5246_vm3, %v6827_v37, %v8615_v50  ;;  %v9474_v17 = vrot.slane %v9466_v23, %v14680_v48  ;;  %v6868_v63 = vrot.slane %v6846_v60, %v11200_v21  ;;  %v6876_v3 = vcombine.high %v6854_v4, %v6854_v4 }
 0x4a0   : > { %v8901_v20 = vsel %vm5246_vm3, %v6829_v5, %v8617_v38  ;;  %v6125_v26 = vadd.f32 %v15002_v31, %v2243_v7  ;;  %v6847_v34 = vcombine.high %v6845_v1, %v6845_v1  ;;  %v6861_v37 = vrot.slane %v6845_v1, %v11200_v21 }
 0x4a1   : > { %v9467_v29 = vcombine.low %v8900_v11, %v8901_v20  ;;  %v6878_v50 = vcombine.high %v6868_v63, %v6868_v63  ;;  %v2005_v23 = vadd.f32 %v15013_v2, %v1462_v49 }
 0x4a2   : > { %v8619_v24 = vpop.permute.xlu0 %8618  ;;  %v6141_v8 = vmax.f32 %v6125_v26, 0.0  ;;  %v6875_v5 = vrot.slane %v6847_v34, %v11200_v21 }
 0x4a3   : > { %v9481_v51 = vrot.slane %v9467_v29, %v14680_v48  ;;  %v8621_v59 = vpop.permute.xlu1 %8620  ;;  %v8902_v46 = vsel %vm5246_vm3, %v6812_v57, %v8619_v24  ;;  %v2244_v29 = vadd.f32 %v15014_v39, %v2005_v23 }
 0x4a4   : > { %v8903_v28 = vsel %vm5246_vm3, %v6826_v47, %v8621_v59  ;;  %v6887_v22 = vrot.slane %v6141_v8, %v11200_v21  ;;  %v6880_v30 = vcombine.high %v6141_v8, %v6141_v8  ;;  %v6877_v47 = vcombine.high %v6861_v37, %v6861_v37 }
 0x4a5   : > { %v9482_v36 = vcombine.low %v9474_v17, %v9481_v51  ;;  %v9483_v25 = vcombine.low %v8902_v46, %v8903_v28  ;;  %v6879_v52 = vcombine.high %v6875_v5, %v6875_v5  ;;  %v6126_v58 = vadd.f32 %v15002_v31, %v2244_v29 }
 0x4a6   : > { %v8623_v41 = vpop.permute.xlu0 %8622  ;;  %v6895_v54 = vcombine.high %v6887_v22, %v6887_v22  ;;  %v6894_v46 = vrot.slane %v6880_v30, %v11200_v21 }
 0x4a7   : > { %v8625_v44 = vpop.permute.xlu1 %8624  ;;  %9650 = vrot.lane.b32.xlu0 %v9482_v36, %s10401_s15  ;;  %v8904_v32 = vsel %vm5246_vm3, %v6828_v12, %v8623_v41  ;;  %v9491_v45 = vrot.slane %v9483_v25, %v14680_v48  ;;  %v6903_v36 = vrot.slane %v6887_v22, %v11200_v21 }
 0x4a8   : > { %v8905_v16 = vsel %vm5246_vm3, %v6830_v43, %v8625_v44  ;;  %v6142_v44 = vmax.f32 %v6126_v58, 0.0  ;;  %v6910_v8 = vrot.slane %v6894_v46, %v11200_v21 }
 0x4a9   : > { %v9484_v61 = vcombine.low %v8904_v32, %v8905_v16  ;;  %v6925_v26 = vcombine.high %v6903_v36, %v6903_v36 }
 0x4aa   : > { %v8627_v10 = vpop.permute.xlu0 %8626  ;;  %v6929_v34 = vcombine.high %v6142_v44, %v6142_v44 }
 0x4ab   : > { %v9498_v55 = vrot.slane %v9484_v61, %v14680_v48  ;;  %v8629_v42 = vpop.permute.xlu1 %8628  ;;  %v8906_v0 = vsel %vm5246_vm3, %v6854_v4, %v8627_v10  ;;  %v6917_v10 = vrot.slane %v6895_v54, %v11200_v21 }
 0x4ac   : > { %v8907_v6 = vsel %vm5246_vm3, %v6868_v63, %v8629_v42 }
 0x4ad   : > { %v9499_v14 = vcombine.low %v9491_v45, %v9498_v55  ;;  %v9500_v18 = vcombine.low %v8906_v0, %v8907_v6  ;;  %v6927_v61 = vcombine.high %v6917_v10, %v6917_v10  ;;  %v6936_v6 = vrot.slane %v6142_v44, %v11200_v21 }
 0x4ae   : > { %v8631_v56 = vpop.permute.xlu0 %8630 }
 0x4af   : > { %v8633_v33 = vpop.permute.xlu1 %8632  ;;  %9652 = vrot.lane.b32.xlu1 %v9499_v14, %s10401_s15  ;;  %v8908_v13 = vsel %vm5246_vm3, %v6876_v3, %v8631_v56  ;;  %v9508_v38 = vrot.slane %v9500_v18, %v14680_v48  ;;  %v6896_v56 = vcombine.high %v6894_v46, %v6894_v46  ;;  %v6944_v27 = vcombine.high %v6936_v6, %v6936_v6 }
 0x4b0   : > { %v8909_v62 = vsel %vm5246_vm3, %v6878_v50, %v8633_v33  ;;  %v6952_v2 = vrot.slane %v6936_v6, %v11200_v21 }
 0x4b1   : > { %v9501_v53 = vcombine.low %v8908_v13, %v8909_v62  ;;  %v6924_v14 = vrot.slane %v6896_v56, %v11200_v21  ;;  %v6926_v62 = vcombine.high %v6910_v8, %v6910_v8  ;;  %v6966_v23 = vrot.slane %v6944_v27, %v11200_v21 }
 0x4b2   : > { %v8635_v35 = vpop.permute.xlu0 %8634 }
 0x4b3   : > { %v9515_v11 = vrot.slane %v9501_v53, %v14680_v48  ;;  %v8637_v20 = vpop.permute.xlu1 %8636  ;;  %v8910_v57 = vsel %vm5246_vm3, %v6861_v37, %v8635_v35  ;;  %v6928_v19 = vcombine.high %v6924_v14, %v6924_v14 }
 0x4b4   : > { %v8911_v40 = vsel %vm5246_vm3, %v6875_v5, %v8637_v20 }
 0x4b5   : > { %v9516_v41 = vcombine.low %v9508_v38, %v9515_v11  ;;  %v9517_v17 = vcombine.low %v8910_v57, %v8911_v40  ;;  %v6943_v38 = vrot.slane %v6929_v34, %v11200_v21  ;;  %v6976_v57 = vcombine.high %v6966_v23, %v6966_v23 }
 0x4b6   : > { %v8639_v24 = vpop.permute.xlu0 %8638 }
 0x4b7   : > { %v8641_v51 = vpop.permute.xlu1 %8640  ;;  %9654 = vrot.lane.b32.xlu0 %v9516_v41, %s10401_s15  ;;  %v8912_v59 = vsel %vm5246_vm3, %v6877_v47, %v8639_v24  ;;  %v9525_v12 = vrot.slane %v9517_v17, %v14680_v48  ;;  %v6945_v47 = vcombine.high %v6943_v38, %v6943_v38  ;;  %v6959_v58 = vrot.slane %v6943_v38, %v11200_v21 }
 0x4b8   : > { %v8913_v28 = vsel %vm5246_vm3, %v6879_v52, %v8641_v51 }
 0x4b9   : > { %v9518_v7 = vcombine.low %v8912_v59, %v8913_v28 }
 0x4ba   : > { %v8643_v9 = vpop.permute.xlu0 %8642 }
 0x4bb   : > { %v9532_v43 = vrot.slane %v9518_v7, %v14680_v48  ;;  %v8645_v60 = vpop.permute.xlu1 %8644  ;;  %v8914_v31 = vsel %vm5246_vm3, %v6903_v36, %v8643_v9  ;;  %v6974_v9 = vcombine.high %v6952_v2, %v6952_v2  ;;  %v6973_v7 = vrot.slane %v6945_v47, %v11200_v21 }
 0x4bc   : > { %v8915_v25 = vsel %vm5246_vm3, %v6917_v10, %v8645_v60 }
 0x4bd   : > { %v9533_v32 = vcombine.low %v9525_v12, %v9532_v43  ;;  %v9534_v4 = vcombine.low %v8914_v31, %v8915_v25  ;;  %v6975_v25 = vcombine.high %v6959_v58, %v6959_v58  ;;  %v6977_v44 = vcombine.high %v6973_v7, %v6973_v7 }
 0x4be   : > { %v8647_v15 = vpop.permute.xlu0 %8646 }
 0x4bf   : > { %v8649_v63 = vpop.permute.xlu1 %8648  ;;  %9656 = vrot.lane.b32.xlu1 %v9533_v32, %s10401_s15  ;;  %v8916_v1 = vsel %vm5246_vm3, %v6925_v26, %v8647_v15  ;;  %v9542_v35 = vrot.slane %v9534_v4, %v14680_v48 }
 0x4c0   : > { %v8917_v45 = vsel %vm5246_vm3, %v6927_v61, %v8649_v63 }
 0x4c1   : > { %v9535_v55 = vcombine.low %v8916_v1, %v8917_v45 }
 0x4c2   : > { %v8651_v16 = vpop.permute.xlu0 %8650 }
 0x4c3   : > { %v9549_v0 = vrot.slane %v9535_v55, %v14680_v48  ;;  %v8653_v3 = vpop.permute.xlu1 %8652  ;;  %v8918_v13 = vsel %vm5246_vm3, %v6910_v8, %v8651_v16 }
 0x4c4   : > { %v8919_v50 = vsel %vm5246_vm3, %v6924_v14, %v8653_v3 }
 0x4c5   : > { %v9550_v18 = vcombine.low %v9542_v35, %v9549_v0  ;;  %v9551_v49 = vcombine.low %v8918_v13, %v8919_v50 }
 0x4c6   : > { %v8655_v42 = vpop.permute.xlu0 %8654 }
 0x4c7   : > { %v8657_v53 = vpop.permute.xlu1 %8656  ;;  %9658 = vrot.lane.b32.xlu0 %v9550_v18, %s10401_s15  ;;  %v8920_v24 = vsel %vm5246_vm3, %v6926_v62, %v8655_v42  ;;  %v9559_v11 = vrot.slane %v9551_v49, %v14680_v48 }
 0x4c8   : > { %v8921_v22 = vsel %vm5246_vm3, %v6928_v19, %v8657_v53 }
 0x4c9   : > { %v9552_v37 = vcombine.low %v8920_v24, %v8921_v22 }
 0x4ca   : > { %v8659_v33 = vpop.permute.xlu0 %8658 }
 0x4cb   : > { %v9566_v20 = vrot.slane %v9552_v37, %v14680_v48  ;;  %v8661_v40 = vpop.permute.xlu1 %8660  ;;  %v8922_v41 = vsel %vm5246_vm3, %v6952_v2, %v8659_v33 }
 0x4cc   : > { %v8923_v30 = vsel %vm5246_vm3, %v6966_v23, %v8661_v40 }
 0x4cd   : > { %v9567_v39 = vcombine.low %v9559_v11, %v9566_v20  ;;  %v9568_v52 = vcombine.low %v8922_v41, %v8923_v30 }
 0x4ce   : > { %v8663_v5 = vpop.permute.xlu0 %8662 }
 0x4cf   : > { %v8665_v54 = vpop.permute.xlu1 %8664  ;;  %9660 = vrot.lane.b32.xlu1 %v9567_v39, %s10401_s15  ;;  %v8924_v17 = vsel %vm5246_vm3, %v6974_v9, %v8663_v5  ;;  %v9576_v15 = vrot.slane %v9568_v52, %v14680_v48 }
 0x4d0   : > { %v8925_v51 = vsel %vm5246_vm3, %v6976_v57, %v8665_v54 }
 0x4d1   : > { %v9569_v59 = vcombine.low %v8924_v17, %v8925_v51 }
 0x4d2   : > { %v8667_v29 = vpop.permute.xlu0 %8666 }
 0x4d3   : > { %v9583_v36 = vrot.slane %v9569_v59, %v14680_v48  ;;  %v8669_v10 = vpop.permute.xlu1 %8668  ;;  %v8926_v60 = vsel %vm5246_vm3, %v6959_v58, %v8667_v29 }
 0x4d4   : > { %v8927_v46 = vsel %vm5246_vm3, %v6973_v7, %v8669_v10 }
 0x4d5   : > { %v9584_v12 = vcombine.low %v9576_v15, %v9583_v36  ;;  %v9585_v32 = vcombine.low %v8926_v60, %v8927_v46 }
 0x4d6   : > { %v8671_v28 = vpop.permute.xlu0 %8670 }
 0x4d7   : > { %v8673_v21 = vpop.permute.xlu1 %8672  ;;  %9662 = vrot.lane.b32.xlu0 %v9584_v12, %s10401_s15  ;;  %v8928_v16 = vsel %vm5246_vm3, %v6975_v25, %v8671_v28  ;;  %v9593_v56 = vrot.slane %v9585_v32, %v14680_v48 }
 0x4d8   : > { %v8929_v31 = vsel %vm5246_vm3, %v6977_v44, %v8673_v21 }
 0x4d9   : > { %v9586_v26 = vcombine.low %v8928_v16, %v8929_v31 }
 0x4da   : > { %v9603_v43 = vpop.permute.xlu0 %9602 }
 0x4db   : > { %9988 = vst.msk [vmem:[%s11658_s16 + $0x20] sm:$0xff] %vm423_vm1, %v9603_v43  ;;  %v9600_v4 = vrot.slane %v9586_v26, %v14680_v48  ;;  %v9605_v63 = vpop.permute.xlu1 %9604 }
 0x4dc   : > { %9989 = vst.msk [vmem:[%s11658_s16 + $0x28] sm:$0xff] %vm423_vm1, %v9605_v63 }
 0x4dd   : > { %v9601_v1 = vcombine.low %v9593_v56, %v9600_v4 }
 0x4de   : > { %v9607_v61 = vpop.permute.xlu0 %9606 }
 0x4df   : > { %9990 = vst.msk [vmem:[%s11658_s16 + $0x30] sm:$0xff] %vm423_vm1, %v9607_v61  ;;  %v9609_v55 = vpop.permute.xlu1 %9608  ;;  %9664 = vrot.lane.b32.xlu1 %v9601_v1, %s10401_s15 }
 0x4e0   : > { %9991 = vst.msk [vmem:[%s11658_s16 + $0x38] sm:$0xff] %vm423_vm1, %v9609_v55 }
 0x4e2   : > { %v9611_v45 = vpop.permute.xlu0 %9610 }
 0x4e3   : > { %9992 = vst.msk [vmem:[%s11658_s16 + $0x60] sm:$0xff] %vm423_vm1, %v9611_v45  ;;  %v9613_v48 = vpop.permute.xlu1 %9612 }
 0x4e4   : > { %9993 = vst.msk [vmem:[%s11658_s16 + $0x68] sm:$0xff] %vm423_vm1, %v9613_v48 }
 0x4e6   : > { %v9615_v42 = vpop.permute.xlu0 %9614 }
 0x4e7   : > { %9994 = vst.msk [vmem:[%s11658_s16 + $0x70] sm:$0xff] %vm423_vm1, %v9615_v42  ;;  %v9617_v8 = vpop.permute.xlu1 %9616 }
 0x4e8   : > { %9995 = vst.msk [vmem:[%s11658_s16 + $0x78] sm:$0xff] %vm423_vm1, %v9617_v8 }
 0x4ea   : > { %v9619_v6 = vpop.permute.xlu0 %9618 }
 0x4eb   : > { %9996 = vst.msk [vmem:[%s11658_s16 + $0xa0] sm:$0xff] %vm423_vm1, %v9619_v6  ;;  %v9621_v35 = vpop.permute.xlu1 %9620 }
 0x4ec   : > { %9997 = vst.msk [vmem:[%s11658_s16 + $0xa8] sm:$0xff] %vm423_vm1, %v9621_v35 }
 0x4ee   : > { %v9623_v14 = vpop.permute.xlu0 %9622 }
 0x4ef   : > { %9998 = vst.msk [vmem:[%s11658_s16 + $0xb0] sm:$0xff] %vm423_vm1, %v9623_v14 }
 0x4f1   : > { %v9625_v3 = vpop.permute.xlu1 %9624 }
 0x4f2   : > { %v9627_v0 = vpop.permute.xlu0 %9626  ;;  %9999 = vst.msk [vmem:[%s11658_s16 + $0xb8] sm:$0xff] %vm423_vm1, %v9625_v3 }
 0x4f3   : > { %10000 = vst.msk [vmem:[%s11658_s16 + $0xe0] sm:$0xff] %vm423_vm1, %v9627_v0 }
 0x4f5   : > { %v9629_v34 = vpop.permute.xlu1 %9628 }
 0x4f6   : > { %v9631_v50 = vpop.permute.xlu0 %9630  ;;  %10001 = vst.msk [vmem:[%s11658_s16 + $0xe8] sm:$0xff] %vm423_vm1, %v9629_v34 }
 0x4f7   : > { %10002 = vst.msk [vmem:[%s11658_s16 + $0xf0] sm:$0xff] %vm423_vm1, %v9631_v50 }
 0x4fa   : > { %v9635_v18 = vpop.permute.xlu0 %9634  ;;  %v9633_v33 = vpop.permute.xlu1 %9632 }
 0x4fb   : > { %10004 = vst.msk [vmem:[%s11658_s16 + $0x120] sm:$0xff] %vm423_vm1, %v9635_v18  ;;  %10003 = vst.msk [vmem:[%s11658_s16 + $0xf8] sm:$0xff] %vm423_vm1, %v9633_v33 }
 0x4fe   : > { %v9639_v13 = vpop.permute.xlu0 %9638 }
 0x4ff   : > { %10006 = vst.msk [vmem:[%s11658_s16 + $0x130] sm:$0xff] %vm423_vm1, %v9639_v13 }
 0x500   : > { %v9637_v62 = vpop.permute.xlu1 %9636 }
 0x501   : > { %10005 = vst.msk [vmem:[%s11658_s16 + $0x128] sm:$0xff] %vm423_vm1, %v9637_v62 }
 0x502   : > { %v9643_v19 = vpop.permute.xlu0 %9642 }
 0x503   : > { %10008 = vst.msk [vmem:[%s11658_s16 + $0x160] sm:$0xff] %vm423_vm1, %v9643_v19 }
 0x504   : > { %v9641_v27 = vpop.permute.xlu1 %9640 }
 0x505   : > { %10007 = vst.msk [vmem:[%s11658_s16 + $0x138] sm:$0xff] %vm423_vm1, %v9641_v27 }
 0x508   : > { %v9645_v49 = vpop.permute.xlu1 %9644 }
 0x509   : > { %10009 = vst.msk [vmem:[%s11658_s16 + $0x168] sm:$0xff] %vm423_vm1, %v9645_v49 }
 0x50c   : > { %v9647_v53 = vpop.permute.xlu0 %9646 }
 0x50d   : > { %10010 = vst.msk [vmem:[%s11658_s16 + $0x170] sm:$0xff] %vm423_vm1, %v9647_v53 }
 0x511   : > { %v9649_v24 = vpop.permute.xlu1 %9648 }
 0x512   : > { %10011 = vst.msk [vmem:[%s11658_s16 + $0x178] sm:$0xff] %vm423_vm1, %v9649_v24 }
 0x519   : > { %v9651_v22 = vpop.permute.xlu0 %9650 }
 0x51a   : > { %10012 = vst.msk [vmem:[%s11658_s16 + $0x1a0] sm:$0xff] %vm423_vm1, %v9651_v22 }
 0x521   : > { %v9653_v37 = vpop.permute.xlu1 %9652 }
 0x522   : > { %10013 = vst.msk [vmem:[%s11658_s16 + $0x1a8] sm:$0xff] %vm423_vm1, %v9653_v37 }
 0x529   : > { %v9655_v5 = vpop.permute.xlu0 %9654 }
 0x52a   : > { %10014 = vst.msk [vmem:[%s11658_s16 + $0x1b0] sm:$0xff] %vm423_vm1, %v9655_v5 }
 0x531   : > { %v9657_v2 = vpop.permute.xlu1 %9656 }
 0x532   : > { %10015 = vst.msk [vmem:[%s11658_s16 + $0x1b8] sm:$0xff] %vm423_vm1, %v9657_v2 }
 0x539   : > { %v9659_v23 = vpop.permute.xlu0 %9658 }
 0x53a   : > { %10016 = vst.msk [vmem:[%s11658_s16 + $0x1e0] sm:$0xff] %vm423_vm1, %v9659_v23 }
 0x541   : > { %v9661_v38 = vpop.permute.xlu1 %9660 }
 0x542   : > { %10017 = vst.msk [vmem:[%s11658_s16 + $0x1e8] sm:$0xff] %vm423_vm1, %v9661_v38 }
 0x549   : > { %v9663_v11 = vpop.permute.xlu0 %9662 }
 0x54a   : > { %10018 = vst.msk [vmem:[%s11658_s16 + $0x1f0] sm:$0xff] %vm423_vm1, %v9663_v11 }
 0x551   : > { %v9665_v20 = vpop.permute.xlu1 %9664 }
 0x552   : > { %10019 = vst.msk [vmem:[%s11658_s16 + $0x1f8] sm:$0xff] %vm423_vm1, %v9665_v20 }
 0x553 PF: > { %s15_s22 = sadd.s32 1, %s10393_s22   ;;  %s15015_s18 = smov %s10385_s20 }
 0x554   : > { %p12_p12 = scmp.ge.s32.totalorder %s15_s22, 6   ;;  %s15016_s19 = smov %s10389_s21 }
 0x555   : > { %s15017_s20 = smov %s15020_s23  ;;  %s15018_s21 = smov %s15024_s24 }
 0x556   :  { %14 = sbr.rel (!%p12_p12) target bundleno = 3 (0x3), region = 80 }

</bundles_post_ra>
